<compile_context>
chip_gen: v7x
topology: tpu7x:2x2x1
jax: 0.10.0
libtpu: 0.0.40
codegen_flags: <defaults>
</compile_context>

<pallas_src>
import functools

import jax
import jax.numpy as jnp
import numpy as np
from jax.experimental import pallas as pl
from jax.experimental.pallas import tpu as pltpu

BN_EPS = 1e-5
C_PAD = 128   # lane-dense channel padding for all activations / weight columns
K = 5         # conv kernel size
STRIDE = 2    # conv stride


# ----------------------------------------------------------------------------
# Pallas kernels
# ----------------------------------------------------------------------------
def conv_bn_relu_kernel(p_ref, w_ref, g_ref, b_ref, o_ref):
    """im2col-matmul conv (no bias; cancelled by BN) + BatchNorm(train) + ReLU.

    p_ref: [M, Kd]      im2col patches (M = N*OH*OW, Kd multiple of 128)
    w_ref: [Kd, 128]    conv weight, rows ordered (kh, kw, cin), Cout padded
    g_ref: [1, 128]     BN gamma (zero in padded channels)
    b_ref: [1, 128]     BN beta  (zero in padded channels)
    o_ref: [M, 128]     lane-dense output
    """
    y = jnp.dot(p_ref[...], w_ref[...], preferred_element_type=jnp.float32)
    mean = jnp.mean(y, axis=0, keepdims=True)
    var = jnp.mean((y - mean) ** 2, axis=0, keepdims=True)
    y_hat = (y - mean) * jax.lax.rsqrt(var + BN_EPS)
    o_ref[...] = jnp.maximum(y_hat * g_ref[...] + b_ref[...], 0.0)


def conv_bn_relu_head_kernel(p_ref, w_ref, g_ref, b_ref, wh_ref, bh_ref, o_ref,
                             *, n_batch):
    """conv3 (im2col matmul) + BN + ReLU + Linear head, fused in one kernel.

    p_ref:  [N*OH*OW, Kd]          conv3 patches
    w_ref:  [Kd, 128]              conv3 weight (Cout padded to 128)
    wh_ref: [OH*OW*128, 128]       head weight, columns permuted to NHWC
                                   (+channel-pad) flatten order, O padded
    bh_ref: [1, 128]               head bias (padded)
    o_ref:  [N, 128]               padded Q-values (slice [:, :outputs] outside)
    """
    y = jnp.dot(p_ref[...], w_ref[...], preferred_element_type=jnp.float32)
    mean = jnp.mean(y, axis=0, keepdims=True)
    var = jnp.mean((y - mean) ** 2, axis=0, keepdims=True)
    a = jnp.maximum((y - mean) * jax.lax.rsqrt(var + BN_EPS) * g_ref[...]
                    + b_ref[...], 0.0)                    # [N*OH*OW, 128]
    flat = a.reshape(n_batch, -1)                         # [N, OH*OW*128]
    o_ref[...] = (jnp.dot(flat, wh_ref[...], preferred_element_type=jnp.float32)
                  + bh_ref[...])


def _vmem_spec():
    return pl.BlockSpec(memory_space=pltpu.MemorySpace.VMEM)


def conv_bn_relu_pallas(patches, w_flat, gamma, beta):
    M = patches.shape[0]
    cout = w_flat.shape[1]
    return pl.pallas_call(
        conv_bn_relu_kernel,
        out_shape=jax.ShapeDtypeStruct((M, cout), jnp.float32),
        in_specs=[_vmem_spec()] * 4,
        out_specs=_vmem_spec(),
    )(patches, w_flat, gamma, beta)


def conv_bn_relu_head_pallas(patches, w_flat, gamma, beta, wh, bh, *, n_batch):
    o_pad = wh.shape[1]
    return pl.pallas_call(
        functools.partial(conv_bn_relu_head_kernel, n_batch=n_batch),
        out_shape=jax.ShapeDtypeStruct((n_batch, o_pad), jnp.float32),
        in_specs=[_vmem_spec()] * 6,
        out_specs=_vmem_spec(),
    )(patches, w_flat, gamma, beta, wh, bh)


# ----------------------------------------------------------------------------
# Glue: NHWC im2col (layout plumbing only; all FLOPs stay in the Pallas kernels)
# TODO(synk): at realistic DQN scale (batch 128+, 84x84), move im2col in-kernel
# (DMA the NHWC tile once, build the 25 shifted views on the XLU/load slots)
# and add an M-grid with cross-tile BN stat accumulation for v7x's 2 TCs.
# ----------------------------------------------------------------------------
def im2col_nhwc(x, k, stride, kd_pad):
    """x: [N, H, W, C] -> patches [N*OH*OW, k*k*C], column order (kh, kw, c)."""
    N, H, W, C = x.shape
    OH = (H - k) // stride + 1
    OW = (W - k) // stride + 1
    cols = []
    for kh in range(k):
        for kw in range(k):
            cols.append(x[:, kh:kh + stride * OH:stride,
                          kw:kw + stride * OW:stride, :])   # [N, OH, OW, C]
    p = jnp.stack(cols, axis=3)                              # [N, OH, OW, k*k, C]
    p = p.reshape(N * OH * OW, k * k * C)
    if kd_pad > p.shape[1]:
        p = jnp.pad(p, ((0, 0), (0, kd_pad - p.shape[1])))
    return p, OH, OW


def dqn_forward(x_nchw, prep, *, outputs):
    # Single NCHW -> NHWC transpose at the entry; everything stays NHWC after.
    x = jnp.transpose(x_nchw, (0, 2, 3, 1))
    N = x.shape[0]

    p1, oh1, ow1 = im2col_nhwc(x, K, STRIDE, prep["w1"].shape[0])
    a1 = conv_bn_relu_pallas(p1, prep["w1"], prep["g1"], prep["be1"])
    a1 = a1.reshape(N, oh1, ow1, C_PAD)

    p2, oh2, ow2 = im2col_nhwc(a1, K, STRIDE, prep["w2"].shape[0])
    a2 = conv_bn_relu_pallas(p2, prep["w2"], prep["g2"], prep["be2"])
    a2 = a2.reshape(N, oh2, ow2, C_PAD)

    p3, _, _ = im2col_nhwc(a2, K, STRIDE, prep["w3"].shape[0])
    q_pad = conv_bn_relu_head_pallas(p3, prep["w3"], prep["g3"], prep["be3"],
                                     prep["wh"], prep["bh"], n_batch=N)
    return q_pad[:, :outputs]


# ----------------------------------------------------------------------------
# Parameter init (PyTorch layout) + one-time kernel-layout preparation
# ----------------------------------------------------------------------------
def _conv_size_out(size, kernel_size=K, stride=STRIDE):
    return (size - (kernel_size - 1) - 1) // stride + 1


def init_params(key, h, w, outputs):
    convw = _conv_size_out(_conv_size_out(_conv_size_out(w)))
    convh = _conv_size_out(_conv_size_out(_conv_size_out(h)))
    lin_in = convw * convh * 64

    keys = jax.random.split(key, 8)

    def uconv(k, shape):
        fan_in = shape[1] * shape[2] * shape[3]
        bound = 1.0 / np.sqrt(fan_in)
        return jax.random.uniform(k, shape, jnp.float32, -bound, bound)

    return {
        "w1": uconv(keys[0], (32, 3, K, K)),
        "b1": jax.random.uniform(keys[1], (32,), jnp.float32, -0.1, 0.1),
        "g1": jnp.ones((32,), jnp.float32), "be1": jnp.zeros((32,), jnp.float32),
        "w2": uconv(keys[2], (64, 32, K, K)),
        "b2": jax.random.uniform(keys[3], (64,), jnp.float32, -0.05, 0.05),
        "g2": jnp.ones((64,), jnp.float32), "be2": jnp.zeros((64,), jnp.float32),
        "w3": uconv(keys[4], (64, 64, K, K)),
        "b3": jax.random.uniform(keys[5], (64,), jnp.float32, -0.05, 0.05),
        "g3": jnp.ones((64,), jnp.float32), "be3": jnp.zeros((64,), jnp.float32),
        "wh": jax.random.uniform(keys[6], (outputs, lin_in), jnp.float32,
                                 -1.0 / np.sqrt(lin_in), 1.0 / np.sqrt(lin_in)),
        "bh": jax.random.uniform(keys[7], (outputs,), jnp.float32, -0.05, 0.05),
    }


def _pad_to(x, axis, size):
    pads = [(0, 0)] * x.ndim
    pads[axis] = (0, size - x.shape[axis])
    return jnp.pad(x, pads)


def prepare_params(params, h, w):
    """One-time repack of PyTorch-layout params into kernel layout.

    Conv weight (Cout, Cin, KH, KW) -> (KH*KW*Cin_pad, 128) rows in (kh, kw, ci)
    order matching im2col columns; BN vectors padded to 128 lanes; head weight
    columns permuted from NCHW flatten to NHWC(+channel-pad) flatten, O padded.
    Conv biases are intentionally dropped (exactly cancelled by BN mean-sub).
    """
    def conv_w(w_oikk, cin_pad, kd_pad):
        cout, _, k, _ = w_oikk.shape
        wk = jnp.transpose(w_oikk, (2, 3, 1, 0))        # (KH, KW, Cin, Cout)
        wk = _pad_to(wk, 2, cin_pad)
        wk = wk.reshape(k * k * cin_pad, cout)          # rows = (kh, kw, ci)
        wk = _pad_to(wk, 1, C_PAD)                      # lane-dense Cout
        if kd_pad > wk.shape[0]:
            wk = _pad_to(wk, 0, kd_pad)                 # 128-multiple contraction
        return wk

    def bn_vec(v):
        return _pad_to(v.reshape(1, -1), 1, C_PAD)

    h3 = _conv_size_out(_conv_size_out(_conv_size_out(h)))
    w3 = _conv_size_out(_conv_size_out(_conv_size_out(w)))

    kd1 = 3 * K * K
    kd1_pad = ((kd1 + 127) // 128) * 128

    prep = {
        "w1": conv_w(params["w1"], 3, kd1_pad),
        "g1": bn_vec(params["g1"]), "be1": bn_vec(params["be1"]),
        "w2": conv_w(params["w2"], C_PAD, K * K * C_PAD),
        "g2": bn_vec(params["g2"]), "be2": bn_vec(params["be2"]),
        "w3": conv_w(params["w3"], C_PAD, K * K * C_PAD),
        "g3": bn_vec(params["g3"]), "be3": bn_vec(params["be3"]),
    }

    outputs, _ = params["wh"].shape
    cout3 = params["w3"].shape[0]
    wh = params["wh"].reshape(outputs, cout3, h3, w3)    # NCHW flatten order
    wh = jnp.transpose(wh, (0, 2, 3, 1))                 # (O, H3, W3, C)
    wh = _pad_to(wh, 3, C_PAD).reshape(outputs, h3 * w3 * C_PAD).T
    prep["wh"] = _pad_to(wh, 1, C_PAD)                   # (H3*W3*128, 128)
    prep["bh"] = _pad_to(params["bh"].reshape(1, -1), 1, C_PAD)
    return prep


# ----------------------------------------------------------------------------
# Pure-JAX reference faithful to the PyTorch module (with bias, NCHW flatten)
# ----------------------------------------------------------------------------
def conv_bn_relu_ref(x, w, b, g, be, stride=STRIDE):
    y = jax.lax.conv_general_dilated(
        x, w, window_strides=(stride, stride), padding="VALID",
        dimension_numbers=("NCHW", "OIHW", "NCHW")) + b[None, :, None, None]
    mean = jnp.mean(y, axis=(0, 2, 3), keepdims=True)
    var = jnp.mean((y - mean) ** 2, axis=(0, 2, 3), keepdims=True)
    y = (y - mean) * jax.lax.rsqrt(var + BN_EPS) * g[None, :, None, None] \
        + be[None, :, None, None]
    return jnp.maximum(y, 0.0)


def dqn_forward_ref(x, p):
    x = conv_bn_relu_ref(x, p["w1"], p["b1"], p["g1"], p["be1"])
    x = conv_bn_relu_ref(x, p["w2"], p["b2"], p["g2"], p["be2"])
    x = conv_bn_relu_ref(x, p["w3"], p["b3"], p["g3"], p["be3"])
    return x.reshape(x.shape[0], -1) @ p["wh"].T + p["bh"]


# ----------------------------------------------------------------------------
if __name__ == "__main__":
    H = W = 32          # DQN(h=32, w=32, outputs=2): 32 -> 14 -> 5 -> 1 spatial
    OUTPUTS = 2
    BATCH = 2

    key = jax.random.PRNGKey(0)
    kx, kp = jax.random.split(key)
    x = jax.random.normal(kx, (BATCH, 3, H, W), dtype=jnp.float32)  # NCHW input
    params = init_params(kp, H, W, OUTPUTS)
    prep = prepare_params(params, H, W)   # one-time kernel-layout repack

    fwd = jax.jit(functools.partial(dqn_forward, outputs=OUTPUTS))
    out = jax.block_until_ready(fwd(x, prep))

    ref = jax.block_until_ready(dqn_forward_ref(x, params))
    assert out.shape == (BATCH, OUTPUTS), out.shape
    np.testing.assert_allclose(np.asarray(out), np.asarray(ref),
                               rtol=2e-3, atol=2e-3)

    print("KERNEL_OK")
</pallas_src>

<mosaic_0001>
module attributes {stable_mosaic.version = 11 : i64} {
  func.func @conv_bn_relu_kernel(%arg0: memref<392x128xf32, #tpu.memory_space<vmem>>, %arg1: memref<128x128xf32, #tpu.memory_space<vmem>>, %arg2: memref<1x128xf32, #tpu.memory_space<vmem>>, %arg3: memref<1x128xf32, #tpu.memory_space<vmem>>, %arg4: memref<392x128xf32, #tpu.memory_space<vmem>>) attributes {dimension_semantics = [], scalar_prefetch = 0 : i64, scratch_operands = 0 : i64, tpu.core_type = #tpu.core_type<tc>} {
    %c0 = arith.constant 0 : index
    %c0_0 = arith.constant 0 : index
    %0 = vector.load %arg0[%c0, %c0_0] : memref<392x128xf32, #tpu.memory_space<vmem>>, vector<392x128xf32>
    %c0_1 = arith.constant 0 : index
    %c0_2 = arith.constant 0 : index
    %1 = vector.load %arg1[%c0_1, %c0_2] : memref<128x128xf32, #tpu.memory_space<vmem>>, vector<128x128xf32>
    %cst = arith.constant dense<0.000000e+00> : vector<392x128xf32>
    %2 = tpu.matmul %0, %1, %cst {dimension_numbers = #tpu.dot_dimension_numbers<[1], [0], [0], [1], [0, 0, 1, 1], [], []>} : vector<392x128xf32>, vector<128x128xf32>, vector<392x128xf32> -> vector<392x128xf32>
    %cst_3 = arith.constant dense<0.000000e+00> : vector<128xf32>
    %3 = vector.multi_reduction <add>, %2, %cst_3 [0] : vector<392x128xf32> to vector<128xf32>
    %4 = vector.shape_cast %3 : vector<128xf32> to vector<1x128xf32>
    %cst_4 = arith.constant 3.920000e+02 : f32
    %5 = vector.broadcast %cst_4 : f32 to vector<1x128xf32>
    %6 = arith.divf %4, %5 : vector<1x128xf32>
    %7 = vector.broadcast %6 : vector<1x128xf32> to vector<392x128xf32>
    %8 = arith.subf %2, %7 : vector<392x128xf32>
    %9 = arith.mulf %8, %8 : vector<392x128xf32>
    %cst_5 = arith.constant dense<0.000000e+00> : vector<128xf32>
    %10 = vector.multi_reduction <add>, %9, %cst_5 [0] : vector<392x128xf32> to vector<128xf32>
    %11 = vector.shape_cast %10 : vector<128xf32> to vector<1x128xf32>
    %cst_6 = arith.constant 3.920000e+02 : f32
    %12 = vector.broadcast %cst_6 : f32 to vector<1x128xf32>
    %13 = arith.divf %11, %12 : vector<1x128xf32>
    %14 = vector.broadcast %6 : vector<1x128xf32> to vector<392x128xf32>
    %15 = arith.subf %2, %14 : vector<392x128xf32>
    %cst_7 = arith.constant 9.99999974E-6 : f32
    %16 = vector.broadcast %cst_7 : f32 to vector<1x128xf32>
    %17 = arith.addf %13, %16 : vector<1x128xf32>
    %18 = math.rsqrt %17 : vector<1x128xf32>
    %19 = vector.broadcast %18 : vector<1x128xf32> to vector<392x128xf32>
    %20 = arith.mulf %15, %19 : vector<392x128xf32>
    %c0_8 = arith.constant 0 : index
    %c0_9 = arith.constant 0 : index
    %21 = vector.load %arg2[%c0_8, %c0_9] : memref<1x128xf32, #tpu.memory_space<vmem>>, vector<1x128xf32>
    %22 = vector.broadcast %21 : vector<1x128xf32> to vector<392x128xf32>
    %23 = arith.mulf %20, %22 : vector<392x128xf32>
    %c0_10 = arith.constant 0 : index
    %c0_11 = arith.constant 0 : index
    %24 = vector.load %arg3[%c0_10, %c0_11] : memref<1x128xf32, #tpu.memory_space<vmem>>, vector<1x128xf32>
    %25 = vector.broadcast %24 : vector<1x128xf32> to vector<392x128xf32>
    %26 = arith.addf %23, %25 : vector<392x128xf32>
    %cst_12 = arith.constant 0.000000e+00 : f32
    %27 = vector.broadcast %cst_12 : f32 to vector<392x128xf32>
    %28 = arith.maximumf %26, %27 : vector<392x128xf32>
    %c0_13 = arith.constant 0 : index
    %c0_14 = arith.constant 0 : index
    %29 = vector.load %arg4[%c0_13, %c0_14] : memref<392x128xf32, #tpu.memory_space<vmem>>, vector<392x128xf32>
    tpu.vector_store %arg4[%c0_13, %c0_14], %28 {strides = array<i32>} : memref<392x128xf32, #tpu.memory_space<vmem>>, vector<392x128xf32>,
    return
  }
}

module attributes {stable_mosaic.version = 11 : i64} {
  func.func @conv_bn_relu_kernel(%arg0: memref<50x3200xf32, #tpu.memory_space<vmem>>, %arg1: memref<3200x128xf32, #tpu.memory_space<vmem>>, %arg2: memref<1x128xf32, #tpu.memory_space<vmem>>, %arg3: memref<1x128xf32, #tpu.memory_space<vmem>>, %arg4: memref<50x128xf32, #tpu.memory_space<vmem>>) attributes {dimension_semantics = [], scalar_prefetch = 0 : i64, scratch_operands = 0 : i64, tpu.core_type = #tpu.core_type<tc>} {
    %c0 = arith.constant 0 : index
    %c0_0 = arith.constant 0 : index
    %0 = vector.load %arg0[%c0, %c0_0] : memref<50x3200xf32, #tpu.memory_space<vmem>>, vector<50x3200xf32>
    %c0_1 = arith.constant 0 : index
    %c0_2 = arith.constant 0 : index
    %1 = vector.load %arg1[%c0_1, %c0_2] : memref<3200x128xf32, #tpu.memory_space<vmem>>, vector<3200x128xf32>
    %cst = arith.constant dense<0.000000e+00> : vector<50x128xf32>
    %2 = tpu.matmul %0, %1, %cst {dimension_numbers = #tpu.dot_dimension_numbers<[1], [0], [0], [1], [0, 0, 1, 1], [], []>} : vector<50x3200xf32>, vector<3200x128xf32>, vector<50x128xf32> -> vector<50x128xf32>
    %cst_3 = arith.constant dense<0.000000e+00> : vector<128xf32>
    %3 = vector.multi_reduction <add>, %2, %cst_3 [0] : vector<50x128xf32> to vector<128xf32>
    %4 = vector.shape_cast %3 : vector<128xf32> to vector<1x128xf32>
    %cst_4 = arith.constant 5.000000e+01 : f32
    %5 = vector.broadcast %cst_4 : f32 to vector<1x128xf32>
    %6 = arith.divf %4, %5 : vector<1x128xf32>
    %7 = vector.broadcast %6 : vector<1x128xf32> to vector<50x128xf32>
    %8 = arith.subf %2, %7 : vector<50x128xf32>
    %9 = arith.mulf %8, %8 : vector<50x128xf32>
    %cst_5 = arith.constant dense<0.000000e+00> : vector<128xf32>
    %10 = vector.multi_reduction <add>, %9, %cst_5 [0] : vector<50x128xf32> to vector<128xf32>
    %11 = vector.shape_cast %10 : vector<128xf32> to vector<1x128xf32>
    %cst_6 = arith.constant 5.000000e+01 : f32
    %12 = vector.broadcast %cst_6 : f32 to vector<1x128xf32>
    %13 = arith.divf %11, %12 : vector<1x128xf32>
    %14 = vector.broadcast %6 : vector<1x128xf32> to vector<50x128xf32>
    %15 = arith.subf %2, %14 : vector<50x128xf32>
    %cst_7 = arith.constant 9.99999974E-6 : f32
    %16 = vector.broadcast %cst_7 : f32 to vector<1x128xf32>
    %17 = arith.addf %13, %16 : vector<1x128xf32>
    %18 = math.rsqrt %17 : vector<1x128xf32>
    %19 = vector.broadcast %18 : vector<1x128xf32> to vector<50x128xf32>
    %20 = arith.mulf %15, %19 : vector<50x128xf32>
    %c0_8 = arith.constant 0 : index
    %c0_9 = arith.constant 0 : index
    %21 = vector.load %arg2[%c0_8, %c0_9] : memref<1x128xf32, #tpu.memory_space<vmem>>, vector<1x128xf32>
    %22 = vector.broadcast %21 : vector<1x128xf32> to vector<50x128xf32>
    %23 = arith.mulf %20, %22 : vector<50x128xf32>
    %c0_10 = arith.constant 0 : index
    %c0_11 = arith.constant 0 : index
    %24 = vector.load %arg3[%c0_10, %c0_11] : memref<1x128xf32, #tpu.memory_space<vmem>>, vector<1x128xf32>
    %25 = vector.broadcast %24 : vector<1x128xf32> to vector<50x128xf32>
    %26 = arith.addf %23, %25 : vector<50x128xf32>
    %cst_12 = arith.constant 0.000000e+00 : f32
    %27 = vector.broadcast %cst_12 : f32 to vector<50x128xf32>
    %28 = arith.maximumf %26, %27 : vector<50x128xf32>
    %c0_13 = arith.constant 0 : index
    %c0_14 = arith.constant 0 : index
    %29 = vector.load %arg4[%c0_13, %c0_14] : memref<50x128xf32, #tpu.memory_space<vmem>>, vector<50x128xf32>
    tpu.vector_store %arg4[%c0_13, %c0_14], %28 {strides = array<i32>} : memref<50x128xf32, #tpu.memory_space<vmem>>, vector<50x128xf32>,
    return
  }
}

module attributes {stable_mosaic.version = 11 : i64} {
  func.func @conv_bn_relu_head_kernel(%arg0: memref<2x3200xf32, #tpu.memory_space<vmem>>, %arg1: memref<3200x128xf32, #tpu.memory_space<vmem>>, %arg2: memref<1x128xf32, #tpu.memory_space<vmem>>, %arg3: memref<1x128xf32, #tpu.memory_space<vmem>>, %arg4: memref<128x128xf32, #tpu.memory_space<vmem>>, %arg5: memref<1x128xf32, #tpu.memory_space<vmem>>, %arg6: memref<2x128xf32, #tpu.memory_space<vmem>>) attributes {dimension_semantics = [], scalar_prefetch = 0 : i64, scratch_operands = 0 : i64, tpu.core_type = #tpu.core_type<tc>} {
    %c0 = arith.constant 0 : index
    %c0_0 = arith.constant 0 : index
    %0 = vector.load %arg0[%c0, %c0_0] : memref<2x3200xf32, #tpu.memory_space<vmem>>, vector<2x3200xf32>
    %c0_1 = arith.constant 0 : index
    %c0_2 = arith.constant 0 : index
    %1 = vector.load %arg1[%c0_1, %c0_2] : memref<3200x128xf32, #tpu.memory_space<vmem>>, vector<3200x128xf32>
    %cst = arith.constant dense<0.000000e+00> : vector<2x128xf32>
    %2 = tpu.matmul %0, %1, %cst {dimension_numbers = #tpu.dot_dimension_numbers<[1], [0], [0], [1], [0, 0, 1, 1], [], []>} : vector<2x3200xf32>, vector<3200x128xf32>, vector<2x128xf32> -> vector<2x128xf32>
    %cst_3 = arith.constant dense<0.000000e+00> : vector<128xf32>
    %3 = vector.multi_reduction <add>, %2, %cst_3 [0] : vector<2x128xf32> to vector<128xf32>
    %4 = vector.shape_cast %3 : vector<128xf32> to vector<1x128xf32>
    %cst_4 = arith.constant 2.000000e+00 : f32
    %5 = vector.broadcast %cst_4 : f32 to vector<1x128xf32>
    %6 = arith.divf %4, %5 : vector<1x128xf32>
    %7 = vector.broadcast %6 : vector<1x128xf32> to vector<2x128xf32>
    %8 = arith.subf %2, %7 : vector<2x128xf32>
    %9 = arith.mulf %8, %8 : vector<2x128xf32>
    %cst_5 = arith.constant dense<0.000000e+00> : vector<128xf32>
    %10 = vector.multi_reduction <add>, %9, %cst_5 [0] : vector<2x128xf32> to vector<128xf32>
    %11 = vector.shape_cast %10 : vector<128xf32> to vector<1x128xf32>
    %cst_6 = arith.constant 2.000000e+00 : f32
    %12 = vector.broadcast %cst_6 : f32 to vector<1x128xf32>
    %13 = arith.divf %11, %12 : vector<1x128xf32>
    %14 = vector.broadcast %6 : vector<1x128xf32> to vector<2x128xf32>
    %15 = arith.subf %2, %14 : vector<2x128xf32>
    %cst_7 = arith.constant 9.99999974E-6 : f32
    %16 = vector.broadcast %cst_7 : f32 to vector<1x128xf32>
    %17 = arith.addf %13, %16 : vector<1x128xf32>
    %18 = math.rsqrt %17 : vector<1x128xf32>
    %19 = vector.broadcast %18 : vector<1x128xf32> to vector<2x128xf32>
    %20 = arith.mulf %15, %19 : vector<2x128xf32>
    %c0_8 = arith.constant 0 : index
    %c0_9 = arith.constant 0 : index
    %21 = vector.load %arg2[%c0_8, %c0_9] : memref<1x128xf32, #tpu.memory_space<vmem>>, vector<1x128xf32>
    %22 = vector.broadcast %21 : vector<1x128xf32> to vector<2x128xf32>
    %23 = arith.mulf %20, %22 : vector<2x128xf32>
    %c0_10 = arith.constant 0 : index
    %c0_11 = arith.constant 0 : index
    %24 = vector.load %arg3[%c0_10, %c0_11] : memref<1x128xf32, #tpu.memory_space<vmem>>, vector<1x128xf32>
    %25 = vector.broadcast %24 : vector<1x128xf32> to vector<2x128xf32>
    %26 = arith.addf %23, %25 : vector<2x128xf32>
    %cst_12 = arith.constant 0.000000e+00 : f32
    %27 = vector.broadcast %cst_12 : f32 to vector<2x128xf32>
    %28 = arith.maximumf %26, %27 : vector<2x128xf32>
    %c0_13 = arith.constant 0 : index
    %c0_14 = arith.constant 0 : index
    %29 = vector.load %arg4[%c0_13, %c0_14] : memref<128x128xf32, #tpu.memory_space<vmem>>, vector<128x128xf32>
    %cst_15 = arith.constant dense<0.000000e+00> : vector<2x128xf32>
    %30 = tpu.matmul %28, %29, %cst_15 {dimension_numbers = #tpu.dot_dimension_numbers<[1], [0], [0], [1], [0, 0, 1, 1], [], []>} : vector<2x128xf32>, vector<128x128xf32>, vector<2x128xf32> -> vector<2x128xf32>
    %c0_16 = arith.constant 0 : index
    %c0_17 = arith.constant 0 : index
    %31 = vector.load %arg5[%c0_16, %c0_17] : memref<1x128xf32, #tpu.memory_space<vmem>>, vector<1x128xf32>
    %32 = vector.broadcast %31 : vector<1x128xf32> to vector<2x128xf32>
    %33 = arith.addf %30, %32 : vector<2x128xf32>
    %c0_18 = arith.constant 0 : index
    %c0_19 = arith.constant 0 : index
    %34 = vector.load %arg6[%c0_18, %c0_19] : memref<2x128xf32, #tpu.memory_space<vmem>>, vector<2x128xf32>
    tpu.vector_store %arg6[%c0_18, %c0_19], %33 {strides = array<i32>} : memref<2x128xf32, #tpu.memory_space<vmem>>, vector<2x128xf32>,
    return
  }
}

</mosaic_0001>

<bundles_post_ra>
// kernel: dqn_forward.3
= control target key start
LH: loop header
LB: loop body
LE: loop exit
PB: predicated region body
PF: predicated region fallthrough
CT: control target
= control target key end

     0   :  { %v1157_v0 = vmov 0.0|0.0   ;;  %vm1158_vm0 = vmmov 0   ;;  %v1159_v4 = vmov 0.0   ;;  %s2208_s1 = inlined_call_operand.vmem [shape: f32[128,128], index: 1, kind: input, shape index: {}]   ;;  %s2209_s0 = inlined_call_operand.vmem [shape: f32[392,128], index: 0, kind: input, shape index: {}]   ;;  %s2210_s2 = inlined_call_operand.vmem [shape: f32[1,128], index: 2, kind: input, shape index: {}]   ;;  %s2211_s3 = inlined_call_operand.vmem [shape: f32[1,128], index: 3, kind: input, shape index: {}]   ;;  %s2212_s4 = inlined_call_operand.vmem [shape: f32[392,128], index: 4, kind: output, shape index: {}]  }
   0x1   :  { %1112 = vmatprep.subr.bf16.mxu0 %v1157_v0  ;;  %v66_v1 = vld [vmem:[%s2208_s1] sm:$0xff]  ;;  %v67_v2 = vld [vmem:[%s2208_s1 + $0x8] sm:$0xff]  ;;  %v68_v3 = vld [vmem:[%s2208_s1 + $0x10] sm:$0xff]  ;;  %965 = vmatprep.mubr.msk.f32.mxu0 %vm1158_vm0, %v1159_v4 }
   0x2   :  { %v1113_v5 = vpack.c.bf16 %v67_v2, %v66_v1  ;;  %v69_v6 = vld [vmem:[%s2208_s1 + $0x18] sm:$0xff]  ;;  %1136 = vmatprep.subr.bf16.mxu1 %v1157_v0  ;;  %1040 = vmatprep.mubr.msk.f32.mxu1 %vm1158_vm0, %v1159_v4  ;;  %v70_v8 = vld [vmem:[%s2208_s1 + $0x20] sm:$0xff]  ;;  %v71_v9 = vld [vmem:[%s2208_s1 + $0x28] sm:$0xff] }
   0x3   :  { %v1116_v7 = vpack.c.bf16 %v69_v6, %v68_v3  ;;  %v1119_v10 = vpack.c.bf16 %v71_v9, %v70_v8  ;;  %v72_v11 = vld [vmem:[%s2208_s1 + $0x30] sm:$0xff]  ;;  %v73_v12 = vld [vmem:[%s2208_s1 + $0x38] sm:$0xff]  ;;  %v74_v14 = vld [vmem:[%s2208_s1 + $0x40] sm:$0xff] }
   0x4   :  { %1114 = vmatpush3.bf16.msra.mxu0 %v1113_v5  ;;  %1144 = vmatpush3.bf16.msra.mxu1 %v1113_v5  ;;  %v1122_v13 = vpack.c.bf16 %v73_v12, %v72_v11  ;;  %v75_v15 = vld [vmem:[%s2208_s1 + $0x48] sm:$0xff]  ;;  %v76_v17 = vld [vmem:[%s2208_s1 + $0x50] sm:$0xff]  ;;  %v77_v18 = vld [vmem:[%s2208_s1 + $0x58] sm:$0xff] }
   0x5   :  { %1115 = vmatprep.subr.bf16.mxu0 %v1157_v0  ;;  %1137 = vmatprep.subr.bf16.mxu1 %v1157_v0  ;;  %v1125_v16 = vpack.c.bf16 %v75_v15, %v74_v14  ;;  %v1128_v19 = vpack.c.bf16 %v77_v18, %v76_v17  ;;  %v78_v20 = vld [vmem:[%s2208_s1 + $0x60] sm:$0xff]  ;;  %v79_v21 = vld [vmem:[%s2208_s1 + $0x68] sm:$0xff]  ;;  %v80_v23 = vld [vmem:[%s2208_s1 + $0x70] sm:$0xff] }
   0x6   :  { %v1131_v22 = vpack.c.bf16 %v79_v21, %v78_v20  ;;  %v81_v24 = vld [vmem:[%s2208_s1 + $0x78] sm:$0xff]  ;;  %v17_v26 = vld [vmem:[%s2209_s0] sm:$0xff]  ;;  %v42_v27 = vld [vmem:[%s2209_s0 + $0xc8] sm:$0xff] }
   0x7   :  { %v1134_v25 = vpack.c.bf16 %v81_v24, %v80_v23  ;;  %v18_v28 = vld [vmem:[%s2209_s0 + $0x8] sm:$0xff]  ;;  %v43_v29 = vld [vmem:[%s2209_s0 + $0xd0] sm:$0xff]  ;;  %v44_v31 = vld [vmem:[%s2209_s0 + $0xd8] sm:$0xff] }
   0x8   :  { %1117 = vmatpush3.bf16.msra.mxu0 %v1116_v7  ;;  %1145 = vmatpush3.bf16.msra.mxu1 %v1116_v7  ;;  %v19_v30 = vld [vmem:[%s2209_s0 + $0x10] sm:$0xff]  ;;  %v20_v32 = vld [vmem:[%s2209_s0 + $0x18] sm:$0xff]  ;;  %v45_v33 = vld [vmem:[%s2209_s0 + $0xe0] sm:$0xff] }
   0x9   :  { %1118 = vmatprep.subr.bf16.mxu0 %v1157_v0  ;;  %1138 = vmatprep.subr.bf16.mxu1 %v1157_v0  ;;  %v21_v34 = vld [vmem:[%s2209_s0 + $0x20] sm:$0xff]  ;;  %v46_v35 = vld [vmem:[%s2209_s0 + $0xe8] sm:$0xff]  ;;  %v47_v37 = vld [vmem:[%s2209_s0 + $0xf0] sm:$0xff] }
   0xa   :  { %v22_v36 = vld [vmem:[%s2209_s0 + $0x28] sm:$0xff]  ;;  %v23_v38 = vld [vmem:[%s2209_s0 + $0x30] sm:$0xff]  ;;  %v48_v39 = vld [vmem:[%s2209_s0 + $0xf8] sm:$0xff] }
   0xb   :  { %v24_v40 = vld [vmem:[%s2209_s0 + $0x38] sm:$0xff]  ;;  %v49_v41 = vld [vmem:[%s2209_s0 + $0x100] sm:$0xff]  ;;  %v50_v43 = vld [vmem:[%s2209_s0 + $0x108] sm:$0xff] }
   0xc   :  { %1120 = vmatpush3.bf16.msra.mxu0 %v1119_v10  ;;  %1146 = vmatpush3.bf16.msra.mxu1 %v1119_v10  ;;  %v25_v42 = vld [vmem:[%s2209_s0 + $0x40] sm:$0xff]  ;;  %v26_v44 = vld [vmem:[%s2209_s0 + $0x48] sm:$0xff]  ;;  %v51_v45 = vld [vmem:[%s2209_s0 + $0x110] sm:$0xff] }
   0xd   :  { %1121 = vmatprep.subr.bf16.mxu0 %v1157_v0  ;;  %1139 = vmatprep.subr.bf16.mxu1 %v1157_v0  ;;  %v27_v46 = vld [vmem:[%s2209_s0 + $0x50] sm:$0xff]  ;;  %v52_v47 = vld [vmem:[%s2209_s0 + $0x118] sm:$0xff]  ;;  %v53_v49 = vld [vmem:[%s2209_s0 + $0x120] sm:$0xff] }
   0xe   :  { %v28_v48 = vld [vmem:[%s2209_s0 + $0x58] sm:$0xff]  ;;  %v29_v50 = vld [vmem:[%s2209_s0 + $0x60] sm:$0xff]  ;;  %v54_v51 = vld [vmem:[%s2209_s0 + $0x128] sm:$0xff] }
   0xf   :  { %v30_v52 = vld [vmem:[%s2209_s0 + $0x68] sm:$0xff]  ;;  %v55_v53 = vld [vmem:[%s2209_s0 + $0x130] sm:$0xff]  ;;  %v56_v55 = vld [vmem:[%s2209_s0 + $0x138] sm:$0xff] }
  0x10   :  { %1123 = vmatpush3.bf16.msra.mxu0 %v1122_v13  ;;  %1147 = vmatpush3.bf16.msra.mxu1 %v1122_v13  ;;  %v31_v54 = vld [vmem:[%s2209_s0 + $0x70] sm:$0xff]  ;;  %v32_v56 = vld [vmem:[%s2209_s0 + $0x78] sm:$0xff]  ;;  %v57_v57 = vld [vmem:[%s2209_s0 + $0x140] sm:$0xff] }
  0x11   :  { %1124 = vmatprep.subr.bf16.mxu0 %v1157_v0  ;;  %1140 = vmatprep.subr.bf16.mxu1 %v1157_v0  ;;  %v33_v58 = vld [vmem:[%s2209_s0 + $0x80] sm:$0xff]  ;;  %v58_v59 = vld [vmem:[%s2209_s0 + $0x148] sm:$0xff]  ;;  %v59_v61 = vld [vmem:[%s2209_s0 + $0x150] sm:$0xff] }
  0x12   :  { %v34_v60 = vld [vmem:[%s2209_s0 + $0x88] sm:$0xff]  ;;  %v35_v62 = vld [vmem:[%s2209_s0 + $0x90] sm:$0xff]  ;;  %v60_v63 = vld [vmem:[%s2209_s0 + $0x158] sm:$0xff] }
  0x13   :  { %v61_v1 = vld [vmem:[%s2209_s0 + $0x160] sm:$0xff]  ;;  %v62_v3 = vld [vmem:[%s2209_s0 + $0x168] sm:$0xff]  ;;  %v63_v6 = vld [vmem:[%s2209_s0 + $0x170] sm:$0xff] }
  0x14   :  { %1126 = vmatpush3.bf16.msra.mxu0 %v1125_v16  ;;  %1148 = vmatpush3.bf16.msra.mxu1 %v1125_v16  ;;  %v37_v2 = vld [vmem:[%s2209_s0 + $0xa0] sm:$0xff]  ;;  %v38_v5 = vld [vmem:[%s2209_s0 + $0xa8] sm:$0xff]  ;;  %v39_v7 = vld [vmem:[%s2209_s0 + $0xb0] sm:$0xff] }
  0x15   :  { %1127 = vmatprep.subr.bf16.mxu0 %v1157_v0  ;;  %1141 = vmatprep.subr.bf16.mxu1 %v1157_v0  ;;  %v64_v8 = vld [vmem:[%s2209_s0 + $0x178] sm:$0xff]  ;;  %v65_v10 = vld [vmem:[%s2209_s0 + $0x180] sm:$0xff] }
  0x16   :  { %v40_v9 = vld [vmem:[%s2209_s0 + $0xb8] sm:$0xff]  ;;  %v41_v11 = vld [vmem:[%s2209_s0 + $0xc0] sm:$0xff] }
  0x18   :  { %1129 = vmatpush3.bf16.msra.mxu0 %v1128_v19  ;;  %1149 = vmatpush3.bf16.msra.mxu1 %v1128_v19 }
  0x19   :  { %1130 = vmatprep.subr.bf16.mxu0 %v1157_v0  ;;  %1142 = vmatprep.subr.bf16.mxu1 %v1157_v0 }
  0x1c   :  { %1132 = vmatpush3.bf16.msra.mxu0 %v1131_v22  ;;  %1150 = vmatpush3.bf16.msra.mxu1 %v1131_v22 }
  0x1d   :  { %1133 = vmatprep.subr.bf16.mxu0 %v1157_v0  ;;  %1143 = vmatprep.subr.bf16.mxu1 %v1157_v0  ;;  %v36_v0 = vld [vmem:[%s2209_s0 + $0x98] sm:$0xff] }
  0x20   :  { %1135 = vmatpush3.bf16.msra.mxu0 %v1134_v25  ;;  %1151 = vmatpush3.bf16.msra.mxu1 %v1134_v25 }
  0x23   :  { %966 = vmatmul.mubr.f32.vlgmr.msra.gmra.mrb[0].mxu0 %v17_v26  ;;  %1041 = vmatmul.mubr.f32.vlgmr.msra.gmra.mrb[0].mxu1 %v42_v27 }
  0x24   :  { %968 = vmatprep.mubr.msk.f32.mxu0 %vm1158_vm0, %v1159_v4  ;;  %1043 = vmatprep.mubr.msk.f32.mxu1 %vm1158_vm0, %v1159_v4 }
  0x27   :  { %969 = vmatmul.mubr.f32.gmra.mrb[2].mxu0 %v18_v28  ;;  %1044 = vmatmul.mubr.f32.gmra.mrb[2].mxu1 %v43_v29 }
  0x28   :  { %971 = vmatprep.mubr.msk.f32.mxu0 %vm1158_vm0, %v1159_v4  ;;  %1046 = vmatprep.mubr.msk.f32.mxu1 %vm1158_vm0, %v1159_v4 }
  0x2b   :  { %972 = vmatmul.mubr.f32.gmra.mrb[4].mxu0 %v19_v30  ;;  %1047 = vmatmul.mubr.f32.gmra.mrb[4].mxu1 %v44_v31 }
  0x2c   :  { %974 = vmatprep.mubr.msk.f32.mxu0 %vm1158_vm0, %v1159_v4  ;;  %1049 = vmatprep.mubr.msk.f32.mxu1 %vm1158_vm0, %v1159_v4 }
  0x2f   :  { %975 = vmatmul.mubr.f32.gmra.mrb[6].mxu0 %v20_v32  ;;  %1050 = vmatmul.mubr.f32.gmra.mrb[6].mxu1 %v45_v33 }
  0x30   :  { %977 = vmatprep.mubr.msk.f32.mxu0 %vm1158_vm0, %v1159_v4  ;;  %1052 = vmatprep.mubr.msk.f32.mxu1 %vm1158_vm0, %v1159_v4 }
  0x33   :  { %978 = vmatmul.mubr.f32.gmra.mrb[8].mxu0 %v21_v34  ;;  %1053 = vmatmul.mubr.f32.gmra.mrb[8].mxu1 %v46_v35 }
  0x34   :  { %980 = vmatprep.mubr.msk.f32.mxu0 %vm1158_vm0, %v1159_v4  ;;  %1055 = vmatprep.mubr.msk.f32.mxu1 %vm1158_vm0, %v1159_v4 }
  0x37   :  { %981 = vmatmul.mubr.f32.gmra.mrb[10].mxu0 %v22_v36  ;;  %1056 = vmatmul.mubr.f32.gmra.mrb[10].mxu1 %v47_v37 }
  0x38   :  { %983 = vmatprep.mubr.msk.f32.mxu0 %vm1158_vm0, %v1159_v4  ;;  %1058 = vmatprep.mubr.msk.f32.mxu1 %vm1158_vm0, %v1159_v4 }
  0x3b   :  { %984 = vmatmul.mubr.f32.gmra.mrb[12].mxu0 %v23_v38  ;;  %1059 = vmatmul.mubr.f32.gmra.mrb[12].mxu1 %v48_v39 }
  0x3c   :  { %986 = vmatprep.mubr.msk.f32.mxu0 %vm1158_vm0, %v1159_v4  ;;  %1061 = vmatprep.mubr.msk.f32.mxu1 %vm1158_vm0, %v1159_v4 }
  0x3f   :  { %987 = vmatmul.mubr.f32.gmra.mrb[14].mxu0 %v24_v40  ;;  %1062 = vmatmul.mubr.f32.gmra.mrb[14].mxu1 %v49_v41 }
  0x40   :  { %989 = vmatprep.mubr.msk.f32.mxu0 %vm1158_vm0, %v1159_v4  ;;  %1064 = vmatprep.mubr.msk.f32.mxu1 %vm1158_vm0, %v1159_v4 }
  0x43   :  { %990 = vmatmul.mubr.f32.gmra.mrb[16].mxu0 %v25_v42  ;;  %1065 = vmatmul.mubr.f32.gmra.mrb[16].mxu1 %v50_v43 }
  0x44   :  { %992 = vmatprep.mubr.msk.f32.mxu0 %vm1158_vm0, %v1159_v4  ;;  %1067 = vmatprep.mubr.msk.f32.mxu1 %vm1158_vm0, %v1159_v4 }
  0x47   :  { %993 = vmatmul.mubr.f32.gmra.mrb[18].mxu0 %v26_v44  ;;  %1068 = vmatmul.mubr.f32.gmra.mrb[18].mxu1 %v51_v45 }
  0x48   :  { %995 = vmatprep.mubr.msk.f32.mxu0 %vm1158_vm0, %v1159_v4  ;;  %1070 = vmatprep.mubr.msk.f32.mxu1 %vm1158_vm0, %v1159_v4 }
  0x4b   :  { %996 = vmatmul.mubr.f32.gmra.mrb[20].mxu0 %v27_v46  ;;  %1071 = vmatmul.mubr.f32.gmra.mrb[20].mxu1 %v52_v47 }
  0x4c   :  { %998 = vmatprep.mubr.msk.f32.mxu0 %vm1158_vm0, %v1159_v4  ;;  %1073 = vmatprep.mubr.msk.f32.mxu1 %vm1158_vm0, %v1159_v4 }
  0x4f   :  { %999 = vmatmul.mubr.f32.gmra.mrb[22].mxu0 %v28_v48  ;;  %1074 = vmatmul.mubr.f32.gmra.mrb[22].mxu1 %v53_v49 }
  0x50   :  { %1001 = vmatprep.mubr.msk.f32.mxu0 %vm1158_vm0, %v1159_v4  ;;  %1076 = vmatprep.mubr.msk.f32.mxu1 %vm1158_vm0, %v1159_v4 }
  0x53   :  { %1002 = vmatmul.mubr.f32.gmra.mrb[24].mxu0 %v29_v50  ;;  %1077 = vmatmul.mubr.f32.gmra.mrb[24].mxu1 %v54_v51 }
  0x54   :  { %1004 = vmatprep.mubr.msk.f32.mxu0 %vm1158_vm0, %v1159_v4  ;;  %1079 = vmatprep.mubr.msk.f32.mxu1 %vm1158_vm0, %v1159_v4 }
  0x57   :  { %1005 = vmatmul.mubr.f32.gmra.mrb[26].mxu0 %v30_v52  ;;  %1080 = vmatmul.mubr.f32.gmra.mrb[26].mxu1 %v55_v53 }
  0x58   :  { %1007 = vmatprep.mubr.msk.f32.mxu0 %vm1158_vm0, %v1159_v4  ;;  %1082 = vmatprep.mubr.msk.f32.mxu1 %vm1158_vm0, %v1159_v4 }
  0x5b   :  { %1008 = vmatmul.mubr.f32.gmra.mrb[28].mxu0 %v31_v54  ;;  %1083 = vmatmul.mubr.f32.gmra.mrb[28].mxu1 %v56_v55 }
  0x5c   :  { %1010 = vmatprep.mubr.msk.f32.mxu0 %vm1158_vm0, %v1159_v4  ;;  %1085 = vmatprep.mubr.msk.f32.mxu1 %vm1158_vm0, %v1159_v4 }
  0x5f   :  { %1011 = vmatmul.mubr.f32.gmra.mrb[30].mxu0 %v32_v56  ;;  %1086 = vmatmul.mubr.f32.gmra.mrb[30].mxu1 %v57_v57 }
  0x60   :  { %1013 = vmatprep.mubr.msk.f32.mxu0 %vm1158_vm0, %v1159_v4  ;;  %1088 = vmatprep.mubr.msk.f32.mxu1 %vm1158_vm0, %v1159_v4 }
  0x63   :  { %1014 = vmatmul.mubr.f32.gmra.mrb[32].mxu0 %v33_v58  ;;  %1089 = vmatmul.mubr.f32.gmra.mrb[32].mxu1 %v58_v59 }
  0x64   :  { %1016 = vmatprep.mubr.msk.f32.mxu0 %vm1158_vm0, %v1159_v4  ;;  %1091 = vmatprep.mubr.msk.f32.mxu1 %vm1158_vm0, %v1159_v4 }
  0x67   :  { %1017 = vmatmul.mubr.f32.gmra.mrb[34].mxu0 %v34_v60  ;;  %1092 = vmatmul.mubr.f32.gmra.mrb[34].mxu1 %v59_v61 }
  0x68   :  { %1019 = vmatprep.mubr.msk.f32.mxu0 %vm1158_vm0, %v1159_v4  ;;  %1094 = vmatprep.mubr.msk.f32.mxu1 %vm1158_vm0, %v1159_v4 }
  0x6b   :  { %1020 = vmatmul.mubr.f32.gmra.mrb[36].mxu0 %v35_v62  ;;  %1095 = vmatmul.mubr.f32.gmra.mrb[36].mxu1 %v60_v63 }
  0x6c   :  { %1022 = vmatprep.mubr.msk.f32.mxu0 %vm1158_vm0, %v1159_v4  ;;  %1097 = vmatprep.mubr.msk.f32.mxu1 %vm1158_vm0, %v1159_v4 }
  0x6f   :  { %1023 = vmatmul.mubr.f32.gmra.mrb[38].mxu0 %v36_v0  ;;  %1098 = vmatmul.mubr.f32.gmra.mrb[38].mxu1 %v61_v1 }
  0x70   :  { %1025 = vmatprep.mubr.msk.f32.mxu0 %vm1158_vm0, %v1159_v4  ;;  %1100 = vmatprep.mubr.msk.f32.mxu1 %vm1158_vm0, %v1159_v4 }
  0x73   :  { %1026 = vmatmul.mubr.f32.gmra.mrb[40].mxu0 %v37_v2  ;;  %1101 = vmatmul.mubr.f32.gmra.mrb[40].mxu1 %v62_v3 }
  0x74   :  { %1028 = vmatprep.mubr.msk.f32.mxu0 %vm1158_vm0, %v1159_v4  ;;  %1103 = vmatprep.mubr.msk.f32.mxu1 %vm1158_vm0, %v1159_v4 }
  0x77   :  { %1029 = vmatmul.mubr.f32.gmra.mrb[42].mxu0 %v38_v5  ;;  %1104 = vmatmul.mubr.f32.gmra.mrb[42].mxu1 %v63_v6 }
  0x78   :  { %1031 = vmatprep.mubr.msk.f32.mxu0 %vm1158_vm0, %v1159_v4  ;;  %1106 = vmatprep.mubr.msk.f32.mxu1 %vm1158_vm0, %v1159_v4 }
  0x7b   :  { %1032 = vmatmul.mubr.f32.gmra.mrb[44].mxu0 %v39_v7  ;;  %1107 = vmatmul.mubr.f32.gmra.mrb[44].mxu1 %v64_v8 }
  0x7c   :  { %1034 = vmatprep.mubr.msk.f32.mxu0 %vm1158_vm0, %v1159_v4  ;;  %1109 = vmatprep.mubr.msk.f32.mxu1 %vm1158_vm0, %v1159_v4 }
  0x7f   :  { %1035 = vmatmul.mubr.f32.gmra.mrb[46].mxu0 %v40_v9  ;;  %1110 = vmatmul.mubr.f32.gmra.mrb[46].mxu1 %v65_v10 }
  0x80   :  { %1037 = vmatprep.mubr.msk.f32.mxu0 %vm1158_vm0, %v1159_v4 }
  0x83   :  { %1038 = vmatmul.mubr.f32.gmra.mrb[48].mxu0 %v41_v11 }
  0xf6   :  { %v1478_v12 = vpop.f32.mrb[0].mxu0  ;;  %v1480_v13 = vpop.f32.mrb[0].mxu1 }
  0xf7   :  { %v967_v14 = vpop.f32.mrb[1].mxu0  ;;  %v1042_v15 = vpop.f32.mrb[1].mxu1 }
  0xfa   :  { %v1482_v16 = vpop.f32.mrb[2].mxu0  ;;  %v1484_v17 = vpop.f32.mrb[2].mxu1 }
  0xfb   :  { %v392_v18 = vadd.f32 %v1482_v16, %v1478_v12  ;;  %v970_v19 = vpop.f32.mrb[3].mxu0  ;;  %v1045_v4 = vpop.f32.mrb[3].mxu1 }
  0xfe   :  { %v1488_v20 = vpop.f32.mrb[4].mxu0  ;;  %v1490_v21 = vpop.f32.mrb[4].mxu1 }
  0xff   :  { %v393_v22 = vadd.f32 %v392_v18, %v1488_v20  ;;  %v973_v23 = vpop.f32.mrb[5].mxu0  ;;  %v1048_v24 = vpop.f32.mrb[5].mxu1 }
 0x102   :  { %v1493_v25 = vpop.f32.mrb[6].mxu0  ;;  %v1495_v26 = vpop.f32.mrb[6].mxu1 }
 0x103   :  { %v394_v27 = vadd.f32 %v393_v22, %v1493_v25  ;;  %v976_v28 = vpop.f32.mrb[7].mxu0  ;;  %v1051_v29 = vpop.f32.mrb[7].mxu1 }
 0x106   :  { %v1498_v30 = vpop.f32.mrb[8].mxu0  ;;  %v1500_v31 = vpop.f32.mrb[8].mxu1 }
 0x107   :  { %v395_v32 = vadd.f32 %v394_v27, %v1498_v30  ;;  %v979_v33 = vpop.f32.mrb[9].mxu0  ;;  %v1054_v34 = vpop.f32.mrb[9].mxu1 }
 0x10a   :  { %v1503_v35 = vpop.f32.mrb[10].mxu0  ;;  %v1505_v36 = vpop.f32.mrb[10].mxu1 }
 0x10b   :  { %v396_v37 = vadd.f32 %v395_v32, %v1503_v35  ;;  %v982_v38 = vpop.f32.mrb[11].mxu0  ;;  %v1057_v39 = vpop.f32.mrb[11].mxu1 }
 0x10e   :  { %v1508_v40 = vpop.f32.mrb[12].mxu0  ;;  %v1510_v41 = vpop.f32.mrb[12].mxu1 }
 0x10f   :  { %v397_v42 = vadd.f32 %v396_v37, %v1508_v40  ;;  %v985_v43 = vpop.f32.mrb[13].mxu0  ;;  %v1060_v44 = vpop.f32.mrb[13].mxu1 }
 0x112   :  { %v1513_v45 = vpop.f32.mrb[14].mxu0  ;;  %v1515_v46 = vpop.f32.mrb[14].mxu1 }
 0x113   :  { %v398_v47 = vadd.f32 %v397_v42, %v1513_v45  ;;  %v988_v48 = vpop.f32.mrb[15].mxu0  ;;  %v1063_v49 = vpop.f32.mrb[15].mxu1 }
 0x116   :  { %v1518_v50 = vpop.f32.mrb[16].mxu0  ;;  %v1520_v51 = vpop.f32.mrb[16].mxu1 }
 0x117   :  { %v399_v52 = vadd.f32 %v398_v47, %v1518_v50  ;;  %v991_v53 = vpop.f32.mrb[17].mxu0  ;;  %v1066_v54 = vpop.f32.mrb[17].mxu1 }
 0x11a   :  { %v1523_v55 = vpop.f32.mrb[18].mxu0  ;;  %v1525_v56 = vpop.f32.mrb[18].mxu1 }
 0x11b   :  { %v400_v57 = vadd.f32 %v399_v52, %v1523_v55  ;;  %v994_v58 = vpop.f32.mrb[19].mxu0  ;;  %v1069_v59 = vpop.f32.mrb[19].mxu1 }
 0x11e   :  { %v1528_v60 = vpop.f32.mrb[20].mxu0  ;;  %v1530_v61 = vpop.f32.mrb[20].mxu1 }
 0x11f   :  { %v401_v62 = vadd.f32 %v400_v57, %v1528_v60  ;;  %v997_v63 = vpop.f32.mrb[21].mxu0  ;;  %v1072_v0 = vpop.f32.mrb[21].mxu1 }
 0x122   :  { %v1533_v1 = vpop.f32.mrb[22].mxu0  ;;  %v1535_v2 = vpop.f32.mrb[22].mxu1 }
 0x123   :  { %v402_v3 = vadd.f32 %v401_v62, %v1533_v1  ;;  %v1000_v5 = vpop.f32.mrb[23].mxu0  ;;  %v1075_v6 = vpop.f32.mrb[23].mxu1 }
 0x126   :  { %v1538_v7 = vpop.f32.mrb[24].mxu0  ;;  %v1540_v8 = vpop.f32.mrb[24].mxu1 }
 0x127   :  { %v403_v9 = vadd.f32 %v402_v3, %v1538_v7  ;;  %v1003_v10 = vpop.f32.mrb[25].mxu0  ;;  %v1078_v11 = vpop.f32.mrb[25].mxu1 }
 0x12a   :  { %v1543_v14 = vpop.f32.mrb[26].mxu0  ;;  %v1545_v15 = vpop.f32.mrb[26].mxu1 }
 0x12b   :  { %v404_v18 = vadd.f32 %v403_v9, %v1543_v14  ;;  %v1006_v19 = vpop.f32.mrb[27].mxu0  ;;  %v1081_v4 = vpop.f32.mrb[27].mxu1 }
 0x12e   :  { %v1548_v22 = vpop.f32.mrb[28].mxu0  ;;  %v1550_v23 = vpop.f32.mrb[28].mxu1 }
 0x12f   :  { %v405_v24 = vadd.f32 %v404_v18, %v1548_v22  ;;  %v1009_v27 = vpop.f32.mrb[29].mxu0  ;;  %v1084_v28 = vpop.f32.mrb[29].mxu1 }
 0x132   :  { %v1553_v29 = vpop.f32.mrb[30].mxu0  ;;  %v1555_v32 = vpop.f32.mrb[30].mxu1 }
 0x133   :  { %v406_v33 = vadd.f32 %v405_v24, %v1553_v29  ;;  %v1012_v34 = vpop.f32.mrb[31].mxu0  ;;  %v1087_v37 = vpop.f32.mrb[31].mxu1 }
 0x136   :  { %v1558_v38 = vpop.f32.mrb[32].mxu0  ;;  %v1560_v39 = vpop.f32.mrb[32].mxu1 }
 0x137   :  { %v407_v42 = vadd.f32 %v406_v33, %v1558_v38  ;;  %v1015_v43 = vpop.f32.mrb[33].mxu0  ;;  %v1090_v44 = vpop.f32.mrb[33].mxu1 }
 0x13a   :  { %v1563_v47 = vpop.f32.mrb[34].mxu0  ;;  %v1565_v48 = vpop.f32.mrb[34].mxu1 }
 0x13b   :  { %v408_v49 = vadd.f32 %v407_v42, %v1563_v47  ;;  %v1018_v52 = vpop.f32.mrb[35].mxu0  ;;  %v1093_v53 = vpop.f32.mrb[35].mxu1 }
 0x13e   :  { %v1568_v54 = vpop.f32.mrb[36].mxu0  ;;  %v1570_v57 = vpop.f32.mrb[36].mxu1 }
 0x13f   :  { %v409_v58 = vadd.f32 %v408_v49, %v1568_v54  ;;  %v1021_v59 = vpop.f32.mrb[37].mxu0  ;;  %v1096_v62 = vpop.f32.mrb[37].mxu1 }
 0x142   :  { %v1573_v63 = vpop.f32.mrb[38].mxu0  ;;  %v1575_v0 = vpop.f32.mrb[38].mxu1 }
 0x143   :  { %v410_v3 = vadd.f32 %v409_v58, %v1573_v63  ;;  %v1024_v5 = vpop.f32.mrb[39].mxu0  ;;  %v1099_v6 = vpop.f32.mrb[39].mxu1 }
 0x146   :  { %v1578_v9 = vpop.f32.mrb[40].mxu0  ;;  %v1580_v10 = vpop.f32.mrb[40].mxu1 }
 0x147   :  { %v411_v11 = vadd.f32 %v410_v3, %v1578_v9  ;;  %v1027_v18 = vpop.f32.mrb[41].mxu0  ;;  %v1102_v19 = vpop.f32.mrb[41].mxu1 }
 0x14a   :  { %v1583_v4 = vpop.f32.mrb[42].mxu0  ;;  %v1585_v24 = vpop.f32.mrb[42].mxu1 }
 0x14b   :  { %v412_v27 = vadd.f32 %v411_v11, %v1583_v4  ;;  %v1030_v28 = vpop.f32.mrb[43].mxu0  ;;  %v1105_v33 = vpop.f32.mrb[43].mxu1 }
 0x14e   :  { %v1588_v34 = vpop.f32.mrb[44].mxu0  ;;  %v1590_v37 = vpop.f32.mrb[44].mxu1 }
 0x14f   :  { %v413_v42 = vadd.f32 %v412_v27, %v1588_v34  ;;  %v1033_v43 = vpop.f32.mrb[45].mxu0  ;;  %v1108_v44 = vpop.f32.mrb[45].mxu1 }
 0x152   :  { %v263_v49 = vpop.f32.mrb[46].mxu0  ;;  %v1593_v52 = vpop.f32.mrb[46].mxu1 }
 0x153   :  { %v414_v53 = vadd.f32 %v413_v42, %v263_v49  ;;  %v1036_v58 = vpop.f32.mrb[47].mxu0  ;;  %v1111_v59 = vpop.f32.mrb[47].mxu1 }
 0x156   :  { %v268_v62 = vpop.f32.mrb[48].mxu0 }
 0x157   :  { %v415_v3 = vadd.f32 %v414_v53, %v268_v62  ;;  %v1039_v5 = vpop.f32.mrb[49].mxu0 }
 0x159   :  { %v416_v6 = vadd.f32 %v415_v3, %v1480_v13 }
 0x15b   :  { %v417_v11 = vadd.f32 %v416_v6, %v1484_v17 }
 0x15d   :  { %v418_v18 = vadd.f32 %v417_v11, %v1490_v21 }
 0x15f   :  { %v419_v19 = vadd.f32 %v418_v18, %v1495_v26 }
 0x161   :  { %v420_v27 = vadd.f32 %v419_v19, %v1500_v31 }
 0x163   :  { %v421_v28 = vadd.f32 %v420_v27, %v1505_v36 }
 0x165   :  { %v422_v33 = vadd.f32 %v421_v28, %v1510_v41 }
 0x167   :  { %v423_v42 = vadd.f32 %v422_v33, %v1515_v46 }
 0x169   :  { %v424_v43 = vadd.f32 %v423_v42, %v1520_v51 }
 0x16b   :  { %v425_v44 = vadd.f32 %v424_v43, %v1525_v56 }
 0x16d   :  { %v426_v53 = vadd.f32 %v425_v44, %v1530_v61 }
 0x16f   :  { %v427_v58 = vadd.f32 %v426_v53, %v1535_v2 }
 0x171   :  { %v428_v59 = vadd.f32 %v427_v58, %v1540_v8 }
 0x173   :  { %v429_v3 = vadd.f32 %v428_v59, %v1545_v15 }
 0x175   :  { %v430_v5 = vadd.f32 %v429_v3, %v1550_v23 }
 0x177   :  { %v431_v6 = vadd.f32 %v430_v5, %v1555_v32 }
 0x179   :  { %v432_v11 = vadd.f32 %v431_v6, %v1560_v39 }
 0x17b   :  { %v433_v18 = vadd.f32 %v432_v11, %v1565_v48 }
 0x17d   :  { %v434_v19 = vadd.f32 %v433_v18, %v1570_v57 }
 0x17f   :  { %v435_v27 = vadd.f32 %v434_v19, %v1575_v0 }
 0x181   :  { %v436_v28 = vadd.f32 %v435_v27, %v1580_v10 }
 0x183   :  { %v437_v33 = vadd.f32 %v436_v28, %v1585_v24 }
 0x185   :  { %v438_v42 = vadd.f32 %v437_v33, %v1590_v37 }
 0x187   :  { %v439_v43 = vadd.f32 %v438_v42, %v1593_v52 }
 0x189   :  { %v440_v44 = vrot.slane %v439_v43, 4 }
 0x18b   :  { %v441_v53 = vadd.f32 %v440_v44, %v439_v43 }
 0x18d   :  { %v442_v58 = vrot.slane %v441_v53, 2 }
 0x18f   :  { %v443_v59 = vadd.f32 %v442_v58, %v441_v53 }
 0x191   :  { %v444_v3 = vrot.slane %v443_v59, 1 }
 0x193   :  { %v445_v5 = vadd.f32 %v444_v3, %v443_v59 }
 0x195   :  { %v447_v6 = vmul.f32 0.0025510204, %v445_v5 }
 0x197   :  { %v1620_v11 = vsub.f32 %v1478_v12, %v447_v6  ;;  %v1623_v18 = vsub.f32 %v1482_v16, %v447_v6  ;;  %v1626_v19 = vsub.f32 %v1488_v20, %v447_v6  ;;  %v1629_v27 = vsub.f32 %v1493_v25, %v447_v6 }
 0x198   :  { %v1632_v28 = vsub.f32 %v1498_v30, %v447_v6  ;;  %v1635_v33 = vsub.f32 %v1503_v35, %v447_v6  ;;  %v1638_v42 = vsub.f32 %v1508_v40, %v447_v6  ;;  %v1641_v12 = vsub.f32 %v1513_v45, %v447_v6 }
 0x199   :  { %v1644_v16 = vsub.f32 %v1518_v50, %v447_v6  ;;  %v1647_v20 = vsub.f32 %v1523_v55, %v447_v6  ;;  %v1650_v25 = vsub.f32 %v1528_v60, %v447_v6  ;;  %v1653_v30 = vsub.f32 %v1533_v1, %v447_v6 }
 0x19a   :  { %v1656_v35 = vsub.f32 %v1538_v7, %v447_v6  ;;  %v1659_v40 = vsub.f32 %v1543_v14, %v447_v6  ;;  %v1662_v45 = vsub.f32 %v1548_v22, %v447_v6  ;;  %v1665_v50 = vsub.f32 %v1553_v29, %v447_v6 }
 0x19b   :  { %v1668_v55 = vsub.f32 %v1558_v38, %v447_v6  ;;  %v1671_v60 = vsub.f32 %v1563_v47, %v447_v6  ;;  %v1674_v1 = vsub.f32 %v1568_v54, %v447_v6  ;;  %v1677_v7 = vsub.f32 %v1573_v63, %v447_v6 }
 0x19c   :  { %v1680_v14 = vsub.f32 %v1578_v9, %v447_v6  ;;  %v1683_v22 = vsub.f32 %v1583_v4, %v447_v6  ;;  %v1686_v29 = vsub.f32 %v1588_v34, %v447_v6  ;;  %v1688_v38 = vsub.f32 %v263_v49, %v447_v6 }
 0x19d   :  { %v1690_v43 = vsub.f32 %v268_v62, %v447_v6  ;;  %v1693_v47 = vsub.f32 %v1480_v13, %v447_v6  ;;  %v1696_v54 = vsub.f32 %v1484_v17, %v447_v6  ;;  %v1699_v63 = vsub.f32 %v1490_v21, %v447_v6 }
 0x19e   :  { %v1702_v9 = vsub.f32 %v1495_v26, %v447_v6  ;;  %v1705_v4 = vsub.f32 %v1500_v31, %v447_v6  ;;  %v1708_v34 = vsub.f32 %v1505_v36, %v447_v6  ;;  %v1711_v49 = vsub.f32 %v1510_v41, %v447_v6 }
 0x19f   :  { %v1714_v13 = vsub.f32 %v1515_v46, %v447_v6  ;;  %v1717_v17 = vsub.f32 %v1520_v51, %v447_v6  ;;  %v1720_v21 = vsub.f32 %v1525_v56, %v447_v6  ;;  %v1723_v26 = vsub.f32 %v1530_v61, %v447_v6 }
 0x1a0   :  { %v1726_v31 = vsub.f32 %v1535_v2, %v447_v6  ;;  %v1729_v36 = vsub.f32 %v1540_v8, %v447_v6  ;;  %v1732_v41 = vsub.f32 %v1545_v15, %v447_v6  ;;  %v1735_v46 = vsub.f32 %v1550_v23, %v447_v6 }
 0x1a1   :  { %v1738_v51 = vsub.f32 %v1555_v32, %v447_v6  ;;  %v1741_v56 = vsub.f32 %v1560_v39, %v447_v6  ;;  %v1744_v61 = vsub.f32 %v1565_v48, %v447_v6  ;;  %v1747_v2 = vsub.f32 %v1570_v57, %v447_v6 }
 0x1a2   :  { %v1750_v8 = vsub.f32 %v1575_v0, %v447_v6  ;;  %v1753_v15 = vsub.f32 %v1580_v10, %v447_v6  ;;  %v1756_v23 = vsub.f32 %v1585_v24, %v447_v6  ;;  %v1759_v32 = vsub.f32 %v1590_v37, %v447_v6 }
 0x1a3   :  { %v1762_v39 = vsub.f32 %v1593_v52, %v447_v6  ;;  %v497_v48 = vmul.f32 %v1620_v11, %v1620_v11  ;;  %v498_v57 = vmul.f32 %v1623_v18, %v1623_v18  ;;  %v499_v0 = vmul.f32 %v1626_v19, %v1626_v19 }
 0x1a4   :  { %2216 = vst [vmem:[#allocation2_spill] sm:$0xff] %v1750_v8  ;;  %2217 = vst [vmem:[#allocation3_spill] sm:$0xff] %v1753_v15  ;;  %v500_v24 = vmul.f32 %v1629_v27, %v1629_v27  ;;  %v501_v37 = vmul.f32 %v1632_v28, %v1632_v28  ;;  %v502_v52 = vmul.f32 %v1635_v33, %v1635_v33 }
 0x1a5   :  { %2218 = vst [vmem:[#allocation4_spill] sm:$0xff] %v1756_v23  ;;  %v546_v10 = vadd.f32 %v498_v57, %v497_v48  ;;  %v503_v58 = vmul.f32 %v1638_v42, %v1638_v42  ;;  %v504_v3 = vmul.f32 %v1641_v12, %v1641_v12  ;;  %v505_v6 = vmul.f32 %v1644_v16, %v1644_v16 }
 0x1a6   :  { %v506_v57 = vmul.f32 %v1647_v20, %v1647_v20 }
 0x1a7   :  { %v547_v62 = vadd.f32 %v546_v10, %v499_v0  ;;  %v507_v10 = vmul.f32 %v1650_v25, %v1650_v25 }
 0x1a9   :  { %v548_v44 = vadd.f32 %v547_v62, %v500_v24  ;;  %v508_v62 = vmul.f32 %v1653_v30, %v1653_v30 }
 0x1ab   :  { %v549_v53 = vadd.f32 %v548_v44, %v501_v37  ;;  %v509_v44 = vmul.f32 %v1656_v35, %v1656_v35 }
 0x1ad   :  { %v550_v59 = vadd.f32 %v549_v53, %v502_v52  ;;  %v510_v53 = vmul.f32 %v1659_v40, %v1659_v40 }
 0x1af   :  { %v551_v5 = vadd.f32 %v550_v59, %v503_v58  ;;  %v511_v59 = vmul.f32 %v1662_v45, %v1662_v45 }
 0x1b1   :  { %v552_v48 = vadd.f32 %v551_v5, %v504_v3  ;;  %v512_v5 = vmul.f32 %v1665_v50, %v1665_v50 }
 0x1b3   :  { %v553_v0 = vadd.f32 %v552_v48, %v505_v6  ;;  %v513_v48 = vmul.f32 %v1668_v55, %v1668_v55 }
 0x1b5   :  { %v554_v24 = vadd.f32 %v553_v0, %v506_v57  ;;  %v514_v0 = vmul.f32 %v1671_v60, %v1671_v60 }
 0x1b7   :  { %v555_v37 = vadd.f32 %v554_v24, %v507_v10  ;;  %v515_v24 = vmul.f32 %v1674_v1, %v1674_v1 }
 0x1b9   :  { %v556_v52 = vadd.f32 %v555_v37, %v508_v62  ;;  %v516_v37 = vmul.f32 %v1677_v7, %v1677_v7 }
 0x1bb   :  { %v557_v58 = vadd.f32 %v556_v52, %v509_v44  ;;  %v517_v52 = vmul.f32 %v1680_v14, %v1680_v14 }
 0x1bd   :  { %v558_v3 = vadd.f32 %v557_v58, %v510_v53  ;;  %v518_v58 = vmul.f32 %v1683_v22, %v1683_v22 }
 0x1bf   :  { %v559_v6 = vadd.f32 %v558_v3, %v511_v59  ;;  %v519_v3 = vmul.f32 %v1686_v29, %v1686_v29 }
 0x1c1   :  { %v560_v57 = vadd.f32 %v559_v6, %v512_v5  ;;  %v520_v6 = vmul.f32 %v1688_v38, %v1688_v38 }
 0x1c3   :  { %v561_v10 = vadd.f32 %v560_v57, %v513_v48  ;;  %v521_v57 = vmul.f32 %v1690_v43, %v1690_v43 }
 0x1c5   :  { %v562_v62 = vadd.f32 %v561_v10, %v514_v0  ;;  %v522_v10 = vmul.f32 %v1693_v47, %v1693_v47 }
 0x1c7   :  { %v563_v44 = vadd.f32 %v562_v62, %v515_v24  ;;  %v523_v62 = vmul.f32 %v1696_v54, %v1696_v54 }
 0x1c9   :  { %v564_v53 = vadd.f32 %v563_v44, %v516_v37  ;;  %v524_v44 = vmul.f32 %v1699_v63, %v1699_v63 }
 0x1cb   :  { %v565_v59 = vadd.f32 %v564_v53, %v517_v52  ;;  %v525_v53 = vmul.f32 %v1702_v9, %v1702_v9 }
 0x1cd   :  { %v566_v5 = vadd.f32 %v565_v59, %v518_v58  ;;  %v526_v59 = vmul.f32 %v1705_v4, %v1705_v4 }
 0x1cf   :  { %v567_v48 = vadd.f32 %v566_v5, %v519_v3  ;;  %v527_v5 = vmul.f32 %v1708_v34, %v1708_v34 }
 0x1d1   :  { %v568_v0 = vadd.f32 %v567_v48, %v520_v6  ;;  %v528_v48 = vmul.f32 %v1711_v49, %v1711_v49 }
 0x1d3   :  { %v569_v24 = vadd.f32 %v568_v0, %v521_v57  ;;  %v529_v0 = vmul.f32 %v1714_v13, %v1714_v13 }
 0x1d5   :  { %v570_v37 = vadd.f32 %v569_v24, %v522_v10  ;;  %v530_v24 = vmul.f32 %v1717_v17, %v1717_v17 }
 0x1d7   :  { %v571_v52 = vadd.f32 %v570_v37, %v523_v62  ;;  %v531_v37 = vmul.f32 %v1720_v21, %v1720_v21 }
 0x1d9   :  { %v572_v58 = vadd.f32 %v571_v52, %v524_v44  ;;  %v532_v52 = vmul.f32 %v1723_v26, %v1723_v26 }
 0x1db   :  { %v573_v3 = vadd.f32 %v572_v58, %v525_v53  ;;  %v533_v58 = vmul.f32 %v1726_v31, %v1726_v31 }
 0x1dd   :  { %v574_v6 = vadd.f32 %v573_v3, %v526_v59  ;;  %v534_v3 = vmul.f32 %v1729_v36, %v1729_v36 }
 0x1df   :  { %v575_v57 = vadd.f32 %v574_v6, %v527_v5  ;;  %v535_v6 = vmul.f32 %v1732_v41, %v1732_v41 }
 0x1e1   :  { %v576_v10 = vadd.f32 %v575_v57, %v528_v48  ;;  %v536_v57 = vmul.f32 %v1735_v46, %v1735_v46 }
 0x1e3   :  { %v577_v62 = vadd.f32 %v576_v10, %v529_v0  ;;  %v537_v10 = vmul.f32 %v1738_v51, %v1738_v51 }
 0x1e5   :  { %v578_v44 = vadd.f32 %v577_v62, %v530_v24  ;;  %v538_v62 = vmul.f32 %v1741_v56, %v1741_v56 }
 0x1e7   :  { %v579_v53 = vadd.f32 %v578_v44, %v531_v37  ;;  %v539_v44 = vmul.f32 %v1744_v61, %v1744_v61 }
 0x1e9   :  { %v580_v59 = vadd.f32 %v579_v53, %v532_v52  ;;  %v540_v53 = vmul.f32 %v1747_v2, %v1747_v2 }
 0x1eb   :  { %v581_v5 = vadd.f32 %v580_v59, %v533_v58  ;;  %v541_v59 = vmul.f32 %v1750_v8, %v1750_v8 }
 0x1ed   :  { %v582_v48 = vadd.f32 %v581_v5, %v534_v3  ;;  %v542_v5 = vmul.f32 %v1753_v15, %v1753_v15 }
 0x1ef   :  { %v583_v0 = vadd.f32 %v582_v48, %v535_v6  ;;  %v543_v48 = vmul.f32 %v1756_v23, %v1756_v23 }
 0x1f1   :  { %v584_v24 = vadd.f32 %v583_v0, %v536_v57  ;;  %v544_v0 = vmul.f32 %v1759_v32, %v1759_v32 }
 0x1f3   :  { %v585_v37 = vadd.f32 %v584_v24, %v537_v10  ;;  %v545_v24 = vmul.f32 %v1762_v39, %v1762_v39 }
 0x1f5   :  { %v586_v52 = vadd.f32 %v585_v37, %v538_v62 }
 0x1f7   :  { %v587_v58 = vadd.f32 %v586_v52, %v539_v44 }
 0x1f9   :  { %v588_v3 = vadd.f32 %v587_v58, %v540_v53 }
 0x1fb   :  { %v589_v6 = vadd.f32 %v588_v3, %v541_v59 }
 0x1fd   :  { %v590_v57 = vadd.f32 %v589_v6, %v542_v5 }
 0x1ff   :  { %v591_v10 = vadd.f32 %v590_v57, %v543_v48 }
 0x201   :  { %v592_v62 = vadd.f32 %v591_v10, %v544_v0 }
 0x203   :  { %v593_v37 = vadd.f32 %v592_v62, %v545_v24 }
 0x205   :  { %v594_v44 = vrot.slane %v593_v37, 4 }
 0x207   :  { %v595_v52 = vadd.f32 %v594_v44, %v593_v37  ;;  %v2220_v37 = vld [vmem:[#allocation3_spill] sm:$0xff]  ;;  %v2221_v44 = vld [vmem:[#allocation4_spill] sm:$0xff] }
 0x209   :  { %v596_v53 = vrot.slane %v595_v52, 2 }
 0x20b   :  { %v597_v58 = vadd.f32 %v596_v53, %v595_v52 }
 0x20d   :  { %v598_v8 = vrot.slane %v597_v58, 1 }
 0x20f   :  { %v599_v15 = vadd.f32 %v598_v8, %v597_v58 }
 0x211   :  { %v600_v59 = vmul.f32 0.0025510204, %v599_v15 }
 0x213   :  { %v601_v3 = vadd.f32 1e-05, %v600_v59 }
 0x215   :  { %1155 = vrsqrt.f32 %v601_v3 }
 0x21f   :  { %v1156_v23 = vpop.eup %1155 }
 0x220   :  { %v603_v5 = vmul.f32 %v1156_v23, %v1620_v11  ;;  %v604_v6 = vmul.f32 %v1156_v23, %v1623_v18  ;;  %v605_v48 = vmul.f32 %v1156_v23, %v1626_v19  ;;  %v606_v57 = vmul.f32 %v1156_v23, %v1629_v27 }
 0x221   :  { %v607_v0 = vmul.f32 %v1156_v23, %v1632_v28  ;;  %v608_v10 = vmul.f32 %v1156_v23, %v1635_v33  ;;  %v609_v24 = vmul.f32 %v1156_v23, %v1638_v42  ;;  %v610_v8 = vmul.f32 %v1156_v23, %v1641_v12 }
 0x222   :  { %v611_v15 = vmul.f32 %v1156_v23, %v1644_v16  ;;  %v612_v62 = vmul.f32 %v1156_v23, %v1647_v20  ;;  %v613_v11 = vmul.f32 %v1156_v23, %v1650_v25  ;;  %v614_v18 = vmul.f32 %v1156_v23, %v1653_v30 }
 0x223   :  { %v615_v19 = vmul.f32 %v1156_v23, %v1656_v35  ;;  %v616_v27 = vmul.f32 %v1156_v23, %v1659_v40  ;;  %v617_v28 = vmul.f32 %v1156_v23, %v1662_v45  ;;  %v618_v33 = vmul.f32 %v1156_v23, %v1665_v50 }
 0x224   :  { %v619_v42 = vmul.f32 %v1156_v23, %v1668_v55  ;;  %v620_v12 = vmul.f32 %v1156_v23, %v1671_v60  ;;  %v621_v16 = vmul.f32 %v1156_v23, %v1674_v1  ;;  %v622_v20 = vmul.f32 %v1156_v23, %v1677_v7 }
 0x225   :  { %v623_v25 = vmul.f32 %v1156_v23, %v1680_v14  ;;  %v624_v30 = vmul.f32 %v1156_v23, %v1683_v22  ;;  %v625_v35 = vmul.f32 %v1156_v23, %v1686_v29  ;;  %v626_v40 = vmul.f32 %v1156_v23, %v1688_v38 }
 0x226   :  { %v627_v45 = vmul.f32 %v1156_v23, %v1690_v43  ;;  %v628_v50 = vmul.f32 %v1156_v23, %v1693_v47  ;;  %v629_v55 = vmul.f32 %v1156_v23, %v1696_v54  ;;  %v630_v60 = vmul.f32 %v1156_v23, %v1699_v63 }
 0x227   :  { %v631_v1 = vmul.f32 %v1156_v23, %v1702_v9  ;;  %v632_v7 = vmul.f32 %v1156_v23, %v1705_v4  ;;  %v633_v14 = vmul.f32 %v1156_v23, %v1708_v34  ;;  %v634_v22 = vmul.f32 %v1156_v23, %v1711_v49  ;;  %v866_v34 = vld [vmem:[%s2210_s2] ss:$0 sm:$0xff] }
 0x228   :  { %v635_v29 = vmul.f32 %v1156_v23, %v1714_v13  ;;  %v636_v38 = vmul.f32 %v1156_v23, %v1717_v17  ;;  %v637_v43 = vmul.f32 %v1156_v23, %v1720_v21  ;;  %v638_v47 = vmul.f32 %v1156_v23, %v1723_v26  ;;  %v2219_v26 = vld [vmem:[#allocation2_spill] sm:$0xff] }
 0x229   :  { %v639_v54 = vmul.f32 %v1156_v23, %v1726_v31  ;;  %v640_v63 = vmul.f32 %v1156_v23, %v1729_v36  ;;  %v641_v9 = vmul.f32 %v1156_v23, %v1732_v41  ;;  %v642_v4 = vmul.f32 %v1156_v23, %v1735_v46 }
 0x22a   :  { %v643_v49 = vmul.f32 %v1156_v23, %v1738_v51  ;;  %v644_v13 = vmul.f32 %v1156_v23, %v1741_v56  ;;  %v645_v17 = vmul.f32 %v1156_v23, %v1744_v61  ;;  %v646_v21 = vmul.f32 %v1156_v23, %v1747_v2 }
 0x22b   :  { %v647_v31 = vmul.f32 %v1156_v23, %v2219_v26  ;;  %v648_v36 = vmul.f32 %v1156_v23, %v2220_v37  ;;  %v649_v41 = vmul.f32 %v1156_v23, %v2221_v44  ;;  %v650_v46 = vmul.f32 %v1156_v23, %v1759_v32 }
 0x22c   :  { %v651_v52 = vmul.f32 %v1156_v23, %v1762_v39  ;;  %v659_v53 = vmul.f32 %v866_v34, %v603_v5  ;;  %v660_v58 = vmul.f32 %v866_v34, %v604_v6  ;;  %v661_v59 = vmul.f32 %v866_v34, %v605_v48 }
 0x22d   :  { %v662_v51 = vmul.f32 %v866_v34, %v606_v57  ;;  %v663_v3 = vmul.f32 %v866_v34, %v607_v0  ;;  %v664_v56 = vmul.f32 %v866_v34, %v608_v10  ;;  %v665_v61 = vmul.f32 %v866_v34, %v609_v24 }
 0x22e   :  { %v666_v2 = vmul.f32 %v866_v34, %v610_v8  ;;  %v667_v26 = vmul.f32 %v866_v34, %v611_v15  ;;  %v668_v37 = vmul.f32 %v866_v34, %v612_v62  ;;  %v669_v44 = vmul.f32 %v866_v34, %v613_v11 }
 0x22f   :  { %v670_v32 = vmul.f32 %v866_v34, %v614_v18  ;;  %v671_v23 = vmul.f32 %v866_v34, %v615_v19  ;;  %v672_v39 = vmul.f32 %v866_v34, %v616_v27  ;;  %v673_v5 = vmul.f32 %v866_v34, %v617_v28 }
 0x230   :  { %v674_v6 = vmul.f32 %v866_v34, %v618_v33  ;;  %v675_v48 = vmul.f32 %v866_v34, %v619_v42  ;;  %v676_v57 = vmul.f32 %v866_v34, %v620_v12  ;;  %v677_v0 = vmul.f32 %v866_v34, %v621_v16 }
 0x231   :  { %v678_v10 = vmul.f32 %v866_v34, %v622_v20  ;;  %v679_v24 = vmul.f32 %v866_v34, %v623_v25  ;;  %v680_v8 = vmul.f32 %v866_v34, %v624_v30  ;;  %v681_v15 = vmul.f32 %v866_v34, %v625_v35 }
 0x232   :  { %v682_v62 = vmul.f32 %v866_v34, %v626_v40  ;;  %v683_v11 = vmul.f32 %v866_v34, %v627_v45  ;;  %v684_v18 = vmul.f32 %v866_v34, %v628_v50  ;;  %v685_v19 = vmul.f32 %v866_v34, %v629_v55  ;;  %v867_v50 = vld [vmem:[%s2211_s3] ss:$0 sm:$0xff] }
 0x233   :  { %v686_v27 = vmul.f32 %v866_v34, %v630_v60  ;;  %v687_v28 = vmul.f32 %v866_v34, %v631_v1  ;;  %v688_v33 = vmul.f32 %v866_v34, %v632_v7  ;;  %v689_v42 = vmul.f32 %v866_v34, %v633_v14 }
 0x234   :  { %v690_v12 = vmul.f32 %v866_v34, %v634_v22  ;;  %v691_v16 = vmul.f32 %v866_v34, %v635_v29  ;;  %v692_v20 = vmul.f32 %v866_v34, %v636_v38  ;;  %v693_v25 = vmul.f32 %v866_v34, %v637_v43 }
 0x235   :  { %v694_v30 = vmul.f32 %v866_v34, %v638_v47  ;;  %v695_v35 = vmul.f32 %v866_v34, %v639_v54  ;;  %v696_v40 = vmul.f32 %v866_v34, %v640_v63  ;;  %v697_v45 = vmul.f32 %v866_v34, %v641_v9 }
 0x236   :  { %v698_v55 = vmul.f32 %v866_v34, %v642_v4  ;;  %v699_v60 = vmul.f32 %v866_v34, %v643_v49  ;;  %v700_v1 = vmul.f32 %v866_v34, %v644_v13  ;;  %v701_v7 = vmul.f32 %v866_v34, %v645_v17 }
 0x237   :  { %v702_v14 = vmul.f32 %v866_v34, %v646_v21  ;;  %v703_v22 = vmul.f32 %v866_v34, %v647_v31  ;;  %v704_v29 = vmul.f32 %v866_v34, %v648_v36  ;;  %v705_v38 = vmul.f32 %v866_v34, %v649_v41 }
 0x238   :  { %v706_v43 = vmul.f32 %v866_v34, %v650_v46  ;;  %v707_v47 = vmul.f32 %v866_v34, %v651_v52  ;;  %v715_v54 = vadd.f32 %v867_v50, %v659_v53  ;;  %v1917_v63 = vadd.f32 %v867_v50, %v660_v58 }
 0x239   :  { %v1919_v9 = vadd.f32 %v867_v50, %v661_v59  ;;  %v1921_v4 = vadd.f32 %v867_v50, %v662_v51  ;;  %v1923_v49 = vadd.f32 %v867_v50, %v663_v3  ;;  %v1925_v13 = vadd.f32 %v867_v50, %v664_v56 }
 0x23a   :  { %v1927_v17 = vadd.f32 %v867_v50, %v665_v61  ;;  %v1929_v21 = vadd.f32 %v867_v50, %v666_v2  ;;  %v1931_v31 = vadd.f32 %v867_v50, %v667_v26  ;;  %v1933_v36 = vadd.f32 %v867_v50, %v668_v37 }
 0x23b   :  { %v1935_v34 = vadd.f32 %v867_v50, %v669_v44  ;;  %v1937_v41 = vadd.f32 %v867_v50, %v670_v32  ;;  %v1939_v46 = vadd.f32 %v867_v50, %v671_v23  ;;  %v1941_v52 = vadd.f32 %v867_v50, %v672_v39 }
 0x23c   :  { %v1943_v53 = vadd.f32 %v867_v50, %v673_v5  ;;  %v1945_v58 = vadd.f32 %v867_v50, %v674_v6  ;;  %v1947_v59 = vadd.f32 %v867_v50, %v675_v48  ;;  %v1949_v51 = vadd.f32 %v867_v50, %v676_v57 }
 0x23d   :  { %v1951_v3 = vadd.f32 %v867_v50, %v677_v0  ;;  %v1953_v56 = vadd.f32 %v867_v50, %v678_v10  ;;  %v1955_v61 = vadd.f32 %v867_v50, %v679_v24  ;;  %v1957_v2 = vadd.f32 %v867_v50, %v680_v8 }
 0x23e   :  { %v1959_v26 = vadd.f32 %v867_v50, %v681_v15  ;;  %v1961_v37 = vadd.f32 %v867_v50, %v682_v62  ;;  %v1963_v44 = vadd.f32 %v867_v50, %v683_v11  ;;  %v1965_v32 = vadd.f32 %v867_v50, %v684_v18 }
 0x23f   :  { %v1967_v23 = vadd.f32 %v867_v50, %v685_v19  ;;  %v1969_v39 = vadd.f32 %v867_v50, %v686_v27  ;;  %v1971_v5 = vadd.f32 %v867_v50, %v687_v28  ;;  %v1973_v6 = vadd.f32 %v867_v50, %v688_v33 }
 0x240   :  { %v1975_v48 = vadd.f32 %v867_v50, %v689_v42  ;;  %v1977_v57 = vadd.f32 %v867_v50, %v690_v12  ;;  %v1979_v0 = vadd.f32 %v867_v50, %v691_v16  ;;  %v1981_v10 = vadd.f32 %v867_v50, %v692_v20 }
 0x241   :  { %v1983_v24 = vadd.f32 %v867_v50, %v693_v25  ;;  %v1985_v8 = vadd.f32 %v867_v50, %v694_v30  ;;  %v1987_v15 = vadd.f32 %v867_v50, %v695_v35  ;;  %v1989_v62 = vadd.f32 %v867_v50, %v696_v40 }
 0x242   :  { %v1991_v11 = vadd.f32 %v867_v50, %v697_v45  ;;  %v1993_v18 = vadd.f32 %v867_v50, %v698_v55  ;;  %v1995_v19 = vadd.f32 %v867_v50, %v699_v60  ;;  %v1997_v27 = vadd.f32 %v867_v50, %v700_v1 }
 0x243   :  { %v1999_v28 = vadd.f32 %v867_v50, %v701_v7  ;;  %v2001_v33 = vadd.f32 %v867_v50, %v702_v14  ;;  %v2003_v42 = vadd.f32 %v867_v50, %v703_v22  ;;  %v2005_v12 = vadd.f32 %v867_v50, %v704_v29 }
 0x244   :  { %v2007_v16 = vadd.f32 %v867_v50, %v705_v38  ;;  %v2009_v20 = vadd.f32 %v867_v50, %v706_v43  ;;  %v2011_v25 = vadd.f32 %v867_v50, %v707_v47  ;;  %v764_v30 = vmax.f32 %v715_v54, 0.0 }
 0x245   :  { %v765_v35 = vmax.f32 %v1917_v63, 0.0  ;;  %v766_v40 = vmax.f32 %v1919_v9, 0.0  ;;  %v767_v45 = vmax.f32 %v1921_v4, 0.0  ;;  %v768_v55 = vmax.f32 %v1923_v49, 0.0 }
 0x246   :  { %v769_v60 = vmax.f32 %v1925_v13, 0.0  ;;  %v770_v1 = vmax.f32 %v1927_v17, 0.0  ;;  %v771_v7 = vmax.f32 %v1929_v21, 0.0  ;;  %v772_v14 = vmax.f32 %v1931_v31, 0.0  ;;  %813 = vst [vmem:[%s2212_s4] sm:$0xff] %v764_v30 }
 0x247   :  { %v773_v50 = vmax.f32 %v1933_v36, 0.0  ;;  %v774_v22 = vmax.f32 %v1935_v34, 0.0  ;;  %v775_v29 = vmax.f32 %v1937_v41, 0.0  ;;  %v776_v38 = vmax.f32 %v1939_v46, 0.0  ;;  %814 = vst [vmem:[%s2212_s4 + $0x8] sm:$0xff] %v765_v35  ;;  %815 = vst [vmem:[%s2212_s4 + $0x10] sm:$0xff] %v766_v40 }
 0x248   :  { %816 = vst [vmem:[%s2212_s4 + $0x18] sm:$0xff] %v767_v45  ;;  %817 = vst [vmem:[%s2212_s4 + $0x20] sm:$0xff] %v768_v55  ;;  %v777_v43 = vmax.f32 %v1941_v52, 0.0  ;;  %v778_v47 = vmax.f32 %v1943_v53, 0.0  ;;  %v779_v54 = vmax.f32 %v1945_v58, 0.0  ;;  %v780_v63 = vmax.f32 %v1947_v59, 0.0 }
 0x249   :  { %818 = vst [vmem:[%s2212_s4 + $0x28] sm:$0xff] %v769_v60  ;;  %819 = vst [vmem:[%s2212_s4 + $0x30] sm:$0xff] %v770_v1  ;;  %v781_v9 = vmax.f32 %v1949_v51, 0.0  ;;  %v782_v4 = vmax.f32 %v1951_v3, 0.0  ;;  %v783_v49 = vmax.f32 %v1953_v56, 0.0  ;;  %v784_v13 = vmax.f32 %v1955_v61, 0.0 }
 0x24a   :  { %820 = vst [vmem:[%s2212_s4 + $0x38] sm:$0xff] %v771_v7  ;;  %821 = vst [vmem:[%s2212_s4 + $0x40] sm:$0xff] %v772_v14  ;;  %v785_v17 = vmax.f32 %v1957_v2, 0.0  ;;  %v786_v21 = vmax.f32 %v1959_v26, 0.0  ;;  %v787_v31 = vmax.f32 %v1961_v37, 0.0  ;;  %v788_v36 = vmax.f32 %v1963_v44, 0.0 }
 0x24b   :  { %822 = vst [vmem:[%s2212_s4 + $0x48] sm:$0xff] %v773_v50  ;;  %823 = vst [vmem:[%s2212_s4 + $0x50] sm:$0xff] %v774_v22  ;;  %v789_v34 = vmax.f32 %v1965_v32, 0.0  ;;  %v790_v41 = vmax.f32 %v1967_v23, 0.0  ;;  %v791_v46 = vmax.f32 %v1969_v39, 0.0  ;;  %v792_v52 = vmax.f32 %v1971_v5, 0.0 }
 0x24c   :  { %824 = vst [vmem:[%s2212_s4 + $0x58] sm:$0xff] %v775_v29  ;;  %825 = vst [vmem:[%s2212_s4 + $0x60] sm:$0xff] %v776_v38  ;;  %v793_v53 = vmax.f32 %v1973_v6, 0.0  ;;  %v794_v58 = vmax.f32 %v1975_v48, 0.0  ;;  %v795_v59 = vmax.f32 %v1977_v57, 0.0  ;;  %v796_v51 = vmax.f32 %v1979_v0, 0.0 }
 0x24d   :  { %826 = vst [vmem:[%s2212_s4 + $0x68] sm:$0xff] %v777_v43  ;;  %827 = vst [vmem:[%s2212_s4 + $0x70] sm:$0xff] %v778_v47  ;;  %v797_v3 = vmax.f32 %v1981_v10, 0.0  ;;  %v798_v56 = vmax.f32 %v1983_v24, 0.0  ;;  %v799_v61 = vmax.f32 %v1985_v8, 0.0  ;;  %v800_v2 = vmax.f32 %v1987_v15, 0.0 }
 0x24e   :  { %828 = vst [vmem:[%s2212_s4 + $0x78] sm:$0xff] %v779_v54  ;;  %829 = vst [vmem:[%s2212_s4 + $0x80] sm:$0xff] %v780_v63  ;;  %v801_v26 = vmax.f32 %v1989_v62, 0.0  ;;  %v802_v37 = vmax.f32 %v1991_v11, 0.0  ;;  %v803_v44 = vmax.f32 %v1993_v18, 0.0  ;;  %v804_v32 = vmax.f32 %v1995_v19, 0.0 }
 0x24f   :  { %830 = vst [vmem:[%s2212_s4 + $0x88] sm:$0xff] %v781_v9  ;;  %831 = vst [vmem:[%s2212_s4 + $0x90] sm:$0xff] %v782_v4  ;;  %v805_v23 = vmax.f32 %v1997_v27, 0.0  ;;  %v806_v39 = vmax.f32 %v1999_v28, 0.0  ;;  %v807_v5 = vmax.f32 %v2001_v33, 0.0  ;;  %v808_v6 = vmax.f32 %v2003_v42, 0.0 }
 0x250   :  { %832 = vst [vmem:[%s2212_s4 + $0x98] sm:$0xff] %v783_v49  ;;  %833 = vst [vmem:[%s2212_s4 + $0xa0] sm:$0xff] %v784_v13  ;;  %v809_v48 = vmax.f32 %v2005_v12, 0.0  ;;  %v810_v57 = vmax.f32 %v2007_v16, 0.0  ;;  %v811_v0 = vmax.f32 %v2009_v20, 0.0  ;;  %v812_v10 = vmax.f32 %v2011_v25, 0.0 }
 0x251   :  { %834 = vst [vmem:[%s2212_s4 + $0xa8] sm:$0xff] %v785_v17  ;;  %835 = vst [vmem:[%s2212_s4 + $0xb0] sm:$0xff] %v786_v21 }
 0x252   :  { %836 = vst [vmem:[%s2212_s4 + $0xb8] sm:$0xff] %v787_v31  ;;  %837 = vst [vmem:[%s2212_s4 + $0xc0] sm:$0xff] %v788_v36 }
 0x253   :  { %838 = vst [vmem:[%s2212_s4 + $0xc8] sm:$0xff] %v789_v34  ;;  %839 = vst [vmem:[%s2212_s4 + $0xd0] sm:$0xff] %v790_v41 }
 0x254   :  { %840 = vst [vmem:[%s2212_s4 + $0xd8] sm:$0xff] %v791_v46  ;;  %841 = vst [vmem:[%s2212_s4 + $0xe0] sm:$0xff] %v792_v52 }
 0x255   :  { %842 = vst [vmem:[%s2212_s4 + $0xe8] sm:$0xff] %v793_v53  ;;  %843 = vst [vmem:[%s2212_s4 + $0xf0] sm:$0xff] %v794_v58 }
 0x256   :  { %844 = vst [vmem:[%s2212_s4 + $0xf8] sm:$0xff] %v795_v59  ;;  %845 = vst [vmem:[%s2212_s4 + $0x100] sm:$0xff] %v796_v51 }
 0x257   :  { %846 = vst [vmem:[%s2212_s4 + $0x108] sm:$0xff] %v797_v3  ;;  %847 = vst [vmem:[%s2212_s4 + $0x110] sm:$0xff] %v798_v56 }
 0x258   :  { %848 = vst [vmem:[%s2212_s4 + $0x118] sm:$0xff] %v799_v61  ;;  %849 = vst [vmem:[%s2212_s4 + $0x120] sm:$0xff] %v800_v2 }
 0x259   :  { %850 = vst [vmem:[%s2212_s4 + $0x128] sm:$0xff] %v801_v26  ;;  %851 = vst [vmem:[%s2212_s4 + $0x130] sm:$0xff] %v802_v37 }
 0x25a   :  { %852 = vst [vmem:[%s2212_s4 + $0x138] sm:$0xff] %v803_v44  ;;  %853 = vst [vmem:[%s2212_s4 + $0x140] sm:$0xff] %v804_v32 }
 0x25b   :  { %854 = vst [vmem:[%s2212_s4 + $0x148] sm:$0xff] %v805_v23  ;;  %855 = vst [vmem:[%s2212_s4 + $0x150] sm:$0xff] %v806_v39 }
 0x25c   :  { %856 = vst [vmem:[%s2212_s4 + $0x158] sm:$0xff] %v807_v5  ;;  %857 = vst [vmem:[%s2212_s4 + $0x160] sm:$0xff] %v808_v6 }
 0x25d   :  { %858 = vst [vmem:[%s2212_s4 + $0x168] sm:$0xff] %v809_v48  ;;  %859 = vst [vmem:[%s2212_s4 + $0x170] sm:$0xff] %v810_v57 }
 0x25e   :  { %860 = vst [vmem:[%s2212_s4 + $0x178] sm:$0xff] %v811_v0  ;;  %861 = vst [vmem:[%s2212_s4 + $0x180] sm:$0xff] %v812_v10 }

// kernel: dqn_forward.4
= control target key start
LH: loop header
LB: loop body
LE: loop exit
PB: predicated region body
PF: predicated region fallthrough
CT: control target
= control target key end

     0   :  { %vm3135_vm0 = vmmov 0   ;;  %vm1897_vm1 = vcmask 1041408   ;;  %s4939_s1 = inlined_call_operand.vmem [shape: f32[3200,128], index: 1, kind: input, shape index: {}]   ;;  %s4940_s0 = inlined_call_operand.vmem [shape: f32[50,3200], index: 0, kind: input, shape index: {}]   ;;  %s4941_s2 = inlined_call_operand.vmem [shape: f32[1,128], index: 2, kind: input, shape index: {}]   ;;  %s4942_s3 = inlined_call_operand.vmem [shape: f32[1,128], index: 3, kind: input, shape index: {}]   ;;  %s4943_s4 = inlined_call_operand.vmem [shape: f32[50,128], index: 4, kind: output, shape index: {}]  }
   0x1   :  { %v208_v0 = vld [vmem:[%s4939_s1 + $0x80] sm:$0xff]  ;;  %v209_v1 = vld [vmem:[%s4939_s1 + $0x88] sm:$0xff]  ;;  %v210_v11 = vld [vmem:[%s4939_s1 + $0x90] sm:$0xff] }
   0x2   :  { %v240_v2 = vld [vmem:[%s4939_s1 + $0x180] sm:$0xff]  ;;  %v2705_v3 = vpack.c.bf16 %v209_v1, %v208_v0  ;;  %v241_v4 = vld [vmem:[%s4939_s1 + $0x188] sm:$0xff]  ;;  %v211_v13 = vld [vmem:[%s4939_s1 + $0x98] sm:$0xff] }
   0x3   :  { %v192_v5 = vld [vmem:[%s4939_s1] sm:$0xff]  ;;  %v193_v6 = vld [vmem:[%s4939_s1 + $0x8] sm:$0xff]  ;;  %v2737_v7 = vpack.c.bf16 %v241_v4, %v240_v2  ;;  %v242_v14 = vld [vmem:[%s4939_s1 + $0x190] sm:$0xff]  ;;  %v2709_v16 = vpack.c.bf16 %v211_v13, %v210_v11 }
   0x4   :  { %v2707_v8 = vpack.c.bf16 %v193_v6, %v192_v5  ;;  %v224_v9 = vld [vmem:[%s4939_s1 + $0x100] sm:$0xff]  ;;  %v225_v10 = vld [vmem:[%s4939_s1 + $0x108] sm:$0xff]  ;;  %2706 = vmatprep.subr.bf16.mxu0 %v2705_v3  ;;  %v243_v15 = vld [vmem:[%s4939_s1 + $0x198] sm:$0xff] }
   0x5   :  { %v2739_v12 = vpack.c.bf16 %v225_v10, %v224_v9  ;;  %2738 = vmatprep.subr.bf16.mxu1 %v2737_v7  ;;  %v2741_v17 = vpack.c.bf16 %v243_v15, %v242_v14  ;;  %v194_v18 = vld [vmem:[%s4939_s1 + $0x10] sm:$0xff]  ;;  %v195_v19 = vld [vmem:[%s4939_s1 + $0x18] sm:$0xff]  ;;  %v212_v23 = vld [vmem:[%s4939_s1 + $0xa0] sm:$0xff] }
   0x6   :  { %2708 = vmatpush3.bf16.msra.mxu0 %v2707_v8  ;;  %v226_v20 = vld [vmem:[%s4939_s1 + $0x110] sm:$0xff]  ;;  %v2711_v21 = vpack.c.bf16 %v195_v19, %v194_v18  ;;  %v227_v22 = vld [vmem:[%s4939_s1 + $0x118] sm:$0xff]  ;;  %v213_v24 = vld [vmem:[%s4939_s1 + $0xa8] sm:$0xff] }
   0x7   :  { %2740 = vmatpush3.bf16.msra.mxu1 %v2739_v12  ;;  %2710 = vmatprep.subr.bf16.mxu0 %v2709_v16  ;;  %v2743_v25 = vpack.c.bf16 %v227_v22, %v226_v20  ;;  %v2713_v26 = vpack.c.bf16 %v213_v24, %v212_v23  ;;  %v244_v27 = vld [vmem:[%s4939_s1 + $0x1a0] sm:$0xff]  ;;  %v245_v28 = vld [vmem:[%s4939_s1 + $0x1a8] sm:$0xff]  ;;  %v214_v35 = vld [vmem:[%s4939_s1 + $0xb0] sm:$0xff] }
   0x8   :  { %2742 = vmatprep.subr.bf16.mxu1 %v2741_v17  ;;  %v196_v29 = vld [vmem:[%s4939_s1 + $0x20] sm:$0xff]  ;;  %v2745_v30 = vpack.c.bf16 %v245_v28, %v244_v27  ;;  %v197_v31 = vld [vmem:[%s4939_s1 + $0x28] sm:$0xff]  ;;  %v215_v36 = vld [vmem:[%s4939_s1 + $0xb8] sm:$0xff] }
   0x9   :  { %v228_v32 = vld [vmem:[%s4939_s1 + $0x120] sm:$0xff]  ;;  %v229_v33 = vld [vmem:[%s4939_s1 + $0x128] sm:$0xff]  ;;  %v2715_v34 = vpack.c.bf16 %v197_v31, %v196_v29  ;;  %v246_v37 = vld [vmem:[%s4939_s1 + $0x1b0] sm:$0xff]  ;;  %v2717_v39 = vpack.c.bf16 %v215_v36, %v214_v35 }
   0xa   :  { %2712 = vmatpush3.bf16.msra.mxu0 %v2711_v21  ;;  %v2747_v38 = vpack.c.bf16 %v229_v33, %v228_v32  ;;  %v247_v40 = vld [vmem:[%s4939_s1 + $0x1b8] sm:$0xff]  ;;  %v198_v41 = vld [vmem:[%s4939_s1 + $0x30] sm:$0xff]  ;;  %v216_v46 = vld [vmem:[%s4939_s1 + $0xc0] sm:$0xff] }
   0xb   :  { %2744 = vmatpush3.bf16.msra.mxu1 %v2743_v25  ;;  %2714 = vmatprep.subr.bf16.mxu0 %v2713_v26  ;;  %v199_v42 = vld [vmem:[%s4939_s1 + $0x38] sm:$0xff]  ;;  %v2749_v43 = vpack.c.bf16 %v247_v40, %v246_v37  ;;  %v230_v44 = vld [vmem:[%s4939_s1 + $0x130] sm:$0xff]  ;;  %v217_v47 = vld [vmem:[%s4939_s1 + $0xc8] sm:$0xff] }
   0xc   :  { %2746 = vmatprep.subr.bf16.mxu1 %v2745_v30  ;;  %v231_v45 = vld [vmem:[%s4939_s1 + $0x138] sm:$0xff]  ;;  %v248_v48 = vld [vmem:[%s4939_s1 + $0x1c0] sm:$0xff]  ;;  %v249_v49 = vld [vmem:[%s4939_s1 + $0x1c8] sm:$0xff]  ;;  %v2719_v50 = vpack.c.bf16 %v199_v42, %v198_v41  ;;  %v2721_v52 = vpack.c.bf16 %v217_v47, %v216_v46 }
   0xd   :  { %v2751_v51 = vpack.c.bf16 %v231_v45, %v230_v44  ;;  %v200_v53 = vld [vmem:[%s4939_s1 + $0x40] sm:$0xff]  ;;  %v201_v54 = vld [vmem:[%s4939_s1 + $0x48] sm:$0xff]  ;;  %v2753_v56 = vpack.c.bf16 %v249_v49, %v248_v48  ;;  %v218_v58 = vld [vmem:[%s4939_s1 + $0xd0] sm:$0xff] }
   0xe   :  { %2716 = vmatpush3.bf16.msra.mxu0 %v2715_v34  ;;  %v232_v55 = vld [vmem:[%s4939_s1 + $0x140] sm:$0xff]  ;;  %v233_v57 = vld [vmem:[%s4939_s1 + $0x148] sm:$0xff]  ;;  %v219_v59 = vld [vmem:[%s4939_s1 + $0xd8] sm:$0xff]  ;;  %v2723_v62 = vpack.c.bf16 %v201_v54, %v200_v53 }
   0xf   :  { %2748 = vmatpush3.bf16.msra.mxu1 %v2747_v38  ;;  %2718 = vmatprep.subr.bf16.mxu0 %v2717_v39  ;;  %v250_v60 = vld [vmem:[%s4939_s1 + $0x1d0] sm:$0xff]  ;;  %v251_v61 = vld [vmem:[%s4939_s1 + $0x1d8] sm:$0xff]  ;;  %v2755_v63 = vpack.c.bf16 %v233_v57, %v232_v55  ;;  %v2725_v0 = vpack.c.bf16 %v219_v59, %v218_v58  ;;  %v220_v6 = vld [vmem:[%s4939_s1 + $0xe0] sm:$0xff] }
  0x10   :  { %2750 = vmatprep.subr.bf16.mxu1 %v2749_v43  ;;  %v202_v1 = vld [vmem:[%s4939_s1 + $0x50] sm:$0xff]  ;;  %v203_v2 = vld [vmem:[%s4939_s1 + $0x58] sm:$0xff]  ;;  %v2757_v4 = vpack.c.bf16 %v251_v61, %v250_v60  ;;  %v221_v7 = vld [vmem:[%s4939_s1 + $0xe8] sm:$0xff] }
  0x11   :  { %v234_v3 = vld [vmem:[%s4939_s1 + $0x150] sm:$0xff]  ;;  %v235_v5 = vld [vmem:[%s4939_s1 + $0x158] sm:$0xff]  ;;  %v252_v8 = vld [vmem:[%s4939_s1 + $0x1e0] sm:$0xff]  ;;  %v2727_v10 = vpack.c.bf16 %v203_v2, %v202_v1  ;;  %v2729_v14 = vpack.c.bf16 %v221_v7, %v220_v6 }
  0x12   :  { %2720 = vmatpush3.bf16.msra.mxu0 %v2719_v50  ;;  %v253_v9 = vld [vmem:[%s4939_s1 + $0x1e8] sm:$0xff]  ;;  %v204_v11 = vld [vmem:[%s4939_s1 + $0x60] sm:$0xff]  ;;  %v2759_v13 = vpack.c.bf16 %v235_v5, %v234_v3  ;;  %v20_v17 = vld [vmem:[%s4940_s0 + $0x18] sm:$0xff] }
  0x13   :  { %2752 = vmatpush3.bf16.msra.mxu1 %v2751_v51  ;;  %2722 = vmatprep.subr.bf16.mxu0 %v2721_v52  ;;  %v205_v12 = vld [vmem:[%s4939_s1 + $0x68] sm:$0xff]  ;;  %v236_v15 = vld [vmem:[%s4939_s1 + $0x160] sm:$0xff]  ;;  %v2761_v18 = vpack.c.bf16 %v253_v9, %v252_v8  ;;  %v222_v20 = vld [vmem:[%s4939_s1 + $0xf0] sm:$0xff] }
  0x14   :  { %2754 = vmatprep.subr.bf16.mxu1 %v2753_v56  ;;  %v18_v16 = vld [vmem:[%s4940_s0 + $0x8] sm:$0xff]  ;;  %v223_v21 = vld [vmem:[%s4939_s1 + $0xf8] sm:$0xff]  ;;  %v254_v22 = vld [vmem:[%s4939_s1 + $0x1f0] sm:$0xff]  ;;  %756 = vmatprep.mubr.f32.mxu1 %v20_v17  ;;  %v2731_v24 = vpack.c.bf16 %v205_v12, %v204_v11 }
  0x15   :  { %v237_v19 = vld [vmem:[%s4939_s1 + $0x168] sm:$0xff]  ;;  %656 = vmatprep.mubr.f32.mxu0 %v18_v16  ;;  %v255_v23 = vld [vmem:[%s4939_s1 + $0x1f8] sm:$0xff]  ;;  %v2733_v26 = vpack.c.bf16 %v223_v21, %v222_v20  ;;  %v206_v27 = vld [vmem:[%s4939_s1 + $0x70] sm:$0xff] }
  0x16   :  { %2724 = vmatpush3.bf16.msra.mxu0 %v2723_v62  ;;  %v2763_v25 = vpack.c.bf16 %v237_v19, %v236_v15  ;;  %v207_v28 = vld [vmem:[%s4939_s1 + $0x78] sm:$0xff]  ;;  %v238_v29 = vld [vmem:[%s4939_s1 + $0x170] sm:$0xff]  ;;  %v2765_v30 = vpack.c.bf16 %v255_v23, %v254_v22  ;;  %v272_v32 = vld [vmem:[%s4939_s1 + $0x280] sm:$0xff] }
  0x17   :  { %2756 = vmatpush3.bf16.msra.mxu1 %v2755_v63  ;;  %2726 = vmatprep.subr.bf16.mxu0 %v2725_v0  ;;  %v239_v31 = vld [vmem:[%s4939_s1 + $0x178] sm:$0xff]  ;;  %v273_v33 = vld [vmem:[%s4939_s1 + $0x288] sm:$0xff]  ;;  %v304_v34 = vld [vmem:[%s4939_s1 + $0x380] sm:$0xff]  ;;  %v2735_v36 = vpack.c.bf16 %v207_v28, %v206_v27 }
  0x18   :  { %2758 = vmatprep.subr.bf16.mxu1 %v2757_v4  ;;  %v305_v35 = vld [vmem:[%s4939_s1 + $0x388] sm:$0xff]  ;;  %v2767_v37 = vpack.c.bf16 %v239_v31, %v238_v29  ;;  %v2769_v38 = vpack.c.bf16 %v273_v33, %v272_v32  ;;  %v256_v39 = vld [vmem:[%s4939_s1 + $0x200] sm:$0xff]  ;;  %v274_v44 = vld [vmem:[%s4939_s1 + $0x290] sm:$0xff] }
  0x19   :  { %v257_v40 = vld [vmem:[%s4939_s1 + $0x208] sm:$0xff]  ;;  %v288_v41 = vld [vmem:[%s4939_s1 + $0x300] sm:$0xff]  ;;  %v2801_v42 = vpack.c.bf16 %v305_v35, %v304_v34  ;;  %v275_v45 = vld [vmem:[%s4939_s1 + $0x298] sm:$0xff] }
  0x1a   :  { %2728 = vmatpush3.bf16.msra.mxu0 %v2727_v10  ;;  %v289_v43 = vld [vmem:[%s4939_s1 + $0x308] sm:$0xff]  ;;  %v306_v46 = vld [vmem:[%s4939_s1 + $0x390] sm:$0xff]  ;;  %v307_v47 = vld [vmem:[%s4939_s1 + $0x398] sm:$0xff]  ;;  %v2771_v50 = vpack.c.bf16 %v257_v40, %v256_v39  ;;  %v2773_v52 = vpack.c.bf16 %v275_v45, %v274_v44 }
  0x1b   :  { %2760 = vmatpush3.bf16.msra.mxu1 %v2759_v13  ;;  %2730 = vmatprep.subr.bf16.mxu0 %v2729_v14  ;;  %v17_v48 = vld [vmem:[%s4940_s0] sm:$0xff]  ;;  %v19_v49 = vld [vmem:[%s4940_s0 + $0x10] sm:$0xff]  ;;  %v2803_v51 = vpack.c.bf16 %v289_v43, %v288_v41  ;;  %v259_v54 = vld [vmem:[%s4939_s1 + $0x218] sm:$0xff]  ;;  %v2805_v56 = vpack.c.bf16 %v307_v47, %v306_v46 }
  0x1c   :  { %2762 = vmatprep.subr.bf16.mxu1 %v2761_v18  ;;  %v258_v53 = vld [vmem:[%s4939_s1 + $0x210] sm:$0xff]  ;;  %v291_v57 = vld [vmem:[%s4939_s1 + $0x318] sm:$0xff]  ;;  %v276_v58 = vld [vmem:[%s4939_s1 + $0x2a0] sm:$0xff] }
  0x1d   :  { %v290_v55 = vld [vmem:[%s4939_s1 + $0x310] sm:$0xff]  ;;  %v277_v59 = vld [vmem:[%s4939_s1 + $0x2a8] sm:$0xff]  ;;  %v308_v61 = vld [vmem:[%s4939_s1 + $0x3a0] sm:$0xff]  ;;  %v2775_v63 = vpack.c.bf16 %v259_v54, %v258_v53 }
  0x1e   :  { %2732 = vmatpush3.bf16.msra.mxu0 %v2731_v24  ;;  %v43_v60 = vld [vmem:[%s4940_s0 + $0xd0] sm:$0xff]  ;;  %v309_v62 = vld [vmem:[%s4939_s1 + $0x3a8] sm:$0xff]  ;;  %v45_v0 = vld [vmem:[%s4940_s0 + $0xe0] sm:$0xff]  ;;  %v2807_v3 = vpack.c.bf16 %v291_v57, %v290_v55  ;;  %v2777_v4 = vpack.c.bf16 %v277_v59, %v276_v58 }
  0x1f   :  { %2764 = vmatpush3.bf16.msra.mxu1 %v2763_v25  ;;  %2734 = vmatprep.subr.bf16.mxu0 %v2733_v26  ;;  %v42_v1 = vld [vmem:[%s4940_s0 + $0xc8] sm:$0xff]  ;;  %v44_v2 = vld [vmem:[%s4940_s0 + $0xd8] sm:$0xff]  ;;  %v260_v5 = vld [vmem:[%s4939_s1 + $0x220] sm:$0xff]  ;;  %v2809_v8 = vpack.c.bf16 %v309_v62, %v308_v61 }
  0x20   :  { %2766 = vmatprep.subr.bf16.mxu1 %v2765_v30  ;;  %v261_v6 = vld [vmem:[%s4939_s1 + $0x228] sm:$0xff]  ;;  %v292_v7 = vld [vmem:[%s4939_s1 + $0x320] sm:$0xff]  ;;  %v278_v10 = vld [vmem:[%s4939_s1 + $0x2b0] sm:$0xff] }
  0x21   :  { %v293_v9 = vld [vmem:[%s4939_s1 + $0x328] sm:$0xff]  ;;  %v279_v11 = vld [vmem:[%s4939_s1 + $0x2b8] sm:$0xff]  ;;  %v310_v13 = vld [vmem:[%s4939_s1 + $0x3b0] sm:$0xff]  ;;  %v2779_v15 = vpack.c.bf16 %v261_v6, %v260_v5 }
  0x22   :  { %2736 = vmatpush3.bf16.msra.mxu0 %v2735_v36  ;;  %v68_v12 = vld [vmem:[%s4940_s0 + $0x198] sm:$0xff]  ;;  %v70_v16 = vld [vmem:[%s4940_s0 + $0x1a8] sm:$0xff]  ;;  %v67_v17 = vld [vmem:[%s4940_s0 + $0x190] sm:$0xff]  ;;  %v2811_v19 = vpack.c.bf16 %v293_v9, %v292_v7  ;;  %v2781_v20 = vpack.c.bf16 %v279_v11, %v278_v10 }
  0x23   :  { %2768 = vmatpush3.bf16.msra.mxu1 %v2767_v37  ;;  %2770 = vmatprep.subr.bf16.mxu0 %v2769_v38  ;;  %v311_v14 = vld [vmem:[%s4939_s1 + $0x3b8] sm:$0xff]  ;;  %v69_v18 = vld [vmem:[%s4940_s0 + $0x1a0] sm:$0xff]  ;;  %v262_v21 = vld [vmem:[%s4939_s1 + $0x230] sm:$0xff] }
  0x24   :  { %2802 = vmatprep.subr.bf16.mxu1 %v2801_v42  ;;  %v263_v22 = vld [vmem:[%s4939_s1 + $0x238] sm:$0xff]  ;;  %v294_v23 = vld [vmem:[%s4939_s1 + $0x330] sm:$0xff]  ;;  %v2813_v24 = vpack.c.bf16 %v311_v14, %v310_v13  ;;  %v280_v26 = vld [vmem:[%s4939_s1 + $0x2c0] sm:$0xff] }
  0x25   :  { %657 = vmatmul.mubr.f32.vlgmr.msra.gmra.mrb[0].mxu0 %v17_v48  ;;  %v295_v25 = vld [vmem:[%s4939_s1 + $0x338] sm:$0xff]  ;;  %v281_v27 = vld [vmem:[%s4939_s1 + $0x2c8] sm:$0xff]  ;;  %v93_v28 = vld [vmem:[%s4940_s0 + $0x260] sm:$0xff]  ;;  %v2783_v31 = vpack.c.bf16 %v263_v22, %v262_v21 }
  0x26   :  { %757 = vmatmul.mubr.f32.vlgmr.msra.gmra.mrb[0].mxu1 %v19_v49  ;;  %2772 = vmatpush3.bf16.msra.mxu0 %v2771_v50  ;;  %v312_v29 = vld [vmem:[%s4939_s1 + $0x3c0] sm:$0xff]  ;;  %v313_v30 = vld [vmem:[%s4939_s1 + $0x3c8] sm:$0xff]  ;;  %v95_v32 = vld [vmem:[%s4940_s0 + $0x270] sm:$0xff]  ;;  %v2815_v35 = vpack.c.bf16 %v295_v25, %v294_v23  ;;  %v2785_v36 = vpack.c.bf16 %v281_v27, %v280_v26 }
  0x27   :  { %2804 = vmatpush3.bf16.msra.mxu1 %v2803_v51  ;;  %2774 = vmatprep.subr.bf16.mxu0 %v2773_v52  ;;  %v92_v33 = vld [vmem:[%s4940_s0 + $0x258] sm:$0xff]  ;;  %v94_v34 = vld [vmem:[%s4940_s0 + $0x268] sm:$0xff]  ;;  %v264_v37 = vld [vmem:[%s4939_s1 + $0x240] sm:$0xff]  ;;  %v2817_v40 = vpack.c.bf16 %v313_v30, %v312_v29 }
  0x28   :  { %2806 = vmatprep.subr.bf16.mxu1 %v2805_v56  ;;  %661 = vmatprep.mubr.f32.mxu0 %v43_v60  ;;  %v265_v38 = vld [vmem:[%s4939_s1 + $0x248] sm:$0xff]  ;;  %v296_v39 = vld [vmem:[%s4939_s1 + $0x340] sm:$0xff]  ;;  %v282_v42 = vld [vmem:[%s4939_s1 + $0x2d0] sm:$0xff] }
  0x29   :  { %761 = vmatprep.mubr.f32.mxu1 %v45_v0  ;;  %662 = vmatmul.mubr.f32.gmra.mrb[2].mxu0 %v42_v1  ;;  %v297_v41 = vld [vmem:[%s4939_s1 + $0x348] sm:$0xff]  ;;  %v283_v43 = vld [vmem:[%s4939_s1 + $0x2d8] sm:$0xff]  ;;  %v314_v45 = vld [vmem:[%s4939_s1 + $0x3d0] sm:$0xff]  ;;  %v2787_v47 = vpack.c.bf16 %v265_v38, %v264_v37 }
  0x2a   :  { %2776 = vmatpush3.bf16.msra.mxu0 %v2775_v63  ;;  %762 = vmatmul.mubr.f32.gmra.mrb[2].mxu1 %v44_v2  ;;  %v118_v44 = vld [vmem:[%s4940_s0 + $0x328] sm:$0xff]  ;;  %v315_v46 = vld [vmem:[%s4939_s1 + $0x3d8] sm:$0xff]  ;;  %v117_v49 = vld [vmem:[%s4940_s0 + $0x320] sm:$0xff]  ;;  %v2819_v51 = vpack.c.bf16 %v297_v41, %v296_v39  ;;  %v2789_v52 = vpack.c.bf16 %v283_v43, %v282_v42 }
  0x2b   :  { %2808 = vmatpush3.bf16.msra.mxu1 %v2807_v3  ;;  %2778 = vmatprep.subr.bf16.mxu0 %v2777_v4  ;;  %v120_v48 = vld [vmem:[%s4940_s0 + $0x338] sm:$0xff]  ;;  %v119_v50 = vld [vmem:[%s4940_s0 + $0x330] sm:$0xff]  ;;  %v2821_v56 = vpack.c.bf16 %v315_v46, %v314_v45  ;;  %v284_v58 = vld [vmem:[%s4939_s1 + $0x2e0] sm:$0xff] }
  0x2c   :  { %2810 = vmatprep.subr.bf16.mxu1 %v2809_v8  ;;  %666 = vmatprep.mubr.f32.mxu0 %v68_v12  ;;  %v266_v53 = vld [vmem:[%s4939_s1 + $0x250] sm:$0xff]  ;;  %v267_v54 = vld [vmem:[%s4939_s1 + $0x258] sm:$0xff]  ;;  %v285_v59 = vld [vmem:[%s4939_s1 + $0x2e8] sm:$0xff] }
  0x2d   :  { %766 = vmatprep.mubr.f32.mxu1 %v70_v16  ;;  %667 = vmatmul.mubr.f32.gmra.mrb[4].mxu0 %v67_v17  ;;  %v298_v55 = vld [vmem:[%s4939_s1 + $0x350] sm:$0xff]  ;;  %v299_v57 = vld [vmem:[%s4939_s1 + $0x358] sm:$0xff]  ;;  %v316_v61 = vld [vmem:[%s4939_s1 + $0x3e0] sm:$0xff]  ;;  %v2791_v63 = vpack.c.bf16 %v267_v54, %v266_v53  ;;  %v2793_v4 = vpack.c.bf16 %v285_v59, %v284_v58 }
  0x2e   :  { %2780 = vmatpush3.bf16.msra.mxu0 %v2779_v15  ;;  %767 = vmatmul.mubr.f32.gmra.mrb[4].mxu1 %v69_v18  ;;  %v143_v60 = vld [vmem:[%s4940_s0 + $0x3f0] sm:$0xff]  ;;  %v317_v62 = vld [vmem:[%s4939_s1 + $0x3e8] sm:$0xff]  ;;  %v145_v0 = vld [vmem:[%s4940_s0 + $0x400] sm:$0xff]  ;;  %v2823_v3 = vpack.c.bf16 %v299_v57, %v298_v55 }
  0x2f   :  { %2812 = vmatpush3.bf16.msra.mxu1 %v2811_v19  ;;  %2782 = vmatprep.subr.bf16.mxu0 %v2781_v20  ;;  %v142_v1 = vld [vmem:[%s4940_s0 + $0x3e8] sm:$0xff]  ;;  %v144_v2 = vld [vmem:[%s4940_s0 + $0x3f8] sm:$0xff]  ;;  %v268_v5 = vld [vmem:[%s4939_s1 + $0x260] sm:$0xff]  ;;  %v2825_v8 = vpack.c.bf16 %v317_v62, %v316_v61 }
  0x30   :  { %2814 = vmatprep.subr.bf16.mxu1 %v2813_v24  ;;  %671 = vmatprep.mubr.f32.mxu0 %v93_v28  ;;  %v269_v6 = vld [vmem:[%s4939_s1 + $0x268] sm:$0xff]  ;;  %v300_v7 = vld [vmem:[%s4939_s1 + $0x360] sm:$0xff]  ;;  %v286_v10 = vld [vmem:[%s4939_s1 + $0x2f0] sm:$0xff] }
  0x31   :  { %771 = vmatprep.mubr.f32.mxu1 %v95_v32  ;;  %672 = vmatmul.mubr.f32.gmra.mrb[6].mxu0 %v92_v33  ;;  %v301_v9 = vld [vmem:[%s4939_s1 + $0x368] sm:$0xff]  ;;  %v287_v11 = vld [vmem:[%s4939_s1 + $0x2f8] sm:$0xff]  ;;  %v318_v13 = vld [vmem:[%s4939_s1 + $0x3f0] sm:$0xff]  ;;  %v2795_v15 = vpack.c.bf16 %v269_v6, %v268_v5 }
  0x32   :  { %2784 = vmatpush3.bf16.msra.mxu0 %v2783_v31  ;;  %772 = vmatmul.mubr.f32.gmra.mrb[6].mxu1 %v94_v34  ;;  %v168_v12 = vld [vmem:[%s4940_s0 + $0x4b8] sm:$0x3]  ;;  %v170_v16 = vld [vmem:[%s4940_s0 + $0x4c8] sm:$0x3]  ;;  %v167_v17 = vld [vmem:[%s4940_s0 + $0x4b0] sm:$0x3]  ;;  %v2827_v19 = vpack.c.bf16 %v301_v9, %v300_v7  ;;  %v2797_v20 = vpack.c.bf16 %v287_v11, %v286_v10 }
  0x33   :  { %2816 = vmatpush3.bf16.msra.mxu1 %v2815_v35  ;;  %2786 = vmatprep.subr.bf16.mxu0 %v2785_v36  ;;  %v319_v14 = vld [vmem:[%s4939_s1 + $0x3f8] sm:$0xff]  ;;  %v169_v18 = vld [vmem:[%s4940_s0 + $0x4c0] sm:$0x3]  ;;  %v270_v21 = vld [vmem:[%s4939_s1 + $0x270] sm:$0xff] }
  0x34   :  { %2818 = vmatprep.subr.bf16.mxu1 %v2817_v40  ;;  %676 = vmatprep.mubr.f32.mxu0 %v118_v44  ;;  %v271_v22 = vld [vmem:[%s4939_s1 + $0x278] sm:$0xff]  ;;  %v302_v23 = vld [vmem:[%s4939_s1 + $0x370] sm:$0xff]  ;;  %v2829_v24 = vpack.c.bf16 %v319_v14, %v318_v13  ;;  %v336_v26 = vld [vmem:[%s4939_s1 + $0x480] sm:$0xff] }
  0x35   :  { %776 = vmatprep.mubr.f32.mxu1 %v120_v48  ;;  %677 = vmatmul.mubr.f32.gmra.mrb[8].mxu0 %v117_v49  ;;  %v303_v25 = vld [vmem:[%s4939_s1 + $0x378] sm:$0xff]  ;;  %v337_v27 = vld [vmem:[%s4939_s1 + $0x488] sm:$0xff]  ;;  %v368_v29 = vld [vmem:[%s4939_s1 + $0x580] sm:$0xff]  ;;  %v2799_v31 = vpack.c.bf16 %v271_v22, %v270_v21 }
  0x36   :  { %2788 = vmatpush3.bf16.msra.mxu0 %v2787_v47  ;;  %777 = vmatmul.mubr.f32.gmra.mrb[8].mxu1 %v119_v50  ;;  %v22_v28 = vld [vmem:[%s4940_s0 + $0x28] sm:$0xff]  ;;  %v24_v32 = vld [vmem:[%s4940_s0 + $0x38] sm:$0xff]  ;;  %v2831_v33 = vpack.c.bf16 %v303_v25, %v302_v23  ;;  %v2833_v34 = vpack.c.bf16 %v337_v27, %v336_v26  ;;  %v320_v35 = vld [vmem:[%s4939_s1 + $0x400] sm:$0xff] }
  0x37   :  { %2820 = vmatpush3.bf16.msra.mxu1 %v2819_v51  ;;  %2790 = vmatprep.subr.bf16.mxu0 %v2789_v52  ;;  %v369_v30 = vld [vmem:[%s4939_s1 + $0x588] sm:$0xff]  ;;  %v352_v38 = vld [vmem:[%s4939_s1 + $0x500] sm:$0xff]  ;;  %v338_v40 = vld [vmem:[%s4939_s1 + $0x490] sm:$0xff] }
  0x38   :  { %2822 = vmatprep.subr.bf16.mxu1 %v2821_v56  ;;  %681 = vmatprep.mubr.f32.mxu0 %v143_v60  ;;  %v321_v36 = vld [vmem:[%s4939_s1 + $0x408] sm:$0xff]  ;;  %v2865_v37 = vpack.c.bf16 %v369_v30, %v368_v29  ;;  %v339_v41 = vld [vmem:[%s4939_s1 + $0x498] sm:$0xff]  ;;  %v370_v42 = vld [vmem:[%s4939_s1 + $0x590] sm:$0xff] }
  0x39   :  { %781 = vmatprep.mubr.f32.mxu1 %v145_v0  ;;  %682 = vmatmul.mubr.f32.gmra.mrb[10].mxu0 %v142_v1  ;;  %v353_v39 = vld [vmem:[%s4939_s1 + $0x508] sm:$0xff]  ;;  %v371_v43 = vld [vmem:[%s4939_s1 + $0x598] sm:$0xff]  ;;  %v21_v44 = vld [vmem:[%s4940_s0 + $0x20] sm:$0xff]  ;;  %v2835_v46 = vpack.c.bf16 %v321_v36, %v320_v35  ;;  %v2837_v51 = vpack.c.bf16 %v339_v41, %v338_v40 }
  0x3a   :  { %2792 = vmatpush3.bf16.msra.mxu0 %v2791_v63  ;;  %782 = vmatmul.mubr.f32.gmra.mrb[10].mxu1 %v144_v2  ;;  %v23_v45 = vld [vmem:[%s4940_s0 + $0x30] sm:$0xff]  ;;  %v2867_v47 = vpack.c.bf16 %v353_v39, %v352_v38  ;;  %v323_v50 = vld [vmem:[%s4939_s1 + $0x418] sm:$0xff]  ;;  %v2869_v52 = vpack.c.bf16 %v371_v43, %v370_v42  ;;  %v340_v55 = vld [vmem:[%s4939_s1 + $0x4a0] sm:$0xff] }
  0x3b   :  { %2824 = vmatpush3.bf16.msra.mxu1 %v2823_v3  ;;  %2794 = vmatprep.subr.bf16.mxu0 %v2793_v4  ;;  %v47_v48 = vld [vmem:[%s4940_s0 + $0xf0] sm:$0xff]  ;;  %v355_v54 = vld [vmem:[%s4939_s1 + $0x518] sm:$0xff]  ;;  %v341_v56 = vld [vmem:[%s4939_s1 + $0x4a8] sm:$0xff] }
  0x3c   :  { %2826 = vmatprep.subr.bf16.mxu1 %v2825_v8  ;;  %686 = vmatprep.mubr.f32.mxu0 %v168_v12  ;;  %v322_v49 = vld [vmem:[%s4939_s1 + $0x410] sm:$0xff]  ;;  %v372_v57 = vld [vmem:[%s4939_s1 + $0x5a0] sm:$0xff]  ;;  %v373_v58 = vld [vmem:[%s4939_s1 + $0x5a8] sm:$0xff]  ;;  %v2841_v3 = vpack.c.bf16 %v341_v56, %v340_v55 }
  0x3d   :  { %786 = vmatprep.mubr.f32.mxu1 %v170_v16  ;;  %687 = vmatmul.mubr.f32.gmra.mrb[12].mxu0 %v167_v17  ;;  %v354_v53 = vld [vmem:[%s4939_s1 + $0x510] sm:$0xff]  ;;  %v46_v59 = vld [vmem:[%s4940_s0 + $0xe8] sm:$0xff]  ;;  %v49_v60 = vld [vmem:[%s4940_s0 + $0x100] sm:$0xff]  ;;  %v2839_v61 = vpack.c.bf16 %v323_v50, %v322_v49  ;;  %v2873_v4 = vpack.c.bf16 %v373_v58, %v372_v57 }
  0x3e   :  { %2796 = vmatpush3.bf16.msra.mxu0 %v2795_v15  ;;  %787 = vmatmul.mubr.f32.gmra.mrb[12].mxu1 %v169_v18  ;;  %v48_v62 = vld [vmem:[%s4940_s0 + $0xf8] sm:$0xff]  ;;  %v2871_v63 = vpack.c.bf16 %v355_v54, %v354_v53  ;;  %v324_v1 = vld [vmem:[%s4939_s1 + $0x420] sm:$0xff]  ;;  %v325_v2 = vld [vmem:[%s4939_s1 + $0x428] sm:$0xff] }
  0x3f   :  { %2828 = vmatpush3.bf16.msra.mxu1 %v2827_v19  ;;  %2798 = vmatprep.subr.bf16.mxu0 %v2797_v20  ;;  %v72_v0 = vld [vmem:[%s4940_s0 + $0x1b8] sm:$0xff]  ;;  %v356_v5 = vld [vmem:[%s4939_s1 + $0x520] sm:$0xff]  ;;  %v357_v6 = vld [vmem:[%s4939_s1 + $0x528] sm:$0xff]  ;;  %v2843_v13 = vpack.c.bf16 %v325_v2, %v324_v1 }
  0x40   :  { %2830 = vmatprep.subr.bf16.mxu1 %v2829_v24  ;;  %856 = vmatprep.mubr.f32.mxu0 %v22_v28  ;;  %v342_v7 = vld [vmem:[%s4939_s1 + $0x4b0] sm:$0xff]  ;;  %v343_v8 = vld [vmem:[%s4939_s1 + $0x4b8] sm:$0xff]  ;;  %v74_v12 = vld [vmem:[%s4940_s0 + $0x1c8] sm:$0xff]  ;;  %v2875_v15 = vpack.c.bf16 %v357_v6, %v356_v5 }
  0x41   :  { %956 = vmatprep.mubr.f32.mxu1 %v24_v32  ;;  %v374_v9 = vld [vmem:[%s4939_s1 + $0x5b0] sm:$0xff]  ;;  %v375_v10 = vld [vmem:[%s4939_s1 + $0x5b8] sm:$0xff]  ;;  %v73_v14 = vld [vmem:[%s4940_s0 + $0x1c0] sm:$0xff]  ;;  %v2845_v19 = vpack.c.bf16 %v343_v8, %v342_v7 }
  0x42   :  { %2800 = vmatpush3.bf16.msra.mxu0 %v2799_v31  ;;  %v71_v11 = vld [vmem:[%s4940_s0 + $0x1b0] sm:$0xff]  ;;  %v97_v16 = vld [vmem:[%s4940_s0 + $0x280] sm:$0xff]  ;;  %v327_v18 = vld [vmem:[%s4939_s1 + $0x438] sm:$0xff]  ;;  %v2877_v20 = vpack.c.bf16 %v375_v10, %v374_v9 }
  0x43   :  { %2832 = vmatpush3.bf16.msra.mxu1 %v2831_v33  ;;  %2834 = vmatprep.subr.bf16.mxu0 %v2833_v34  ;;  %v326_v17 = vld [vmem:[%s4939_s1 + $0x430] sm:$0xff]  ;;  %v359_v22 = vld [vmem:[%s4939_s1 + $0x538] sm:$0xff]  ;;  %v344_v23 = vld [vmem:[%s4939_s1 + $0x4c0] sm:$0xff] }
  0x44   :  { %2866 = vmatprep.subr.bf16.mxu1 %v2865_v37  ;;  %v358_v21 = vld [vmem:[%s4939_s1 + $0x530] sm:$0xff]  ;;  %v345_v24 = vld [vmem:[%s4939_s1 + $0x4c8] sm:$0xff]  ;;  %v376_v25 = vld [vmem:[%s4939_s1 + $0x5c0] sm:$0xff]  ;;  %v2847_v29 = vpack.c.bf16 %v327_v18, %v326_v17 }
  0x45   :  { %857 = vmatmul.mubr.f32.vlgmr.msra.gmra.mrb[14].mxu0 %v21_v44  ;;  %v377_v26 = vld [vmem:[%s4939_s1 + $0x5c8] sm:$0xff]  ;;  %v96_v27 = vld [vmem:[%s4940_s0 + $0x278] sm:$0xff]  ;;  %v99_v28 = vld [vmem:[%s4940_s0 + $0x290] sm:$0xff]  ;;  %v2879_v31 = vpack.c.bf16 %v359_v22, %v358_v21  ;;  %v2849_v35 = vpack.c.bf16 %v345_v24, %v344_v23 }
  0x46   :  { %957 = vmatmul.mubr.f32.vlgmr.msra.gmra.mrb[14].mxu1 %v23_v45  ;;  %2836 = vmatpush3.bf16.msra.mxu0 %v2835_v46  ;;  %v98_v30 = vld [vmem:[%s4940_s0 + $0x288] sm:$0xff]  ;;  %v328_v33 = vld [vmem:[%s4939_s1 + $0x440] sm:$0xff]  ;;  %v2881_v36 = vpack.c.bf16 %v377_v26, %v376_v25  ;;  %v346_v39 = vld [vmem:[%s4939_s1 + $0x4d0] sm:$0xff] }
  0x47   :  { %2868 = vmatpush3.bf16.msra.mxu1 %v2867_v47  ;;  %861 = vmatprep.mubr.f32.mxu0 %v47_v48  ;;  %v122_v32 = vld [vmem:[%s4940_s0 + $0x348] sm:$0xff]  ;;  %v360_v37 = vld [vmem:[%s4939_s1 + $0x540] sm:$0xff]  ;;  %v347_v40 = vld [vmem:[%s4939_s1 + $0x4d8] sm:$0xff] }
  0x48   :  { %2838 = vmatprep.subr.bf16.mxu0 %v2837_v51  ;;  %2870 = vmatprep.subr.bf16.mxu1 %v2869_v52  ;;  %v329_v34 = vld [vmem:[%s4939_s1 + $0x448] sm:$0xff]  ;;  %v378_v41 = vld [vmem:[%s4939_s1 + $0x5d0] sm:$0xff]  ;;  %v379_v42 = vld [vmem:[%s4939_s1 + $0x5d8] sm:$0xff]  ;;  %v2853_v52 = vpack.c.bf16 %v347_v40, %v346_v39 }
  0x49   :  { %862 = vmatmul.mubr.f32.gmra.mrb[16].mxu0 %v46_v59  ;;  %961 = vmatprep.mubr.f32.mxu1 %v49_v60  ;;  %v361_v38 = vld [vmem:[%s4939_s1 + $0x548] sm:$0xff]  ;;  %v121_v43 = vld [vmem:[%s4940_s0 + $0x340] sm:$0xff]  ;;  %v124_v44 = vld [vmem:[%s4940_s0 + $0x358] sm:$0xff]  ;;  %v2851_v45 = vpack.c.bf16 %v329_v34, %v328_v33  ;;  %v2885_v53 = vpack.c.bf16 %v379_v42, %v378_v41 }
  0x4a   :  { %2840 = vmatpush3.bf16.msra.mxu0 %v2839_v61  ;;  %962 = vmatmul.mubr.f32.gmra.mrb[16].mxu1 %v48_v62  ;;  %v123_v46 = vld [vmem:[%s4940_s0 + $0x350] sm:$0xff]  ;;  %v2883_v47 = vpack.c.bf16 %v361_v38, %v360_v37  ;;  %v331_v50 = vld [vmem:[%s4939_s1 + $0x458] sm:$0xff]  ;;  %v146_v51 = vld [vmem:[%s4940_s0 + $0x408] sm:$0xff] }
  0x4b   :  { %2872 = vmatpush3.bf16.msra.mxu1 %v2871_v63  ;;  %866 = vmatprep.mubr.f32.mxu0 %v72_v0  ;;  %v147_v48 = vld [vmem:[%s4940_s0 + $0x410] sm:$0xff]  ;;  %v363_v55 = vld [vmem:[%s4939_s1 + $0x558] sm:$0xff]  ;;  %v348_v56 = vld [vmem:[%s4939_s1 + $0x4e0] sm:$0xff] }
  0x4c   :  { %2842 = vmatprep.subr.bf16.mxu0 %v2841_v3  ;;  %2874 = vmatprep.subr.bf16.mxu1 %v2873_v4  ;;  %v330_v49 = vld [vmem:[%s4939_s1 + $0x450] sm:$0xff]  ;;  %v349_v57 = vld [vmem:[%s4939_s1 + $0x4e8] sm:$0xff]  ;;  %v380_v58 = vld [vmem:[%s4939_s1 + $0x5e0] sm:$0xff] }
  0x4d   :  { %867 = vmatmul.mubr.f32.gmra.mrb[18].mxu0 %v71_v11  ;;  %966 = vmatprep.mubr.f32.mxu1 %v74_v12  ;;  %v362_v54 = vld [vmem:[%s4939_s1 + $0x550] sm:$0xff]  ;;  %v381_v59 = vld [vmem:[%s4939_s1 + $0x5e8] sm:$0xff]  ;;  %v149_v60 = vld [vmem:[%s4940_s0 + $0x420] sm:$0xff]  ;;  %v2855_v61 = vpack.c.bf16 %v331_v50, %v330_v49  ;;  %v2857_v4 = vpack.c.bf16 %v349_v57, %v348_v56 }
  0x4e   :  { %2844 = vmatpush3.bf16.msra.mxu0 %v2843_v13  ;;  %967 = vmatmul.mubr.f32.gmra.mrb[18].mxu1 %v73_v14  ;;  %v148_v62 = vld [vmem:[%s4940_s0 + $0x418] sm:$0xff]  ;;  %v2887_v0 = vpack.c.bf16 %v363_v55, %v362_v54  ;;  %v332_v1 = vld [vmem:[%s4939_s1 + $0x460] sm:$0xff]  ;;  %v333_v2 = vld [vmem:[%s4939_s1 + $0x468] sm:$0xff]  ;;  %v2889_v5 = vpack.c.bf16 %v381_v59, %v380_v58 }
  0x4f   :  { %2876 = vmatpush3.bf16.msra.mxu1 %v2875_v15  ;;  %871 = vmatprep.mubr.f32.mxu0 %v97_v16  ;;  %v172_v63 = vld [vmem:[%s4940_s0 + $0x4d8] sm:$0x3]  ;;  %v364_v3 = vld [vmem:[%s4939_s1 + $0x560] sm:$0xff]  ;;  %v365_v6 = vld [vmem:[%s4939_s1 + $0x568] sm:$0xff]  ;;  %v2859_v13 = vpack.c.bf16 %v333_v2, %v332_v1 }
  0x50   :  { %2846 = vmatprep.subr.bf16.mxu0 %v2845_v19  ;;  %2878 = vmatprep.subr.bf16.mxu1 %v2877_v20  ;;  %v350_v7 = vld [vmem:[%s4939_s1 + $0x4f0] sm:$0xff]  ;;  %v351_v8 = vld [vmem:[%s4939_s1 + $0x4f8] sm:$0xff]  ;;  %v174_v12 = vld [vmem:[%s4940_s0 + $0x4e8] sm:$0x3]  ;;  %v2891_v15 = vpack.c.bf16 %v365_v6, %v364_v3 }
  0x51   :  { %872 = vmatmul.mubr.f32.gmra.mrb[20].mxu0 %v96_v27  ;;  %971 = vmatprep.mubr.f32.mxu1 %v99_v28  ;;  %v382_v9 = vld [vmem:[%s4939_s1 + $0x5f0] sm:$0xff]  ;;  %v383_v10 = vld [vmem:[%s4939_s1 + $0x5f8] sm:$0xff]  ;;  %v173_v14 = vld [vmem:[%s4940_s0 + $0x4e0] sm:$0x3]  ;;  %v2861_v16 = vpack.c.bf16 %v351_v8, %v350_v7 }
  0x52   :  { %2848 = vmatpush3.bf16.msra.mxu0 %v2847_v29  ;;  %972 = vmatmul.mubr.f32.gmra.mrb[20].mxu1 %v98_v30  ;;  %v171_v11 = vld [vmem:[%s4940_s0 + $0x4d0] sm:$0x3]  ;;  %v335_v18 = vld [vmem:[%s4939_s1 + $0x478] sm:$0xff]  ;;  %v2893_v20 = vpack.c.bf16 %v383_v10, %v382_v9  ;;  %v400_v22 = vld [vmem:[%s4939_s1 + $0x680] sm:$0xff] }
  0x53   :  { %2880 = vmatpush3.bf16.msra.mxu1 %v2879_v31  ;;  %876 = vmatprep.mubr.f32.mxu0 %v122_v32  ;;  %v334_v17 = vld [vmem:[%s4939_s1 + $0x470] sm:$0xff]  ;;  %v367_v21 = vld [vmem:[%s4939_s1 + $0x578] sm:$0xff]  ;;  %v401_v23 = vld [vmem:[%s4939_s1 + $0x688] sm:$0xff] }
  0x54   :  { %2850 = vmatprep.subr.bf16.mxu0 %v2849_v35  ;;  %2882 = vmatprep.subr.bf16.mxu1 %v2881_v36  ;;  %v366_v19 = vld [vmem:[%s4939_s1 + $0x570] sm:$0xff]  ;;  %v26_v24 = vld [vmem:[%s4940_s0 + $0x48] sm:$0xff]  ;;  %v432_v25 = vld [vmem:[%s4939_s1 + $0x780] sm:$0xff]  ;;  %v2863_v27 = vpack.c.bf16 %v335_v18, %v334_v17  ;;  %v2897_v30 = vpack.c.bf16 %v401_v23, %v400_v22 }
  0x55   :  { %877 = vmatmul.mubr.f32.gmra.mrb[22].mxu0 %v121_v43  ;;  %976 = vmatprep.mubr.f32.mxu1 %v124_v44  ;;  %v433_v26 = vld [vmem:[%s4939_s1 + $0x788] sm:$0xff]  ;;  %v28_v28 = vld [vmem:[%s4940_s0 + $0x58] sm:$0xff]  ;;  %v2895_v29 = vpack.c.bf16 %v367_v21, %v366_v19  ;;  %v384_v31 = vld [vmem:[%s4939_s1 + $0x600] sm:$0xff] }
  0x56   :  { %2852 = vmatpush3.bf16.msra.mxu0 %v2851_v45  ;;  %977 = vmatmul.mubr.f32.gmra.mrb[22].mxu1 %v123_v46  ;;  %v385_v32 = vld [vmem:[%s4939_s1 + $0x608] sm:$0xff]  ;;  %v2929_v33 = vpack.c.bf16 %v433_v26, %v432_v25  ;;  %v416_v34 = vld [vmem:[%s4939_s1 + $0x700] sm:$0xff]  ;;  %v402_v36 = vld [vmem:[%s4939_s1 + $0x690] sm:$0xff] }
  0x57   :  { %2884 = vmatpush3.bf16.msra.mxu1 %v2883_v47  ;;  %881 = vmatprep.mubr.f32.mxu0 %v147_v48  ;;  %v417_v35 = vld [vmem:[%s4939_s1 + $0x708] sm:$0xff]  ;;  %v403_v37 = vld [vmem:[%s4939_s1 + $0x698] sm:$0xff]  ;;  %v434_v38 = vld [vmem:[%s4939_s1 + $0x790] sm:$0xff]  ;;  %v2899_v42 = vpack.c.bf16 %v385_v32, %v384_v31 }
  0x58   :  { %2854 = vmatprep.subr.bf16.mxu0 %v2853_v52  ;;  %2886 = vmatprep.subr.bf16.mxu1 %v2885_v53  ;;  %v435_v39 = vld [vmem:[%s4939_s1 + $0x798] sm:$0xff]  ;;  %v25_v40 = vld [vmem:[%s4940_s0 + $0x40] sm:$0xff]  ;;  %v27_v41 = vld [vmem:[%s4940_s0 + $0x50] sm:$0xff]  ;;  %v2931_v43 = vpack.c.bf16 %v417_v35, %v416_v34  ;;  %v2901_v47 = vpack.c.bf16 %v403_v37, %v402_v36 }
  0x59   :  { %882 = vmatmul.mubr.f32.gmra.mrb[24].mxu0 %v146_v51  ;;  %981 = vmatprep.mubr.f32.mxu1 %v149_v60  ;;  %v51_v44 = vld [vmem:[%s4940_s0 + $0x110] sm:$0xff]  ;;  %v387_v46 = vld [vmem:[%s4939_s1 + $0x618] sm:$0xff]  ;;  %v2933_v48 = vpack.c.bf16 %v435_v39, %v434_v38  ;;  %v404_v51 = vld [vmem:[%s4939_s1 + $0x6a0] sm:$0xff] }
  0x5a   :  { %2856 = vmatpush3.bf16.msra.mxu0 %v2855_v61  ;;  %982 = vmatmul.mubr.f32.gmra.mrb[24].mxu1 %v148_v62  ;;  %v386_v45 = vld [vmem:[%s4939_s1 + $0x610] sm:$0xff]  ;;  %v419_v50 = vld [vmem:[%s4939_s1 + $0x718] sm:$0xff]  ;;  %v405_v52 = vld [vmem:[%s4939_s1 + $0x6a8] sm:$0xff] }
  0x5b   :  { %2888 = vmatpush3.bf16.msra.mxu1 %v2887_v0  ;;  %886 = vmatprep.mubr.f32.mxu0 %v172_v63  ;;  %v418_v49 = vld [vmem:[%s4939_s1 + $0x710] sm:$0xff]  ;;  %v436_v53 = vld [vmem:[%s4939_s1 + $0x7a0] sm:$0xff]  ;;  %v437_v54 = vld [vmem:[%s4939_s1 + $0x7a8] sm:$0xff]  ;;  %v2903_v57 = vpack.c.bf16 %v387_v46, %v386_v45  ;;  %v2905_v63 = vpack.c.bf16 %v405_v52, %v404_v51 }
  0x5c   :  { %2858 = vmatprep.subr.bf16.mxu0 %v2857_v4  ;;  %2890 = vmatprep.subr.bf16.mxu1 %v2889_v5  ;;  %v50_v55 = vld [vmem:[%s4940_s0 + $0x108] sm:$0xff]  ;;  %v53_v56 = vld [vmem:[%s4940_s0 + $0x120] sm:$0xff]  ;;  %v52_v58 = vld [vmem:[%s4940_s0 + $0x118] sm:$0xff]  ;;  %v2935_v59 = vpack.c.bf16 %v419_v50, %v418_v49  ;;  %v2937_v0 = vpack.c.bf16 %v437_v54, %v436_v53 }
  0x5d   :  { %887 = vmatmul.mubr.f32.gmra.mrb[26].mxu0 %v171_v11  ;;  %986 = vmatprep.mubr.f32.mxu1 %v174_v12  ;;  %v76_v60 = vld [vmem:[%s4940_s0 + $0x1d8] sm:$0xff]  ;;  %v388_v61 = vld [vmem:[%s4939_s1 + $0x620] sm:$0xff]  ;;  %v389_v62 = vld [vmem:[%s4939_s1 + $0x628] sm:$0xff] }
  0x5e   :  { %2860 = vmatpush3.bf16.msra.mxu0 %v2859_v13  ;;  %987 = vmatmul.mubr.f32.gmra.mrb[26].mxu1 %v173_v14  ;;  %v420_v1 = vld [vmem:[%s4939_s1 + $0x720] sm:$0xff]  ;;  %v421_v2 = vld [vmem:[%s4939_s1 + $0x728] sm:$0xff]  ;;  %v406_v3 = vld [vmem:[%s4939_s1 + $0x6b0] sm:$0xff]  ;;  %v2907_v9 = vpack.c.bf16 %v389_v62, %v388_v61 }
  0x5f   :  { %2892 = vmatpush3.bf16.msra.mxu1 %v2891_v15  ;;  %2862 = vmatprep.subr.bf16.mxu0 %v2861_v16  ;;  %v407_v4 = vld [vmem:[%s4939_s1 + $0x6b8] sm:$0xff]  ;;  %v438_v5 = vld [vmem:[%s4939_s1 + $0x7b0] sm:$0xff]  ;;  %v78_v8 = vld [vmem:[%s4940_s0 + $0x1e8] sm:$0xff]  ;;  %v2939_v11 = vpack.c.bf16 %v421_v2, %v420_v1 }
  0x60   :  { %2894 = vmatprep.subr.bf16.mxu1 %v2893_v20  ;;  %1056 = vmatprep.mubr.f32.mxu0 %v26_v24  ;;  %v439_v6 = vld [vmem:[%s4939_s1 + $0x7b8] sm:$0xff]  ;;  %v75_v7 = vld [vmem:[%s4940_s0 + $0x1d0] sm:$0xff]  ;;  %v77_v10 = vld [vmem:[%s4940_s0 + $0x1e0] sm:$0xff]  ;;  %v2909_v15 = vpack.c.bf16 %v407_v4, %v406_v3 }
  0x61   :  { %1156 = vmatprep.mubr.f32.mxu1 %v28_v28  ;;  %v101_v12 = vld [vmem:[%s4940_s0 + $0x2a0] sm:$0xff]  ;;  %v390_v13 = vld [vmem:[%s4939_s1 + $0x630] sm:$0xff]  ;;  %v391_v14 = vld [vmem:[%s4939_s1 + $0x638] sm:$0xff]  ;;  %v2941_v16 = vpack.c.bf16 %v439_v6, %v438_v5 }
  0x62   :  { %2864 = vmatpush3.bf16.msra.mxu0 %v2863_v27  ;;  %v422_v17 = vld [vmem:[%s4939_s1 + $0x730] sm:$0xff]  ;;  %v423_v18 = vld [vmem:[%s4939_s1 + $0x738] sm:$0xff]  ;;  %v408_v19 = vld [vmem:[%s4939_s1 + $0x6c0] sm:$0xff]  ;;  %v2911_v25 = vpack.c.bf16 %v391_v14, %v390_v13 }
  0x63   :  { %2896 = vmatpush3.bf16.msra.mxu1 %v2895_v29  ;;  %2898 = vmatprep.subr.bf16.mxu0 %v2897_v30  ;;  %v409_v20 = vld [vmem:[%s4939_s1 + $0x6c8] sm:$0xff]  ;;  %v440_v21 = vld [vmem:[%s4939_s1 + $0x7c0] sm:$0xff]  ;;  %v100_v23 = vld [vmem:[%s4940_s0 + $0x298] sm:$0xff]  ;;  %v2943_v27 = vpack.c.bf16 %v423_v18, %v422_v17 }
  0x64   :  { %2930 = vmatprep.subr.bf16.mxu1 %v2929_v33  ;;  %v441_v22 = vld [vmem:[%s4939_s1 + $0x7c8] sm:$0xff]  ;;  %v103_v24 = vld [vmem:[%s4940_s0 + $0x2b0] sm:$0xff]  ;;  %v392_v29 = vld [vmem:[%s4939_s1 + $0x640] sm:$0xff]  ;;  %v2913_v31 = vpack.c.bf16 %v409_v20, %v408_v19 }
  0x65   :  { %1057 = vmatmul.mubr.f32.vlgmr.msra.gmra.mrb[28].mxu0 %v25_v40  ;;  %v102_v26 = vld [vmem:[%s4940_s0 + $0x2a8] sm:$0xff]  ;;  %v2945_v32 = vpack.c.bf16 %v441_v22, %v440_v21  ;;  %v424_v33 = vld [vmem:[%s4939_s1 + $0x740] sm:$0xff]  ;;  %v410_v35 = vld [vmem:[%s4939_s1 + $0x6d0] sm:$0xff] }
  0x66   :  { %1157 = vmatmul.mubr.f32.vlgmr.msra.gmra.mrb[28].mxu1 %v27_v41  ;;  %2900 = vmatpush3.bf16.msra.mxu0 %v2899_v42  ;;  %v126_v28 = vld [vmem:[%s4940_s0 + $0x368] sm:$0xff]  ;;  %v411_v36 = vld [vmem:[%s4939_s1 + $0x6d8] sm:$0xff]  ;;  %v442_v37 = vld [vmem:[%s4939_s1 + $0x7d0] sm:$0xff] }
  0x67   :  { %2932 = vmatpush3.bf16.msra.mxu1 %v2931_v43  ;;  %1061 = vmatprep.mubr.f32.mxu0 %v51_v44  ;;  %v393_v30 = vld [vmem:[%s4939_s1 + $0x648] sm:$0xff]  ;;  %v443_v38 = vld [vmem:[%s4939_s1 + $0x7d8] sm:$0xff]  ;;  %v125_v39 = vld [vmem:[%s4940_s0 + $0x360] sm:$0xff] }
  0x68   :  { %2902 = vmatprep.subr.bf16.mxu0 %v2901_v47  ;;  %2934 = vmatprep.subr.bf16.mxu1 %v2933_v48  ;;  %v425_v34 = vld [vmem:[%s4939_s1 + $0x748] sm:$0xff]  ;;  %v128_v40 = vld [vmem:[%s4940_s0 + $0x378] sm:$0xff]  ;;  %v2915_v41 = vpack.c.bf16 %v393_v30, %v392_v29  ;;  %v127_v42 = vld [vmem:[%s4940_s0 + $0x370] sm:$0xff]  ;;  %v2917_v48 = vpack.c.bf16 %v411_v36, %v410_v35  ;;  %v2949_v49 = vpack.c.bf16 %v443_v38, %v442_v37 }
  0x69   :  { %1062 = vmatmul.mubr.f32.gmra.mrb[30].mxu0 %v50_v55  ;;  %1161 = vmatprep.mubr.f32.mxu1 %v53_v56  ;;  %v2947_v43 = vpack.c.bf16 %v425_v34, %v424_v33  ;;  %v151_v44 = vld [vmem:[%s4940_s0 + $0x430] sm:$0xff]  ;;  %v395_v46 = vld [vmem:[%s4939_s1 + $0x658] sm:$0xff]  ;;  %v150_v47 = vld [vmem:[%s4940_s0 + $0x428] sm:$0xff] }
  0x6a   :  { %2904 = vmatpush3.bf16.msra.mxu0 %v2903_v57  ;;  %1162 = vmatmul.mubr.f32.gmra.mrb[30].mxu1 %v52_v58  ;;  %v394_v45 = vld [vmem:[%s4939_s1 + $0x650] sm:$0xff]  ;;  %v427_v51 = vld [vmem:[%s4939_s1 + $0x758] sm:$0xff]  ;;  %v412_v52 = vld [vmem:[%s4939_s1 + $0x6e0] sm:$0xff] }
  0x6b   :  { %2936 = vmatpush3.bf16.msra.mxu1 %v2935_v59  ;;  %1066 = vmatprep.mubr.f32.mxu0 %v76_v60  ;;  %v426_v50 = vld [vmem:[%s4939_s1 + $0x750] sm:$0xff]  ;;  %v413_v53 = vld [vmem:[%s4939_s1 + $0x6e8] sm:$0xff]  ;;  %v444_v54 = vld [vmem:[%s4939_s1 + $0x7e0] sm:$0xff]  ;;  %v2919_v57 = vpack.c.bf16 %v395_v46, %v394_v45 }
  0x6c   :  { %2906 = vmatprep.subr.bf16.mxu0 %v2905_v63  ;;  %2938 = vmatprep.subr.bf16.mxu1 %v2937_v0  ;;  %v445_v55 = vld [vmem:[%s4939_s1 + $0x7e8] sm:$0xff]  ;;  %v153_v56 = vld [vmem:[%s4940_s0 + $0x440] sm:$0xff]  ;;  %v152_v58 = vld [vmem:[%s4940_s0 + $0x438] sm:$0xff]  ;;  %v2951_v60 = vpack.c.bf16 %v427_v51, %v426_v50  ;;  %v2921_v0 = vpack.c.bf16 %v413_v53, %v412_v52 }
  0x6d   :  { %1067 = vmatmul.mubr.f32.gmra.mrb[32].mxu0 %v75_v7  ;;  %1166 = vmatprep.mubr.f32.mxu1 %v78_v8  ;;  %v176_v59 = vld [vmem:[%s4940_s0 + $0x4f8] sm:$0x3]  ;;  %v396_v61 = vld [vmem:[%s4939_s1 + $0x660] sm:$0xff]  ;;  %v397_v62 = vld [vmem:[%s4939_s1 + $0x668] sm:$0xff]  ;;  %v2953_v1 = vpack.c.bf16 %v445_v55, %v444_v54 }
  0x6e   :  { %2908 = vmatpush3.bf16.msra.mxu0 %v2907_v9  ;;  %1167 = vmatmul.mubr.f32.gmra.mrb[32].mxu1 %v77_v10  ;;  %v428_v63 = vld [vmem:[%s4939_s1 + $0x760] sm:$0xff]  ;;  %v429_v2 = vld [vmem:[%s4939_s1 + $0x768] sm:$0xff]  ;;  %v414_v3 = vld [vmem:[%s4939_s1 + $0x6f0] sm:$0xff]  ;;  %v2923_v9 = vpack.c.bf16 %v397_v62, %v396_v61 }
  0x6f   :  { %2940 = vmatpush3.bf16.msra.mxu1 %v2939_v11  ;;  %1071 = vmatprep.mubr.f32.mxu0 %v101_v12  ;;  %v415_v4 = vld [vmem:[%s4939_s1 + $0x6f8] sm:$0xff]  ;;  %v446_v5 = vld [vmem:[%s4939_s1 + $0x7f0] sm:$0xff]  ;;  %v178_v8 = vld [vmem:[%s4940_s0 + $0x508] sm:$0x3]  ;;  %v2955_v11 = vpack.c.bf16 %v429_v2, %v428_v63 }
  0x70   :  { %2910 = vmatprep.subr.bf16.mxu0 %v2909_v15  ;;  %2942 = vmatprep.subr.bf16.mxu1 %v2941_v16  ;;  %v447_v6 = vld [vmem:[%s4939_s1 + $0x7f8] sm:$0xff]  ;;  %v175_v7 = vld [vmem:[%s4940_s0 + $0x4f0] sm:$0x3]  ;;  %v177_v10 = vld [vmem:[%s4940_s0 + $0x500] sm:$0x3]  ;;  %v2925_v12 = vpack.c.bf16 %v415_v4, %v414_v3 }
  0x71   :  { %1072 = vmatmul.mubr.f32.gmra.mrb[34].mxu0 %v100_v23  ;;  %1171 = vmatprep.mubr.f32.mxu1 %v103_v24  ;;  %v398_v13 = vld [vmem:[%s4939_s1 + $0x670] sm:$0xff]  ;;  %v399_v14 = vld [vmem:[%s4939_s1 + $0x678] sm:$0xff]  ;;  %v2957_v16 = vpack.c.bf16 %v447_v6, %v446_v5  ;;  %v464_v18 = vld [vmem:[%s4939_s1 + $0x880] sm:$0xff] }
  0x72   :  { %2912 = vmatpush3.bf16.msra.mxu0 %v2911_v25  ;;  %1172 = vmatmul.mubr.f32.gmra.mrb[34].mxu1 %v102_v26  ;;  %v430_v15 = vld [vmem:[%s4939_s1 + $0x770] sm:$0xff]  ;;  %v431_v17 = vld [vmem:[%s4939_s1 + $0x778] sm:$0xff]  ;;  %v465_v19 = vld [vmem:[%s4939_s1 + $0x888] sm:$0xff]  ;;  %v2927_v23 = vpack.c.bf16 %v399_v14, %v398_v13 }
  0x73   :  { %2944 = vmatpush3.bf16.msra.mxu1 %v2943_v27  ;;  %1076 = vmatprep.mubr.f32.mxu0 %v126_v28  ;;  %v30_v20 = vld [vmem:[%s4940_s0 + $0x68] sm:$0xff]  ;;  %v496_v21 = vld [vmem:[%s4939_s1 + $0x980] sm:$0xff]  ;;  %v32_v24 = vld [vmem:[%s4940_s0 + $0x78] sm:$0xff]  ;;  %v2959_v25 = vpack.c.bf16 %v431_v17, %v430_v15  ;;  %v2961_v26 = vpack.c.bf16 %v465_v19, %v464_v18 }
  0x74   :  { %2914 = vmatprep.subr.bf16.mxu0 %v2913_v31  ;;  %2946 = vmatprep.subr.bf16.mxu1 %v2945_v32  ;;  %v497_v22 = vld [vmem:[%s4939_s1 + $0x988] sm:$0xff]  ;;  %v448_v27 = vld [vmem:[%s4939_s1 + $0x800] sm:$0xff]  ;;  %v466_v32 = vld [vmem:[%s4939_s1 + $0x890] sm:$0xff] }
  0x75   :  { %1077 = vmatmul.mubr.f32.gmra.mrb[36].mxu0 %v125_v39  ;;  %1176 = vmatprep.mubr.f32.mxu1 %v128_v40  ;;  %v449_v28 = vld [vmem:[%s4939_s1 + $0x808] sm:$0xff]  ;;  %v2993_v29 = vpack.c.bf16 %v497_v22, %v496_v21  ;;  %v480_v30 = vld [vmem:[%s4939_s1 + $0x900] sm:$0xff]  ;;  %v467_v33 = vld [vmem:[%s4939_s1 + $0x898] sm:$0xff] }
  0x76   :  { %2916 = vmatpush3.bf16.msra.mxu0 %v2915_v41  ;;  %1177 = vmatmul.mubr.f32.gmra.mrb[36].mxu1 %v127_v42  ;;  %v481_v31 = vld [vmem:[%s4939_s1 + $0x908] sm:$0xff]  ;;  %v498_v34 = vld [vmem:[%s4939_s1 + $0x990] sm:$0xff]  ;;  %v499_v35 = vld [vmem:[%s4939_s1 + $0x998] sm:$0xff]  ;;  %v2963_v38 = vpack.c.bf16 %v449_v28, %v448_v27 }
  0x77   :  { %2948 = vmatpush3.bf16.msra.mxu1 %v2947_v43  ;;  %1081 = vmatprep.mubr.f32.mxu0 %v151_v44  ;;  %v29_v36 = vld [vmem:[%s4940_s0 + $0x60] sm:$0xff]  ;;  %v31_v37 = vld [vmem:[%s4940_s0 + $0x70] sm:$0xff]  ;;  %v2995_v39 = vpack.c.bf16 %v481_v31, %v480_v30  ;;  %v451_v42 = vld [vmem:[%s4939_s1 + $0x818] sm:$0xff]  ;;  %v2965_v43 = vpack.c.bf16 %v467_v33, %v466_v32  ;;  %v2997_v44 = vpack.c.bf16 %v499_v35, %v498_v34 }
  0x78   :  { %2918 = vmatprep.subr.bf16.mxu0 %v2917_v48  ;;  %2950 = vmatprep.subr.bf16.mxu1 %v2949_v49  ;;  %v55_v40 = vld [vmem:[%s4940_s0 + $0x130] sm:$0xff]  ;;  %v483_v46 = vld [vmem:[%s4939_s1 + $0x918] sm:$0xff]  ;;  %v469_v48 = vld [vmem:[%s4939_s1 + $0x8a8] sm:$0xff] }
  0x79   :  { %1082 = vmatmul.mubr.f32.gmra.mrb[38].mxu0 %v150_v47  ;;  %1181 = vmatprep.mubr.f32.mxu1 %v153_v56  ;;  %v450_v41 = vld [vmem:[%s4939_s1 + $0x810] sm:$0xff]  ;;  %v468_v47 = vld [vmem:[%s4939_s1 + $0x8a0] sm:$0xff]  ;;  %v501_v50 = vld [vmem:[%s4939_s1 + $0x9a8] sm:$0xff] }
  0x7a   :  { %2920 = vmatpush3.bf16.msra.mxu0 %v2919_v57  ;;  %1182 = vmatmul.mubr.f32.gmra.mrb[38].mxu1 %v152_v58  ;;  %v482_v45 = vld [vmem:[%s4939_s1 + $0x910] sm:$0xff]  ;;  %v500_v49 = vld [vmem:[%s4939_s1 + $0x9a0] sm:$0xff]  ;;  %v54_v51 = vld [vmem:[%s4940_s0 + $0x128] sm:$0xff]  ;;  %v2967_v53 = vpack.c.bf16 %v451_v42, %v450_v41 }
  0x7b   :  { %2952 = vmatpush3.bf16.msra.mxu1 %v2951_v60  ;;  %1086 = vmatprep.mubr.f32.mxu0 %v176_v59  ;;  %v57_v52 = vld [vmem:[%s4940_s0 + $0x140] sm:$0xff]  ;;  %v56_v54 = vld [vmem:[%s4940_s0 + $0x138] sm:$0xff]  ;;  %v2999_v55 = vpack.c.bf16 %v483_v46, %v482_v45  ;;  %v453_v58 = vld [vmem:[%s4939_s1 + $0x828] sm:$0xff]  ;;  %v2969_v59 = vpack.c.bf16 %v469_v48, %v468_v47  ;;  %v3001_v60 = vpack.c.bf16 %v501_v50, %v500_v49 }
  0x7c   :  { %2922 = vmatprep.subr.bf16.mxu0 %v2921_v0  ;;  %2954 = vmatprep.subr.bf16.mxu1 %v2953_v1  ;;  %v80_v56 = vld [vmem:[%s4940_s0 + $0x1f8] sm:$0xff]  ;;  %v452_v57 = vld [vmem:[%s4939_s1 + $0x820] sm:$0xff]  ;;  %v485_v62 = vld [vmem:[%s4939_s1 + $0x928] sm:$0xff] }
  0x7d   :  { %1087 = vmatmul.mubr.f32.gmra.mrb[40].mxu0 %v175_v7  ;;  %1186 = vmatprep.mubr.f32.mxu1 %v178_v8  ;;  %v484_v61 = vld [vmem:[%s4939_s1 + $0x920] sm:$0xff]  ;;  %v470_v63 = vld [vmem:[%s4939_s1 + $0x8b0] sm:$0xff]  ;;  %v471_v0 = vld [vmem:[%s4939_s1 + $0x8b8] sm:$0xff]  ;;  %v2971_v5 = vpack.c.bf16 %v453_v58, %v452_v57 }
  0x7e   :  { %2924 = vmatpush3.bf16.msra.mxu0 %v2923_v9  ;;  %1187 = vmatmul.mubr.f32.gmra.mrb[40].mxu1 %v177_v10  ;;  %v502_v1 = vld [vmem:[%s4939_s1 + $0x9b0] sm:$0xff]  ;;  %v503_v2 = vld [vmem:[%s4939_s1 + $0x9b8] sm:$0xff]  ;;  %v82_v4 = vld [vmem:[%s4940_s0 + $0x208] sm:$0xff]  ;;  %v3003_v7 = vpack.c.bf16 %v485_v62, %v484_v61 }
  0x7f   :  { %2956 = vmatpush3.bf16.msra.mxu1 %v2955_v11  ;;  %2926 = vmatprep.subr.bf16.mxu0 %v2925_v12  ;;  %v79_v3 = vld [vmem:[%s4940_s0 + $0x1f0] sm:$0xff]  ;;  %v81_v6 = vld [vmem:[%s4940_s0 + $0x200] sm:$0xff]  ;;  %v455_v10 = vld [vmem:[%s4939_s1 + $0x838] sm:$0xff]  ;;  %v2973_v11 = vpack.c.bf16 %v471_v0, %v470_v63  ;;  %v3005_v12 = vpack.c.bf16 %v503_v2, %v502_v1 }
  0x80   :  { %2958 = vmatprep.subr.bf16.mxu1 %v2957_v16  ;;  %1256 = vmatprep.mubr.f32.mxu0 %v30_v20  ;;  %v105_v8 = vld [vmem:[%s4940_s0 + $0x2c0] sm:$0xff]  ;;  %v454_v9 = vld [vmem:[%s4939_s1 + $0x830] sm:$0xff]  ;;  %v487_v14 = vld [vmem:[%s4939_s1 + $0x938] sm:$0xff] }
  0x81   :  { %1356 = vmatprep.mubr.f32.mxu1 %v32_v24  ;;  %v486_v13 = vld [vmem:[%s4939_s1 + $0x930] sm:$0xff]  ;;  %v472_v15 = vld [vmem:[%s4939_s1 + $0x8c0] sm:$0xff]  ;;  %v473_v16 = vld [vmem:[%s4939_s1 + $0x8c8] sm:$0xff]  ;;  %v2975_v21 = vpack.c.bf16 %v455_v10, %v454_v9 }
  0x82   :  { %2928 = vmatpush3.bf16.msra.mxu0 %v2927_v23  ;;  %v504_v17 = vld [vmem:[%s4939_s1 + $0x9c0] sm:$0xff]  ;;  %v505_v18 = vld [vmem:[%s4939_s1 + $0x9c8] sm:$0xff]  ;;  %v104_v19 = vld [vmem:[%s4940_s0 + $0x2b8] sm:$0xff]  ;;  %v3007_v23 = vpack.c.bf16 %v487_v14, %v486_v13  ;;  %v2977_v27 = vpack.c.bf16 %v473_v16, %v472_v15 }
  0x83   :  { %2960 = vmatpush3.bf16.msra.mxu1 %v2959_v25  ;;  %2962 = vmatprep.subr.bf16.mxu0 %v2961_v26  ;;  %v107_v20 = vld [vmem:[%s4940_s0 + $0x2d0] sm:$0xff]  ;;  %v106_v22 = vld [vmem:[%s4940_s0 + $0x2c8] sm:$0xff]  ;;  %v456_v25 = vld [vmem:[%s4939_s1 + $0x840] sm:$0xff]  ;;  %v3009_v28 = vpack.c.bf16 %v505_v18, %v504_v17 }
  0x84   :  { %2994 = vmatprep.subr.bf16.mxu1 %v2993_v29  ;;  %v130_v24 = vld [vmem:[%s4940_s0 + $0x388] sm:$0xff]  ;;  %v488_v29 = vld [vmem:[%s4939_s1 + $0x940] sm:$0xff]  ;;  %v474_v31 = vld [vmem:[%s4939_s1 + $0x8d0] sm:$0xff] }
  0x85   :  { %1257 = vmatmul.mubr.f32.vlgmr.msra.gmra.mrb[42].mxu0 %v29_v36  ;;  %v457_v26 = vld [vmem:[%s4939_s1 + $0x848] sm:$0xff]  ;;  %v475_v32 = vld [vmem:[%s4939_s1 + $0x8d8] sm:$0xff]  ;;  %v506_v33 = vld [vmem:[%s4939_s1 + $0x9d0] sm:$0xff] }
  0x86   :  { %1357 = vmatmul.mubr.f32.vlgmr.msra.gmra.mrb[42].mxu1 %v31_v37  ;;  %2964 = vmatpush3.bf16.msra.mxu0 %v2963_v38  ;;  %v489_v30 = vld [vmem:[%s4939_s1 + $0x948] sm:$0xff]  ;;  %v507_v34 = vld [vmem:[%s4939_s1 + $0x9d8] sm:$0xff]  ;;  %v129_v35 = vld [vmem:[%s4940_s0 + $0x380] sm:$0xff]  ;;  %v2979_v37 = vpack.c.bf16 %v457_v26, %v456_v25 }
  0x87   :  { %2996 = vmatpush3.bf16.msra.mxu1 %v2995_v39  ;;  %1261 = vmatprep.mubr.f32.mxu0 %v55_v40  ;;  %v132_v36 = vld [vmem:[%s4940_s0 + $0x398] sm:$0xff]  ;;  %v131_v38 = vld [vmem:[%s4940_s0 + $0x390] sm:$0xff]  ;;  %v3011_v39 = vpack.c.bf16 %v489_v30, %v488_v29  ;;  %v3013_v45 = vpack.c.bf16 %v507_v34, %v506_v33  ;;  %v476_v48 = vld [vmem:[%s4939_s1 + $0x8e0] sm:$0xff] }
  0x88   :  { %2966 = vmatprep.subr.bf16.mxu0 %v2965_v43  ;;  %2998 = vmatprep.subr.bf16.mxu1 %v2997_v44  ;;  %v155_v40 = vld [vmem:[%s4940_s0 + $0x450] sm:$0xff]  ;;  %v459_v42 = vld [vmem:[%s4939_s1 + $0x858] sm:$0xff]  ;;  %v154_v43 = vld [vmem:[%s4940_s0 + $0x448] sm:$0xff]  ;;  %v2981_v44 = vpack.c.bf16 %v475_v32, %v474_v31 }
  0x89   :  { %1262 = vmatmul.mubr.f32.gmra.mrb[44].mxu0 %v54_v51  ;;  %1361 = vmatprep.mubr.f32.mxu1 %v57_v52  ;;  %v458_v41 = vld [vmem:[%s4939_s1 + $0x850] sm:$0xff]  ;;  %v491_v47 = vld [vmem:[%s4939_s1 + $0x958] sm:$0xff]  ;;  %v477_v49 = vld [vmem:[%s4939_s1 + $0x8e8] sm:$0xff] }
  0x8a   :  { %2968 = vmatpush3.bf16.msra.mxu0 %v2967_v53  ;;  %1362 = vmatmul.mubr.f32.gmra.mrb[44].mxu1 %v56_v54  ;;  %v490_v46 = vld [vmem:[%s4939_s1 + $0x950] sm:$0xff]  ;;  %v508_v50 = vld [vmem:[%s4939_s1 + $0x9e0] sm:$0xff]  ;;  %v509_v51 = vld [vmem:[%s4939_s1 + $0x9e8] sm:$0xff]  ;;  %v2983_v53 = vpack.c.bf16 %v459_v42, %v458_v41 }
  0x8b   :  { %3000 = vmatpush3.bf16.msra.mxu1 %v2999_v55  ;;  %1266 = vmatprep.mubr.f32.mxu0 %v80_v56  ;;  %v157_v52 = vld [vmem:[%s4940_s0 + $0x460] sm:$0xff]  ;;  %v156_v54 = vld [vmem:[%s4940_s0 + $0x458] sm:$0xff]  ;;  %v3015_v56 = vpack.c.bf16 %v491_v47, %v490_v46  ;;  %v461_v58 = vld [vmem:[%s4939_s1 + $0x868] sm:$0xff]  ;;  %v3017_v61 = vpack.c.bf16 %v509_v51, %v508_v50 }
  0x8c   :  { %2970 = vmatprep.subr.bf16.mxu0 %v2969_v59  ;;  %3002 = vmatprep.subr.bf16.mxu1 %v3001_v60  ;;  %v180_v55 = vld [vmem:[%s4940_s0 + $0x518] sm:$0x3]  ;;  %v460_v57 = vld [vmem:[%s4939_s1 + $0x860] sm:$0xff]  ;;  %v2985_v60 = vpack.c.bf16 %v477_v49, %v476_v48  ;;  %v493_v62 = vld [vmem:[%s4939_s1 + $0x968] sm:$0xff] }
  0x8d   :  { %1267 = vmatmul.mubr.f32.gmra.mrb[46].mxu0 %v79_v3  ;;  %1366 = vmatprep.mubr.f32.mxu1 %v82_v4  ;;  %v492_v59 = vld [vmem:[%s4939_s1 + $0x960] sm:$0xff]  ;;  %v478_v63 = vld [vmem:[%s4939_s1 + $0x8f0] sm:$0xff]  ;;  %v479_v0 = vld [vmem:[%s4939_s1 + $0x8f8] sm:$0xff] }
  0x8e   :  { %2972 = vmatpush3.bf16.msra.mxu0 %v2971_v5  ;;  %1367 = vmatmul.mubr.f32.gmra.mrb[46].mxu1 %v81_v6  ;;  %v510_v1 = vld [vmem:[%s4939_s1 + $0x9f0] sm:$0xff]  ;;  %v511_v2 = vld [vmem:[%s4939_s1 + $0x9f8] sm:$0xff]  ;;  %v182_v4 = vld [vmem:[%s4940_s0 + $0x528] sm:$0x3]  ;;  %v2987_v5 = vpack.c.bf16 %v461_v58, %v460_v57 }
  0x8f   :  { %3004 = vmatpush3.bf16.msra.mxu1 %v3003_v7  ;;  %1271 = vmatprep.mubr.f32.mxu0 %v105_v8  ;;  %v179_v3 = vld [vmem:[%s4940_s0 + $0x510] sm:$0x3]  ;;  %v181_v6 = vld [vmem:[%s4940_s0 + $0x520] sm:$0x3]  ;;  %v3019_v7 = vpack.c.bf16 %v493_v62, %v492_v59  ;;  %v2989_v8 = vpack.c.bf16 %v479_v0, %v478_v63  ;;  %v463_v10 = vld [vmem:[%s4939_s1 + $0x878] sm:$0xff] }
  0x90   :  { %2974 = vmatprep.subr.bf16.mxu0 %v2973_v11  ;;  %3006 = vmatprep.subr.bf16.mxu1 %v3005_v12  ;;  %v462_v9 = vld [vmem:[%s4939_s1 + $0x870] sm:$0xff]  ;;  %v3021_v12 = vpack.c.bf16 %v511_v2, %v510_v1  ;;  %v495_v13 = vld [vmem:[%s4939_s1 + $0x978] sm:$0xff]  ;;  %v528_v14 = vld [vmem:[%s4939_s1 + $0xa80] sm:$0xff] }
  0x91   :  { %1272 = vmatmul.mubr.f32.gmra.mrb[48].mxu0 %v104_v19  ;;  %1371 = vmatprep.mubr.f32.mxu1 %v107_v20  ;;  %v494_v11 = vld [vmem:[%s4939_s1 + $0x970] sm:$0xff]  ;;  %v529_v15 = vld [vmem:[%s4939_s1 + $0xa88] sm:$0xff]  ;;  %v560_v17 = vld [vmem:[%s4939_s1 + $0xb80] sm:$0xff]  ;;  %v2991_v19 = vpack.c.bf16 %v463_v10, %v462_v9 }
  0x92   :  { %2976 = vmatpush3.bf16.msra.mxu0 %v2975_v21  ;;  %1372 = vmatmul.mubr.f32.gmra.mrb[48].mxu1 %v106_v22  ;;  %v34_v16 = vld [vmem:[%s4940_s0 + $0x88] sm:$0xff]  ;;  %v36_v20 = vld [vmem:[%s4940_s0 + $0x98] sm:$0xff]  ;;  %v3023_v21 = vpack.c.bf16 %v495_v13, %v494_v11  ;;  %v3025_v22 = vpack.c.bf16 %v529_v15, %v528_v14  ;;  %v544_v26 = vld [vmem:[%s4939_s1 + $0xb00] sm:$0xff] }
  0x93   :  { %3008 = vmatpush3.bf16.msra.mxu1 %v3007_v23  ;;  %1276 = vmatprep.mubr.f32.mxu0 %v130_v24  ;;  %v561_v18 = vld [vmem:[%s4939_s1 + $0xb88] sm:$0xff]  ;;  %v512_v23 = vld [vmem:[%s4939_s1 + $0xa00] sm:$0xff]  ;;  %v531_v29 = vld [vmem:[%s4939_s1 + $0xa98] sm:$0xff] }
  0x94   :  { %2978 = vmatprep.subr.bf16.mxu0 %v2977_v27  ;;  %3010 = vmatprep.subr.bf16.mxu1 %v3009_v28  ;;  %v513_v24 = vld [vmem:[%s4939_s1 + $0xa08] sm:$0xff]  ;;  %v3057_v25 = vpack.c.bf16 %v561_v18, %v560_v17  ;;  %v530_v28 = vld [vmem:[%s4939_s1 + $0xa90] sm:$0xff]  ;;  %v563_v31 = vld [vmem:[%s4939_s1 + $0xb98] sm:$0xff] }
  0x95   :  { %1277 = vmatmul.mubr.f32.gmra.mrb[50].mxu0 %v129_v35  ;;  %1376 = vmatprep.mubr.f32.mxu1 %v132_v36  ;;  %v545_v27 = vld [vmem:[%s4939_s1 + $0xb08] sm:$0xff]  ;;  %v562_v30 = vld [vmem:[%s4939_s1 + $0xb90] sm:$0xff]  ;;  %v33_v32 = vld [vmem:[%s4940_s0 + $0x80] sm:$0xff]  ;;  %v3027_v34 = vpack.c.bf16 %v513_v24, %v512_v23 }
  0x96   :  { %2980 = vmatpush3.bf16.msra.mxu0 %v2979_v37  ;;  %1377 = vmatmul.mubr.f32.gmra.mrb[50].mxu1 %v131_v38  ;;  %v35_v33 = vld [vmem:[%s4940_s0 + $0x90] sm:$0xff]  ;;  %v3059_v35 = vpack.c.bf16 %v545_v27, %v544_v26  ;;  %v515_v38 = vld [vmem:[%s4939_s1 + $0xa18] sm:$0xff]  ;;  %v565_v46 = vld [vmem:[%s4939_s1 + $0xba8] sm:$0xff] }
  0x97   :  { %3012 = vmatpush3.bf16.msra.mxu1 %v3011_v39  ;;  %1281 = vmatprep.mubr.f32.mxu0 %v155_v40  ;;  %v59_v36 = vld [vmem:[%s4940_s0 + $0x150] sm:$0xff]  ;;  %v3029_v39 = vpack.c.bf16 %v531_v29, %v530_v28  ;;  %v3061_v40 = vpack.c.bf16 %v563_v31, %v562_v30  ;;  %v547_v42 = vld [vmem:[%s4939_s1 + $0xb18] sm:$0xff]  ;;  %v58_v47 = vld [vmem:[%s4940_s0 + $0x148] sm:$0xff] }
  0x98   :  { %2982 = vmatprep.subr.bf16.mxu0 %v2981_v44  ;;  %3014 = vmatprep.subr.bf16.mxu1 %v3013_v45  ;;  %v514_v37 = vld [vmem:[%s4939_s1 + $0xa10] sm:$0xff]  ;;  %v533_v44 = vld [vmem:[%s4939_s1 + $0xaa8] sm:$0xff]  ;;  %v564_v45 = vld [vmem:[%s4939_s1 + $0xba0] sm:$0xff] }
  0x99   :  { %1282 = vmatmul.mubr.f32.gmra.mrb[52].mxu0 %v154_v43  ;;  %1381 = vmatprep.mubr.f32.mxu1 %v157_v52  ;;  %v546_v41 = vld [vmem:[%s4939_s1 + $0xb10] sm:$0xff]  ;;  %v532_v43 = vld [vmem:[%s4939_s1 + $0xaa0] sm:$0xff]  ;;  %v3031_v49 = vpack.c.bf16 %v515_v38, %v514_v37  ;;  %v60_v50 = vld [vmem:[%s4940_s0 + $0x158] sm:$0xff] }
  0x9a   :  { %2984 = vmatpush3.bf16.msra.mxu0 %v2983_v53  ;;  %1382 = vmatmul.mubr.f32.gmra.mrb[52].mxu1 %v156_v54  ;;  %v61_v48 = vld [vmem:[%s4940_s0 + $0x160] sm:$0xff]  ;;  %v3063_v51 = vpack.c.bf16 %v547_v42, %v546_v41  ;;  %v84_v52 = vld [vmem:[%s4940_s0 + $0x218] sm:$0xff]  ;;  %v517_v54 = vld [vmem:[%s4939_s1 + $0xa28] sm:$0xff] }
  0x9b   :  { %3016 = vmatpush3.bf16.msra.mxu1 %v3015_v56  ;;  %1286 = vmatprep.mubr.f32.mxu0 %v180_v55  ;;  %v516_v53 = vld [vmem:[%s4939_s1 + $0xa20] sm:$0xff]  ;;  %v3033_v55 = vpack.c.bf16 %v533_v44, %v532_v43  ;;  %v3065_v56 = vpack.c.bf16 %v565_v46, %v564_v45  ;;  %v549_v58 = vld [vmem:[%s4939_s1 + $0xb28] sm:$0xff]  ;;  %v534_v59 = vld [vmem:[%s4939_s1 + $0xab0] sm:$0xff] }
  0x9c   :  { %2986 = vmatprep.subr.bf16.mxu0 %v2985_v60  ;;  %3018 = vmatprep.subr.bf16.mxu1 %v3017_v61  ;;  %v548_v57 = vld [vmem:[%s4939_s1 + $0xb20] sm:$0xff]  ;;  %v535_v60 = vld [vmem:[%s4939_s1 + $0xab8] sm:$0xff]  ;;  %v566_v61 = vld [vmem:[%s4939_s1 + $0xbb0] sm:$0xff]  ;;  %v3035_v1 = vpack.c.bf16 %v517_v54, %v516_v53 }
  0x9d   :  { %1287 = vmatmul.mubr.f32.gmra.mrb[54].mxu0 %v179_v3  ;;  %1386 = vmatprep.mubr.f32.mxu1 %v182_v4  ;;  %v567_v62 = vld [vmem:[%s4939_s1 + $0xbb8] sm:$0xff]  ;;  %v83_v63 = vld [vmem:[%s4940_s0 + $0x210] sm:$0xff]  ;;  %v86_v0 = vld [vmem:[%s4940_s0 + $0x228] sm:$0xff]  ;;  %v3067_v3 = vpack.c.bf16 %v549_v58, %v548_v57 }
  0x9e   :  { %2988 = vmatpush3.bf16.msra.mxu0 %v2987_v5  ;;  %1387 = vmatmul.mubr.f32.gmra.mrb[54].mxu1 %v181_v6  ;;  %v85_v2 = vld [vmem:[%s4940_s0 + $0x220] sm:$0xff]  ;;  %v518_v5 = vld [vmem:[%s4939_s1 + $0xa30] sm:$0xff]  ;;  %v519_v6 = vld [vmem:[%s4939_s1 + $0xa38] sm:$0xff] }
  0x9f   :  { %3020 = vmatpush3.bf16.msra.mxu1 %v3019_v7  ;;  %2990 = vmatprep.subr.bf16.mxu0 %v2989_v8  ;;  %v109_v4 = vld [vmem:[%s4940_s0 + $0x2e0] sm:$0xff]  ;;  %v3037_v7 = vpack.c.bf16 %v535_v60, %v534_v59  ;;  %v3069_v8 = vpack.c.bf16 %v567_v62, %v566_v61  ;;  %v550_v9 = vld [vmem:[%s4939_s1 + $0xb30] sm:$0xff]  ;;  %v551_v10 = vld [vmem:[%s4939_s1 + $0xb38] sm:$0xff]  ;;  %v3039_v17 = vpack.c.bf16 %v519_v6, %v518_v5 }
  0xa0   :  { %3022 = vmatprep.subr.bf16.mxu1 %v3021_v12  ;;  %1456 = vmatprep.mubr.f32.mxu0 %v34_v16  ;;  %v536_v11 = vld [vmem:[%s4939_s1 + $0xac0] sm:$0xff]  ;;  %v537_v12 = vld [vmem:[%s4939_s1 + $0xac8] sm:$0xff]  ;;  %v108_v15 = vld [vmem:[%s4940_s0 + $0x2d8] sm:$0xff] }
  0xa1   :  { %1556 = vmatprep.mubr.f32.mxu1 %v36_v20  ;;  %v568_v13 = vld [vmem:[%s4939_s1 + $0xbc0] sm:$0xff]  ;;  %v569_v14 = vld [vmem:[%s4939_s1 + $0xbc8] sm:$0xff]  ;;  %v111_v16 = vld [vmem:[%s4940_s0 + $0x2f0] sm:$0xff]  ;;  %v3041_v23 = vpack.c.bf16 %v537_v12, %v536_v11 }
  0xa2   :  { %2992 = vmatpush3.bf16.msra.mxu0 %v2991_v19  ;;  %v110_v18 = vld [vmem:[%s4940_s0 + $0x2e8] sm:$0xff]  ;;  %v3071_v19 = vpack.c.bf16 %v551_v10, %v550_v9  ;;  %v3073_v24 = vpack.c.bf16 %v569_v14, %v568_v13  ;;  %v538_v27 = vld [vmem:[%s4939_s1 + $0xad0] sm:$0xff]  ;;  %v539_v28 = vld [vmem:[%s4939_s1 + $0xad8] sm:$0xff] }
  0xa3   :  { %3024 = vmatpush3.bf16.msra.mxu1 %v3023_v21  ;;  %3026 = vmatprep.subr.bf16.mxu0 %v3025_v22  ;;  %v134_v20 = vld [vmem:[%s4940_s0 + $0x3a8] sm:$0xff]  ;;  %v520_v21 = vld [vmem:[%s4939_s1 + $0xa40] sm:$0xff]  ;;  %v570_v29 = vld [vmem:[%s4939_s1 + $0xbd0] sm:$0xff] }
  0xa4   :  { %3058 = vmatprep.subr.bf16.mxu1 %v3057_v25  ;;  %v521_v22 = vld [vmem:[%s4939_s1 + $0xa48] sm:$0xff]  ;;  %v552_v25 = vld [vmem:[%s4939_s1 + $0xb40] sm:$0xff]  ;;  %v571_v30 = vld [vmem:[%s4939_s1 + $0xbd8] sm:$0xff] }
  0xa5   :  { %1457 = vmatmul.mubr.f32.vlgmr.msra.gmra.mrb[56].mxu0 %v33_v32  ;;  %v553_v26 = vld [vmem:[%s4939_s1 + $0xb48] sm:$0xff]  ;;  %v133_v31 = vld [vmem:[%s4940_s0 + $0x3a0] sm:$0xff]  ;;  %v136_v32 = vld [vmem:[%s4940_s0 + $0x3b8] sm:$0xff]  ;;  %v3077_v41 = vpack.c.bf16 %v571_v30, %v570_v29 }
  0xa6   :  { %1557 = vmatmul.mubr.f32.vlgmr.msra.gmra.mrb[56].mxu1 %v35_v33  ;;  %3028 = vmatpush3.bf16.msra.mxu0 %v3027_v34  ;;  %v3043_v33 = vpack.c.bf16 %v521_v22, %v520_v21  ;;  %v135_v34 = vld [vmem:[%s4940_s0 + $0x3b0] sm:$0xff]  ;;  %v523_v38 = vld [vmem:[%s4939_s1 + $0xa58] sm:$0xff]  ;;  %v540_v44 = vld [vmem:[%s4939_s1 + $0xae0] sm:$0xff] }
  0xa7   :  { %3060 = vmatpush3.bf16.msra.mxu1 %v3059_v35  ;;  %1461 = vmatprep.mubr.f32.mxu0 %v59_v36  ;;  %v3075_v35 = vpack.c.bf16 %v553_v26, %v552_v25  ;;  %v159_v36 = vld [vmem:[%s4940_s0 + $0x470] sm:$0xff]  ;;  %v555_v43 = vld [vmem:[%s4939_s1 + $0xb58] sm:$0xff]  ;;  %v541_v45 = vld [vmem:[%s4939_s1 + $0xae8] sm:$0xff] }
  0xa8   :  { %3030 = vmatprep.subr.bf16.mxu0 %v3029_v39  ;;  %3062 = vmatprep.subr.bf16.mxu1 %v3061_v40  ;;  %v522_v37 = vld [vmem:[%s4939_s1 + $0xa50] sm:$0xff]  ;;  %v158_v39 = vld [vmem:[%s4940_s0 + $0x468] sm:$0xff]  ;;  %v3045_v40 = vpack.c.bf16 %v539_v28, %v538_v27  ;;  %v572_v46 = vld [vmem:[%s4939_s1 + $0xbe0] sm:$0xff] }
  0xa9   :  { %1462 = vmatmul.mubr.f32.gmra.mrb[58].mxu0 %v58_v47  ;;  %1561 = vmatprep.mubr.f32.mxu1 %v61_v48  ;;  %v554_v42 = vld [vmem:[%s4939_s1 + $0xb50] sm:$0xff]  ;;  %v573_v47 = vld [vmem:[%s4939_s1 + $0xbe8] sm:$0xff]  ;;  %v161_v48 = vld [vmem:[%s4940_s0 + $0x480] sm:$0xff] }
  0xaa   :  { %3032 = vmatpush3.bf16.msra.mxu0 %v3031_v49  ;;  %1562 = vmatmul.mubr.f32.gmra.mrb[58].mxu1 %v60_v50  ;;  %v3047_v49 = vpack.c.bf16 %v523_v38, %v522_v37  ;;  %v160_v50 = vld [vmem:[%s4940_s0 + $0x478] sm:$0xff]  ;;  %v524_v53 = vld [vmem:[%s4939_s1 + $0xa60] sm:$0xff]  ;;  %v525_v54 = vld [vmem:[%s4939_s1 + $0xa68] sm:$0xff]  ;;  %v3081_v57 = vpack.c.bf16 %v573_v47, %v572_v46 }
  0xab   :  { %3064 = vmatpush3.bf16.msra.mxu1 %v3063_v51  ;;  %1466 = vmatprep.mubr.f32.mxu0 %v84_v52  ;;  %v184_v51 = vld [vmem:[%s4940_s0 + $0x538] sm:$0x3]  ;;  %v3079_v52 = vpack.c.bf16 %v555_v43, %v554_v42  ;;  %v557_v58 = vld [vmem:[%s4939_s1 + $0xb68] sm:$0xff]  ;;  %v542_v59 = vld [vmem:[%s4939_s1 + $0xaf0] sm:$0xff] }
  0xac   :  { %3034 = vmatprep.subr.bf16.mxu0 %v3033_v55  ;;  %3066 = vmatprep.subr.bf16.mxu1 %v3065_v56  ;;  %v556_v55 = vld [vmem:[%s4939_s1 + $0xb60] sm:$0xff]  ;;  %v3049_v56 = vpack.c.bf16 %v541_v45, %v540_v44  ;;  %v543_v60 = vld [vmem:[%s4939_s1 + $0xaf8] sm:$0xff]  ;;  %v574_v61 = vld [vmem:[%s4939_s1 + $0xbf0] sm:$0xff] }
  0xad   :  { %1467 = vmatmul.mubr.f32.gmra.mrb[60].mxu0 %v83_v63  ;;  %1566 = vmatprep.mubr.f32.mxu1 %v86_v0  ;;  %v575_v62 = vld [vmem:[%s4939_s1 + $0xbf8] sm:$0xff]  ;;  %v183_v63 = vld [vmem:[%s4940_s0 + $0x530] sm:$0x3]  ;;  %v186_v0 = vld [vmem:[%s4940_s0 + $0x548] sm:$0x3] }
  0xae   :  { %3036 = vmatpush3.bf16.msra.mxu0 %v3035_v1  ;;  %1567 = vmatmul.mubr.f32.gmra.mrb[60].mxu1 %v85_v2  ;;  %v3051_v1 = vpack.c.bf16 %v525_v54, %v524_v53  ;;  %v3083_v2 = vpack.c.bf16 %v557_v58, %v556_v55  ;;  %v526_v5 = vld [vmem:[%s4939_s1 + $0xa70] sm:$0xff]  ;;  %v527_v6 = vld [vmem:[%s4939_s1 + $0xa78] sm:$0xff]  ;;  %v38_v10 = vld [vmem:[%s4940_s0 + $0xa8] sm:$0xff] }
  0xaf   :  { %3068 = vmatpush3.bf16.msra.mxu1 %v3067_v3  ;;  %1471 = vmatprep.mubr.f32.mxu0 %v109_v4  ;;  %v185_v3 = vld [vmem:[%s4940_s0 + $0x540] sm:$0x3]  ;;  %v3053_v4 = vpack.c.bf16 %v543_v60, %v542_v59  ;;  %v559_v9 = vld [vmem:[%s4939_s1 + $0xb78] sm:$0xff]  ;;  %v3055_v11 = vpack.c.bf16 %v527_v6, %v526_v5  ;;  %v63_v22 = vld [vmem:[%s4940_s0 + $0x170] sm:$0xff] }
  0xb0   :  { %3038 = vmatprep.subr.bf16.mxu0 %v3037_v7  ;;  %3070 = vmatprep.subr.bf16.mxu1 %v3069_v8  ;;  %v3085_v7 = vpack.c.bf16 %v575_v62, %v574_v61  ;;  %v558_v8 = vld [vmem:[%s4939_s1 + $0xb70] sm:$0xff]  ;;  %v40_v12 = vld [vmem:[%s4940_s0 + $0xb8] sm:$0xff]  ;;  %v576_v14 = vld [vmem:[%s4939_s1 + $0xc00] sm:$0xff] }
  0xb1   :  { %1472 = vmatmul.mubr.f32.gmra.mrb[62].mxu0 %v108_v15  ;;  %1571 = vmatprep.mubr.f32.mxu1 %v111_v16  ;;  %v3087_v13 = vpack.c.bf16 %v559_v9, %v558_v8  ;;  %v577_v15 = vld [vmem:[%s4939_s1 + $0xc08] sm:$0xff]  ;;  %v37_v16 = vld [vmem:[%s4940_s0 + $0xa0] sm:$0xff]  ;;  %v579_v21 = vld [vmem:[%s4939_s1 + $0xc18] sm:$0xff] }
  0xb2   :  { %3040 = vmatpush3.bf16.msra.mxu0 %v3039_v17  ;;  %1572 = vmatmul.mubr.f32.gmra.mrb[62].mxu1 %v110_v18  ;;  %v3090_v17 = vpack.c.bf16 %v577_v15, %v576_v14  ;;  %v3134_v18 = vmov 0.0|0.0   ;;  %v64_v26 = vld [vmem:[%s4940_s0 + $0x178] sm:$0xff]  ;;  %v580_v27 = vld [vmem:[%s4939_s1 + $0xc20] sm:$0xff]  ;;  %v581_v28 = vld [vmem:[%s4939_s1 + $0xc28] sm:$0xff] }
  0xb3   :  { %3072 = vmatpush3.bf16.msra.mxu1 %v3071_v19  ;;  %1476 = vmatprep.mubr.f32.mxu0 %v134_v20  ;;  %v39_v19 = vld [vmem:[%s4940_s0 + $0xb0] sm:$0xff]  ;;  %v88_v29 = vld [vmem:[%s4940_s0 + $0x238] sm:$0xff]  ;;  %v585_v42 = vld [vmem:[%s4939_s1 + $0xc48] sm:$0xff] }
  0xb4   :  { %3042 = vmatprep.subr.bf16.mxu0 %v3041_v23  ;;  %3074 = vmatprep.subr.bf16.mxu1 %v3073_v24  ;;  %v578_v20 = vld [vmem:[%s4939_s1 + $0xc10] sm:$0xff]  ;;  %v62_v23 = vld [vmem:[%s4940_s0 + $0x168] sm:$0xff]  ;;  %v65_v24 = vld [vmem:[%s4940_s0 + $0x180] sm:$0xff] }
  0xb5   :  { %1477 = vmatmul.mubr.f32.gmra.mrb[64].mxu0 %v133_v31  ;;  %1576 = vmatprep.mubr.f32.mxu1 %v136_v32  ;;  %v3093_v25 = vpack.c.bf16 %v579_v21, %v578_v20  ;;  %v87_v30 = vld [vmem:[%s4940_s0 + $0x230] sm:$0xff]  ;;  %v90_v31 = vld [vmem:[%s4940_s0 + $0x248] sm:$0xff]  ;;  %v3096_v32 = vpack.c.bf16 %v581_v28, %v580_v27  ;;  %v112_v37 = vld [vmem:[%s4940_s0 + $0x2f8] sm:$0xff] }
  0xb6   :  { %3044 = vmatpush3.bf16.msra.mxu0 %v3043_v33  ;;  %1577 = vmatmul.mubr.f32.gmra.mrb[64].mxu1 %v135_v34  ;;  %v89_v33 = vld [vmem:[%s4940_s0 + $0x240] sm:$0xff]  ;;  %v582_v34 = vld [vmem:[%s4939_s1 + $0xc30] sm:$0xff]  ;;  %v138_v43 = vld [vmem:[%s4940_s0 + $0x3c8] sm:$0xff] }
  0xb7   :  { %3076 = vmatpush3.bf16.msra.mxu1 %v3075_v35  ;;  %1481 = vmatprep.mubr.f32.mxu0 %v159_v36  ;;  %v583_v35 = vld [vmem:[%s4939_s1 + $0xc38] sm:$0xff]  ;;  %v113_v36 = vld [vmem:[%s4940_s0 + $0x300] sm:$0xff]  ;;  %v115_v38 = vld [vmem:[%s4940_s0 + $0x310] sm:$0xff] }
  0xb8   :  { %3046 = vmatprep.subr.bf16.mxu0 %v3045_v40  ;;  %3078 = vmatprep.subr.bf16.mxu1 %v3077_v41  ;;  %v114_v40 = vld [vmem:[%s4940_s0 + $0x308] sm:$0xff]  ;;  %v584_v41 = vld [vmem:[%s4939_s1 + $0xc40] sm:$0xff]  ;;  %v140_v45 = vld [vmem:[%s4940_s0 + $0x3d8] sm:$0xff] }
  0xb9   :  { %1482 = vmatmul.mubr.f32.gmra.mrb[66].mxu0 %v158_v39  ;;  %1581 = vmatprep.mubr.f32.mxu1 %v161_v48  ;;  %v3099_v39 = vpack.c.bf16 %v583_v35, %v582_v34  ;;  %v137_v44 = vld [vmem:[%s4940_s0 + $0x3c0] sm:$0xff]  ;;  %v3102_v46 = vpack.c.bf16 %v585_v42, %v584_v41  ;;  %v139_v47 = vld [vmem:[%s4940_s0 + $0x3d0] sm:$0xff]  ;;  %v164_v54 = vld [vmem:[%s4940_s0 + $0x498] sm:$0xff] }
  0xba   :  { %3048 = vmatpush3.bf16.msra.mxu0 %v3047_v49  ;;  %1582 = vmatmul.mubr.f32.gmra.mrb[66].mxu1 %v160_v50  ;;  %v586_v48 = vld [vmem:[%s4939_s1 + $0xc50] sm:$0xff]  ;;  %v587_v49 = vld [vmem:[%s4939_s1 + $0xc58] sm:$0xff]  ;;  %v588_v55 = vld [vmem:[%s4939_s1 + $0xc60] sm:$0xff] }
  0xbb   :  { %3080 = vmatpush3.bf16.msra.mxu1 %v3079_v52  ;;  %1486 = vmatprep.mubr.f32.mxu0 %v184_v51  ;;  %v163_v50 = vld [vmem:[%s4940_s0 + $0x490] sm:$0xff]  ;;  %v162_v51 = vld [vmem:[%s4940_s0 + $0x488] sm:$0xff]  ;;  %v165_v52 = vld [vmem:[%s4940_s0 + $0x4a0] sm:$0xff]  ;;  %v3105_v53 = vpack.c.bf16 %v587_v49, %v586_v48 }
  0xbc   :  { %3050 = vmatprep.subr.bf16.mxu0 %v3049_v56  ;;  %3082 = vmatprep.subr.bf16.mxu1 %v3081_v57  ;;  %v589_v56 = vld [vmem:[%s4939_s1 + $0xc68] sm:$0xff]  ;;  %v188_v57 = vld [vmem:[%s4940_s0 + $0x558] sm:$0x3]  ;;  %v187_v58 = vld [vmem:[%s4940_s0 + $0x550] sm:$0x3] }
  0xbd   :  { %1487 = vmatmul.mubr.f32.gmra.mrb[68].mxu0 %v183_v63  ;;  %1586 = vmatprep.mubr.f32.mxu1 %v186_v0  ;;  %v190_v59 = vld [vmem:[%s4940_s0 + $0x568] sm:$0x3]  ;;  %v3108_v60 = vpack.c.bf16 %v589_v56, %v588_v55  ;;  %v189_v61 = vld [vmem:[%s4940_s0 + $0x560] sm:$0x3]  ;;  %v590_v62 = vld [vmem:[%s4939_s1 + $0xc70] sm:$0xff] }
  0xbe   :  { %3052 = vmatpush3.bf16.msra.mxu0 %v3051_v1  ;;  %1587 = vmatmul.mubr.f32.gmra.mrb[68].mxu1 %v185_v3  ;;  %v591_v63 = vld [vmem:[%s4939_s1 + $0xc78] sm:$0xff]  ;;  %v3136_v1 = vmov 0.0   ;;  %v141_v3 = vld [vmem:[%s4940_s0 + $0x3e0] sm:$0xff]  ;;  %v166_v5 = vld [vmem:[%s4940_s0 + $0x4a8] sm:$0xff] }
  0xbf   :  { %3084 = vmatpush3.bf16.msra.mxu1 %v3083_v2  ;;  %3054 = vmatprep.subr.bf16.mxu0 %v3053_v4  ;;  %v3111_v0 = vpack.c.bf16 %v591_v63, %v590_v62  ;;  %v41_v2 = vld [vmem:[%s4940_s0 + $0xc0] sm:$0xff]  ;;  %v66_v4 = vld [vmem:[%s4940_s0 + $0x188] sm:$0xff]  ;;  %v91_v6 = vld [vmem:[%s4940_s0 + $0x250] sm:$0xff] }
  0xc0   :  { %3086 = vmatprep.subr.bf16.mxu1 %v3085_v7  ;;  %1656 = vmatprep.mubr.f32.mxu0 %v38_v10  ;;  %v191_v7 = vld [vmem:[%s4940_s0 + $0x570] sm:$0x3]  ;;  %v116_v8 = vld [vmem:[%s4940_s0 + $0x318] sm:$0xff] }
  0xc1   :  { %1756 = vmatprep.mubr.f32.mxu1 %v40_v12 }
  0xc2   :  { %3056 = vmatpush3.bf16.msra.mxu0 %v3055_v11 }
  0xc3   :  { %3088 = vmatpush3.bf16.msra.mxu1 %v3087_v13  ;;  %3089 = vmatprep.subr.bf16.mxu0 %v3134_v18 }
  0xc4   :  { %3113 = vmatprep.subr.bf16.mxu1 %v3134_v18 }
  0xc5   :  { %1657 = vmatmul.mubr.f32.vlgmr.msra.gmra.mrb[70].mxu0 %v37_v16 }
  0xc6   :  { %1757 = vmatmul.mubr.f32.vlgmr.msra.gmra.mrb[70].mxu1 %v39_v19  ;;  %3091 = vmatpush3.bf16.msra.mxu0 %v3090_v17 }
  0xc7   :  { %3121 = vmatpush3.bf16.msra.mxu1 %v3090_v17  ;;  %1661 = vmatprep.mubr.f32.mxu0 %v63_v22 }
  0xc8   :  { %3092 = vmatprep.subr.bf16.mxu0 %v3134_v18  ;;  %3114 = vmatprep.subr.bf16.mxu1 %v3134_v18 }
  0xc9   :  { %1662 = vmatmul.mubr.f32.gmra.mrb[72].mxu0 %v62_v23  ;;  %1761 = vmatprep.mubr.f32.mxu1 %v65_v24 }
  0xca   :  { %3094 = vmatpush3.bf16.msra.mxu0 %v3093_v25  ;;  %1762 = vmatmul.mubr.f32.gmra.mrb[72].mxu1 %v64_v26 }
  0xcb   :  { %3122 = vmatpush3.bf16.msra.mxu1 %v3093_v25  ;;  %1666 = vmatprep.mubr.f32.mxu0 %v88_v29 }
  0xcc   :  { %3095 = vmatprep.subr.bf16.mxu0 %v3134_v18  ;;  %3115 = vmatprep.subr.bf16.mxu1 %v3134_v18 }
  0xcd   :  { %1667 = vmatmul.mubr.f32.gmra.mrb[74].mxu0 %v87_v30  ;;  %1766 = vmatprep.mubr.f32.mxu1 %v90_v31 }
  0xce   :  { %3097 = vmatpush3.bf16.msra.mxu0 %v3096_v32  ;;  %1767 = vmatmul.mubr.f32.gmra.mrb[74].mxu1 %v89_v33 }
  0xcf   :  { %3123 = vmatpush3.bf16.msra.mxu1 %v3096_v32  ;;  %1671 = vmatprep.mubr.f32.mxu0 %v113_v36 }
  0xd0   :  { %3098 = vmatprep.subr.bf16.mxu0 %v3134_v18  ;;  %3116 = vmatprep.subr.bf16.mxu1 %v3134_v18 }
  0xd1   :  { %1672 = vmatmul.mubr.f32.gmra.mrb[76].mxu0 %v112_v37  ;;  %1771 = vmatprep.mubr.f32.mxu1 %v115_v38 }
  0xd2   :  { %3100 = vmatpush3.bf16.msra.mxu0 %v3099_v39  ;;  %1772 = vmatmul.mubr.f32.gmra.mrb[76].mxu1 %v114_v40 }
  0xd3   :  { %3124 = vmatpush3.bf16.msra.mxu1 %v3099_v39  ;;  %1676 = vmatprep.mubr.f32.mxu0 %v138_v43 }
  0xd4   :  { %3101 = vmatprep.subr.bf16.mxu0 %v3134_v18  ;;  %3117 = vmatprep.subr.bf16.mxu1 %v3134_v18 }
  0xd5   :  { %1677 = vmatmul.mubr.f32.gmra.mrb[78].mxu0 %v137_v44  ;;  %1776 = vmatprep.mubr.f32.mxu1 %v140_v45 }
  0xd6   :  { %3103 = vmatpush3.bf16.msra.mxu0 %v3102_v46  ;;  %1777 = vmatmul.mubr.f32.gmra.mrb[78].mxu1 %v139_v47 }
  0xd7   :  { %3125 = vmatpush3.bf16.msra.mxu1 %v3102_v46  ;;  %1681 = vmatprep.mubr.f32.mxu0 %v163_v50 }
  0xd8   :  { %3104 = vmatprep.subr.bf16.mxu0 %v3134_v18  ;;  %3118 = vmatprep.subr.bf16.mxu1 %v3134_v18 }
  0xd9   :  { %1682 = vmatmul.mubr.f32.gmra.mrb[80].mxu0 %v162_v51  ;;  %1781 = vmatprep.mubr.f32.mxu1 %v165_v52 }
  0xda   :  { %3106 = vmatpush3.bf16.msra.mxu0 %v3105_v53  ;;  %1782 = vmatmul.mubr.f32.gmra.mrb[80].mxu1 %v164_v54 }
  0xdb   :  { %3126 = vmatpush3.bf16.msra.mxu1 %v3105_v53  ;;  %1686 = vmatprep.mubr.f32.mxu0 %v188_v57 }
  0xdc   :  { %3107 = vmatprep.subr.bf16.mxu0 %v3134_v18  ;;  %3119 = vmatprep.subr.bf16.mxu1 %v3134_v18 }
  0xdd   :  { %1687 = vmatmul.mubr.f32.gmra.mrb[82].mxu0 %v187_v58  ;;  %1786 = vmatprep.mubr.f32.mxu1 %v190_v59 }
  0xde   :  { %3109 = vmatpush3.bf16.msra.mxu0 %v3108_v60  ;;  %1787 = vmatmul.mubr.f32.gmra.mrb[82].mxu1 %v189_v61 }
  0xdf   :  { %3127 = vmatpush3.bf16.msra.mxu1 %v3108_v60  ;;  %3110 = vmatprep.subr.bf16.mxu0 %v3134_v18 }
  0xe0   :  { %3120 = vmatprep.subr.bf16.mxu1 %v3134_v18  ;;  %2684 = vmatprep.mubr.msk.f32.mxu0 %vm3135_vm0, %v3136_v1 }
  0xe1   :  { %2696 = vmatprep.mubr.msk.f32.mxu1 %vm3135_vm0, %v3136_v1 }
  0xe2   :  { %3112 = vmatpush3.bf16.msra.mxu0 %v3111_v0 }
  0xe3   :  { %3128 = vmatpush3.bf16.msra.mxu1 %v3111_v0 }
  0xe5   :  { %2685 = vmatmul.mubr.f32.vlgmr.msra.gmra.mrb[84].mxu0 %v41_v2 }
  0xe6   :  { %2697 = vmatmul.mubr.f32.vlgmr.msra.gmra.mrb[84].mxu1 %v141_v3  ;;  %2687 = vmatprep.mubr.msk.f32.mxu0 %vm3135_vm0, %v3136_v1 }
  0xe7   :  { %2699 = vmatprep.mubr.msk.f32.mxu1 %vm3135_vm0, %v3136_v1 }
  0xe9   :  { %2688 = vmatmul.mubr.f32.gmra.mrb[86].mxu0 %v66_v4 }
  0xea   :  { %2700 = vmatmul.mubr.f32.gmra.mrb[86].mxu1 %v166_v5  ;;  %2690 = vmatprep.mubr.msk.f32.mxu0 %vm3135_vm0, %v3136_v1 }
  0xeb   :  { %2702 = vmatprep.mubr.msk.f32.mxu1 %vm3135_vm0, %v3136_v1 }
  0xed   :  { %2691 = vmatmul.mubr.f32.gmra.mrb[88].mxu0 %v91_v6 }
  0xee   :  { %2703 = vmatmul.mubr.f32.gmra.mrb[88].mxu1 %v191_v7  ;;  %2693 = vmatprep.mubr.msk.f32.mxu0 %vm3135_vm0, %v3136_v1 }
  0xf1   :  { %2694 = vmatmul.mubr.f32.gmra.mrb[90].mxu0 %v116_v8 }
  0xf8   :  { %v2025_v9 = vpop.f32.mrb[0].mxu0 }
  0xf9   :  { %v2078_v10 = vpop.f32.mrb[0].mxu1  ;;  %v2026_v11 = vpop.f32.mrb[1].mxu0 }
  0xfa   :  { %v2027_v12 = vadd.f32 %v2026_v11, %v2025_v9  ;;  %v2079_v13 = vpop.f32.mrb[1].mxu1 }
  0xfb   :  { %v2080_v14 = vadd.f32 %v2079_v13, %v2078_v10 }
  0xfc   :  { %v2028_v15 = vpop.f32.mrb[2].mxu0 }
  0xfd   :  { %v759_v16 = vadd.f32 %v2080_v14, %v2027_v12  ;;  %v2081_v17 = vpop.f32.mrb[2].mxu1  ;;  %v2029_v18 = vpop.f32.mrb[3].mxu0 }
  0xfe   :  { %v2030_v19 = vadd.f32 %v2029_v18, %v2028_v15  ;;  %v2082_v20 = vpop.f32.mrb[3].mxu1 }
  0xff   :  { %v2083_v21 = vadd.f32 %v2082_v20, %v2081_v17 }
 0x100   :  { %v2031_v22 = vpop.f32.mrb[4].mxu0 }
 0x101   :  { %v764_v23 = vadd.f32 %v2083_v21, %v2030_v19  ;;  %v2084_v24 = vpop.f32.mrb[4].mxu1  ;;  %v2032_v25 = vpop.f32.mrb[5].mxu0 }
 0x102   :  { %v2033_v26 = vadd.f32 %v2032_v25, %v2031_v22  ;;  %v2085_v27 = vpop.f32.mrb[5].mxu1 }
 0x103   :  { %v2086_v28 = vadd.f32 %v2085_v27, %v2084_v24 }
 0x104   :  { %v2034_v29 = vpop.f32.mrb[6].mxu0 }
 0x105   :  { %v769_v30 = vadd.f32 %v2086_v28, %v2033_v26  ;;  %v2087_v31 = vpop.f32.mrb[6].mxu1  ;;  %v2035_v32 = vpop.f32.mrb[7].mxu0 }
 0x106   :  { %v2036_v33 = vadd.f32 %v2035_v32, %v2034_v29  ;;  %v2088_v34 = vpop.f32.mrb[7].mxu1 }
 0x107   :  { %v2089_v35 = vadd.f32 %v2088_v34, %v2087_v31 }
 0x108   :  { %v2037_v36 = vpop.f32.mrb[8].mxu0 }
 0x109   :  { %v774_v37 = vadd.f32 %v2089_v35, %v2036_v33  ;;  %v2090_v38 = vpop.f32.mrb[8].mxu1  ;;  %v2038_v39 = vpop.f32.mrb[9].mxu0 }
 0x10a   :  { %v2039_v40 = vadd.f32 %v2038_v39, %v2037_v36  ;;  %v2091_v41 = vpop.f32.mrb[9].mxu1 }
 0x10b   :  { %v2092_v42 = vadd.f32 %v2091_v41, %v2090_v38 }
 0x10c   :  { %v2040_v43 = vpop.f32.mrb[10].mxu0 }
 0x10d   :  { %v779_v44 = vadd.f32 %v2092_v42, %v2039_v40  ;;  %v2093_v45 = vpop.f32.mrb[10].mxu1  ;;  %v2041_v46 = vpop.f32.mrb[11].mxu0 }
 0x10e   :  { %v2042_v47 = vadd.f32 %v2041_v46, %v2040_v43  ;;  %v2094_v48 = vpop.f32.mrb[11].mxu1 }
 0x10f   :  { %v2095_v49 = vadd.f32 %v2094_v48, %v2093_v45 }
 0x110   :  { %v2043_v50 = vpop.f32.mrb[12].mxu0 }
 0x111   :  { %v784_v51 = vadd.f32 %v2095_v49, %v2042_v47  ;;  %v2096_v52 = vpop.f32.mrb[12].mxu1  ;;  %v2044_v53 = vpop.f32.mrb[13].mxu0 }
 0x112   :  { %v2045_v54 = vadd.f32 %v2044_v53, %v2043_v50  ;;  %v2097_v55 = vpop.f32.mrb[13].mxu1 }
 0x113   :  { %v2098_v56 = vadd.f32 %v2097_v55, %v2096_v52 }
 0x115   :  { %v789_v57 = vadd.f32 %v2098_v56, %v2045_v54 }
 0x118   :  { %v2131_v58 = vpop.f32.mrb[14].mxu0 }
 0x119   :  { %v2132_v59 = vpop.f32.mrb[15].mxu0  ;;  %v2184_v60 = vpop.f32.mrb[14].mxu1 }
 0x11a   :  { %v2133_v61 = vadd.f32 %v2132_v59, %v2131_v58  ;;  %v2185_v62 = vpop.f32.mrb[15].mxu1 }
 0x11b   :  { %v2186_v63 = vadd.f32 %v2185_v62, %v2184_v60 }
 0x11c   :  { %v859_v0 = vadd.f32 %v2133_v61, %v759_v16  ;;  %v2134_v1 = vpop.f32.mrb[16].mxu0 }
 0x11d   :  { %v2135_v2 = vpop.f32.mrb[17].mxu0  ;;  %v2187_v3 = vpop.f32.mrb[16].mxu1 }
 0x11e   :  { %v959_v4 = vadd.f32 %v2186_v63, %v859_v0  ;;  %v2136_v5 = vadd.f32 %v2135_v2, %v2134_v1  ;;  %v2188_v6 = vpop.f32.mrb[17].mxu1 }
 0x11f   :  { %v2189_v7 = vadd.f32 %v2188_v6, %v2187_v3 }
 0x120   :  { %v864_v8 = vadd.f32 %v2136_v5, %v764_v23  ;;  %v2137_v9 = vpop.f32.mrb[18].mxu0 }
 0x121   :  { %v2138_v10 = vpop.f32.mrb[19].mxu0  ;;  %v2190_v11 = vpop.f32.mrb[18].mxu1 }
 0x122   :  { %v964_v12 = vadd.f32 %v2189_v7, %v864_v8  ;;  %v2139_v13 = vadd.f32 %v2138_v10, %v2137_v9  ;;  %v2191_v14 = vpop.f32.mrb[19].mxu1 }
 0x123   :  { %v2192_v15 = vadd.f32 %v2191_v14, %v2190_v11 }
 0x124   :  { %v869_v17 = vadd.f32 %v2139_v13, %v769_v30  ;;  %v2140_v18 = vpop.f32.mrb[20].mxu0 }
 0x125   :  { %v2141_v19 = vpop.f32.mrb[21].mxu0  ;;  %v2193_v20 = vpop.f32.mrb[20].mxu1 }
 0x126   :  { %v969_v16 = vadd.f32 %v2192_v15, %v869_v17  ;;  %v2142_v21 = vadd.f32 %v2141_v19, %v2140_v18  ;;  %v2194_v22 = vpop.f32.mrb[21].mxu1 }
 0x127   :  { %v2195_v24 = vadd.f32 %v2194_v22, %v2193_v20 }
 0x128   :  { %v874_v25 = vadd.f32 %v2142_v21, %v774_v37  ;;  %v2143_v26 = vpop.f32.mrb[22].mxu0 }
 0x129   :  { %v2144_v27 = vpop.f32.mrb[23].mxu0  ;;  %v2196_v28 = vpop.f32.mrb[22].mxu1 }
 0x12a   :  { %v974_v23 = vadd.f32 %v2195_v24, %v874_v25  ;;  %v2145_v29 = vadd.f32 %v2144_v27, %v2143_v26  ;;  %v2197_v31 = vpop.f32.mrb[23].mxu1 }
 0x12b   :  { %v2198_v32 = vadd.f32 %v2197_v31, %v2196_v28 }
 0x12c   :  { %v879_v33 = vadd.f32 %v2145_v29, %v779_v44  ;;  %v2146_v34 = vpop.f32.mrb[24].mxu0 }
 0x12d   :  { %v2147_v35 = vpop.f32.mrb[25].mxu0  ;;  %v2199_v36 = vpop.f32.mrb[24].mxu1 }
 0x12e   :  { %v979_v30 = vadd.f32 %v2198_v32, %v879_v33  ;;  %v2148_v38 = vadd.f32 %v2147_v35, %v2146_v34  ;;  %v2200_v39 = vpop.f32.mrb[25].mxu1 }
 0x12f   :  { %v2201_v40 = vadd.f32 %v2200_v39, %v2199_v36 }
 0x130   :  { %v884_v41 = vadd.f32 %v2148_v38, %v784_v51  ;;  %v2149_v42 = vpop.f32.mrb[26].mxu0 }
 0x131   :  { %v2150_v43 = vpop.f32.mrb[27].mxu0  ;;  %v2202_v45 = vpop.f32.mrb[26].mxu1 }
 0x132   :  { %v984_v37 = vadd.f32 %v2201_v40, %v884_v41  ;;  %v2151_v46 = vadd.f32 %v2150_v43, %v2149_v42  ;;  %v2203_v47 = vpop.f32.mrb[27].mxu1 }
 0x133   :  { %v2204_v48 = vadd.f32 %v2203_v47, %v2202_v45 }
 0x134   :  { %v889_v49 = vadd.f32 %v2151_v46, %v789_v57 }
 0x136   :  { %v989_v50 = vadd.f32 %v2204_v48, %v889_v49 }
 0x138   :  { %v2237_v52 = vpop.f32.mrb[28].mxu0 }
 0x139   :  { %v2238_v53 = vpop.f32.mrb[29].mxu0  ;;  %v2290_v44 = vpop.f32.mrb[28].mxu1 }
 0x13a   :  { %v2239_v54 = vadd.f32 %v2238_v53, %v2237_v52  ;;  %v2291_v55 = vpop.f32.mrb[29].mxu1 }
 0x13b   :  { %v2292_v56 = vadd.f32 %v2291_v55, %v2290_v44 }
 0x13c   :  { %v1059_v58 = vadd.f32 %v2239_v54, %v959_v4  ;;  %v2240_v59 = vpop.f32.mrb[30].mxu0 }
 0x13d   :  { %v2241_v60 = vpop.f32.mrb[31].mxu0  ;;  %v2293_v61 = vpop.f32.mrb[30].mxu1 }
 0x13e   :  { %v1159_v51 = vadd.f32 %v2292_v56, %v1059_v58  ;;  %v2242_v62 = vadd.f32 %v2241_v60, %v2240_v59  ;;  %v2294_v63 = vpop.f32.mrb[31].mxu1 }
 0x13f   :  { %v2295_v0 = vadd.f32 %v2294_v63, %v2293_v61 }
 0x140   :  { %v1064_v1 = vadd.f32 %v2242_v62, %v964_v12  ;;  %v2243_v2 = vpop.f32.mrb[32].mxu0 }
 0x141   :  { %v2244_v3 = vpop.f32.mrb[33].mxu0  ;;  %v2296_v5 = vpop.f32.mrb[32].mxu1 }
 0x142   :  { %v1164_v57 = vadd.f32 %v2295_v0, %v1064_v1  ;;  %v2245_v6 = vadd.f32 %v2244_v3, %v2243_v2  ;;  %v2297_v7 = vpop.f32.mrb[33].mxu1 }
 0x143   :  { %v2298_v8 = vadd.f32 %v2297_v7, %v2296_v5 }
 0x144   :  { %v1069_v9 = vadd.f32 %v2245_v6, %v969_v16  ;;  %v2246_v10 = vpop.f32.mrb[34].mxu0 }
 0x145   :  { %v2247_v11 = vpop.f32.mrb[35].mxu0  ;;  %v2299_v13 = vpop.f32.mrb[34].mxu1 }
 0x146   :  { %v1169_v4 = vadd.f32 %v2298_v8, %v1069_v9  ;;  %v2248_v14 = vadd.f32 %v2247_v11, %v2246_v10  ;;  %v2300_v15 = vpop.f32.mrb[35].mxu1 }
 0x147   :  { %v2301_v17 = vadd.f32 %v2300_v15, %v2299_v13 }
 0x148   :  { %v1074_v18 = vadd.f32 %v2248_v14, %v974_v23  ;;  %v2249_v19 = vpop.f32.mrb[36].mxu0 }
 0x149   :  { %v2250_v20 = vpop.f32.mrb[37].mxu0  ;;  %v2302_v21 = vpop.f32.mrb[36].mxu1 }
 0x14a   :  { %v1174_v12 = vadd.f32 %v2301_v17, %v1074_v18  ;;  %v2251_v22 = vadd.f32 %v2250_v20, %v2249_v19  ;;  %v2303_v24 = vpop.f32.mrb[37].mxu1 }
 0x14b   :  { %v2304_v25 = vadd.f32 %v2303_v24, %v2302_v21 }
 0x14c   :  { %v1079_v26 = vadd.f32 %v2251_v22, %v979_v30  ;;  %v2252_v27 = vpop.f32.mrb[38].mxu0 }
 0x14d   :  { %v2253_v28 = vpop.f32.mrb[39].mxu0  ;;  %v2305_v29 = vpop.f32.mrb[38].mxu1 }
 0x14e   :  { %v1179_v16 = vadd.f32 %v2304_v25, %v1079_v26  ;;  %v2254_v31 = vadd.f32 %v2253_v28, %v2252_v27  ;;  %v2306_v32 = vpop.f32.mrb[39].mxu1 }
 0x14f   :  { %v2307_v33 = vadd.f32 %v2306_v32, %v2305_v29 }
 0x150   :  { %v1084_v34 = vadd.f32 %v2254_v31, %v984_v37  ;;  %v2255_v35 = vpop.f32.mrb[40].mxu0 }
 0x151   :  { %v2256_v36 = vpop.f32.mrb[41].mxu0  ;;  %v2308_v38 = vpop.f32.mrb[40].mxu1 }
 0x152   :  { %v1184_v23 = vadd.f32 %v2307_v33, %v1084_v34  ;;  %v2257_v39 = vadd.f32 %v2256_v36, %v2255_v35  ;;  %v2309_v40 = vpop.f32.mrb[41].mxu1 }
 0x153   :  { %v2310_v41 = vadd.f32 %v2309_v40, %v2308_v38 }
 0x154   :  { %v1089_v42 = vadd.f32 %v2257_v39, %v989_v50 }
 0x156   :  { %v1189_v43 = vadd.f32 %v2310_v41, %v1089_v42 }
 0x158   :  { %v2343_v45 = vpop.f32.mrb[42].mxu0 }
 0x159   :  { %v2344_v46 = vpop.f32.mrb[43].mxu0  ;;  %v2396_v30 = vpop.f32.mrb[42].mxu1 }
 0x15a   :  { %v2345_v47 = vadd.f32 %v2344_v46, %v2343_v45  ;;  %v2397_v48 = vpop.f32.mrb[43].mxu1 }
 0x15b   :  { %v2398_v49 = vadd.f32 %v2397_v48, %v2396_v30 }
 0x15c   :  { %v1259_v52 = vadd.f32 %v2345_v47, %v1159_v51  ;;  %v2346_v53 = vpop.f32.mrb[44].mxu0 }
 0x15d   :  { %v2347_v44 = vpop.f32.mrb[45].mxu0  ;;  %v2399_v54 = vpop.f32.mrb[44].mxu1 }
 0x15e   :  { %v1359_v37 = vadd.f32 %v2398_v49, %v1259_v52  ;;  %v2348_v55 = vadd.f32 %v2347_v44, %v2346_v53  ;;  %v2400_v56 = vpop.f32.mrb[45].mxu1 }
 0x15f   :  { %v2401_v58 = vadd.f32 %v2400_v56, %v2399_v54 }
 0x160   :  { %v1264_v59 = vadd.f32 %v2348_v55, %v1164_v57  ;;  %v2349_v60 = vpop.f32.mrb[46].mxu0 }
 0x161   :  { %v2350_v61 = vpop.f32.mrb[47].mxu0  ;;  %v2402_v62 = vpop.f32.mrb[46].mxu1 }
 0x162   :  { %v1364_v50 = vadd.f32 %v2401_v58, %v1264_v59  ;;  %v2351_v63 = vadd.f32 %v2350_v61, %v2349_v60  ;;  %v2403_v0 = vpop.f32.mrb[47].mxu1 }
 0x163   :  { %v2404_v1 = vadd.f32 %v2403_v0, %v2402_v62 }
 0x164   :  { %v1269_v2 = vadd.f32 %v2351_v63, %v1169_v4  ;;  %v2352_v3 = vpop.f32.mrb[48].mxu0 }
 0x165   :  { %v2353_v5 = vpop.f32.mrb[49].mxu0  ;;  %v2405_v6 = vpop.f32.mrb[48].mxu1 }
 0x166   :  { %v1369_v51 = vadd.f32 %v2404_v1, %v1269_v2  ;;  %v2354_v7 = vadd.f32 %v2353_v5, %v2352_v3  ;;  %v2406_v8 = vpop.f32.mrb[49].mxu1 }
 0x167   :  { %v2407_v9 = vadd.f32 %v2406_v8, %v2405_v6 }
 0x168   :  { %v1274_v10 = vadd.f32 %v2354_v7, %v1174_v12  ;;  %v2355_v11 = vpop.f32.mrb[50].mxu0 }
 0x169   :  { %v2356_v13 = vpop.f32.mrb[51].mxu0  ;;  %v2408_v14 = vpop.f32.mrb[50].mxu1 }
 0x16a   :  { %v1374_v57 = vadd.f32 %v2407_v9, %v1274_v10  ;;  %v2357_v15 = vadd.f32 %v2356_v13, %v2355_v11  ;;  %v2409_v17 = vpop.f32.mrb[51].mxu1 }
 0x16b   :  { %v2410_v18 = vadd.f32 %v2409_v17, %v2408_v14 }
 0x16c   :  { %v1279_v19 = vadd.f32 %v2357_v15, %v1179_v16  ;;  %v2358_v20 = vpop.f32.mrb[52].mxu0 }
 0x16d   :  { %v2359_v21 = vpop.f32.mrb[53].mxu0  ;;  %v2411_v22 = vpop.f32.mrb[52].mxu1 }
 0x16e   :  { %v1379_v4 = vadd.f32 %v2410_v18, %v1279_v19  ;;  %v2360_v24 = vadd.f32 %v2359_v21, %v2358_v20  ;;  %v2412_v25 = vpop.f32.mrb[53].mxu1 }
 0x16f   :  { %v2413_v26 = vadd.f32 %v2412_v25, %v2411_v22 }
 0x170   :  { %v1284_v27 = vadd.f32 %v2360_v24, %v1184_v23  ;;  %v2361_v28 = vpop.f32.mrb[54].mxu0 }
 0x171   :  { %v2362_v29 = vpop.f32.mrb[55].mxu0  ;;  %v2414_v31 = vpop.f32.mrb[54].mxu1 }
 0x172   :  { %v1384_v12 = vadd.f32 %v2413_v26, %v1284_v27  ;;  %v2363_v32 = vadd.f32 %v2362_v29, %v2361_v28  ;;  %v2415_v33 = vpop.f32.mrb[55].mxu1 }
 0x173   :  { %v2416_v34 = vadd.f32 %v2415_v33, %v2414_v31 }
 0x174   :  { %v1289_v35 = vadd.f32 %v2363_v32, %v1189_v43 }
 0x176   :  { %v1389_v36 = vadd.f32 %v2416_v34, %v1289_v35 }
 0x178   :  { %v2449_v38 = vpop.f32.mrb[56].mxu0 }
 0x179   :  { %v2450_v39 = vpop.f32.mrb[57].mxu0  ;;  %v2502_v16 = vpop.f32.mrb[56].mxu1 }
 0x17a   :  { %v2451_v40 = vadd.f32 %v2450_v39, %v2449_v38  ;;  %v2503_v41 = vpop.f32.mrb[57].mxu1 }
 0x17b   :  { %v2504_v42 = vadd.f32 %v2503_v41, %v2502_v16 }
 0x17c   :  { %v1459_v45 = vadd.f32 %v2451_v40, %v1359_v37  ;;  %v2452_v46 = vpop.f32.mrb[58].mxu0 }
 0x17d   :  { %v2453_v30 = vpop.f32.mrb[59].mxu0  ;;  %v2505_v47 = vpop.f32.mrb[58].mxu1 }
 0x17e   :  { %v1559_v23 = vadd.f32 %v2504_v42, %v1459_v45  ;;  %v2454_v48 = vadd.f32 %v2453_v30, %v2452_v46  ;;  %v2506_v49 = vpop.f32.mrb[59].mxu1 }
 0x17f   :  { %v2507_v52 = vadd.f32 %v2506_v49, %v2505_v47 }
 0x180   :  { %v1464_v53 = vadd.f32 %v2454_v48, %v1364_v50  ;;  %v2455_v44 = vpop.f32.mrb[60].mxu0 }
 0x181   :  { %v2456_v54 = vpop.f32.mrb[61].mxu0  ;;  %v2508_v55 = vpop.f32.mrb[60].mxu1 }
 0x182   :  { %v1564_v43 = vadd.f32 %v2507_v52, %v1464_v53  ;;  %v2457_v56 = vadd.f32 %v2456_v54, %v2455_v44  ;;  %v2509_v58 = vpop.f32.mrb[61].mxu1 }
 0x183   :  { %v2510_v59 = vadd.f32 %v2509_v58, %v2508_v55 }
 0x184   :  { %v1469_v60 = vadd.f32 %v2457_v56, %v1369_v51  ;;  %v2458_v61 = vpop.f32.mrb[62].mxu0 }
 0x185   :  { %v2459_v62 = vpop.f32.mrb[63].mxu0  ;;  %v2511_v63 = vpop.f32.mrb[62].mxu1 }
 0x186   :  { %v1569_v37 = vadd.f32 %v2510_v59, %v1469_v60  ;;  %v2460_v0 = vadd.f32 %v2459_v62, %v2458_v61  ;;  %v2512_v1 = vpop.f32.mrb[63].mxu1 }
 0x187   :  { %v2513_v2 = vadd.f32 %v2512_v1, %v2511_v63 }
 0x188   :  { %v1474_v3 = vadd.f32 %v2460_v0, %v1374_v57  ;;  %v2461_v5 = vpop.f32.mrb[64].mxu0 }
 0x189   :  { %v2462_v6 = vpop.f32.mrb[65].mxu0  ;;  %v2514_v7 = vpop.f32.mrb[64].mxu1 }
 0x18a   :  { %v1574_v50 = vadd.f32 %v2513_v2, %v1474_v3  ;;  %v2463_v8 = vadd.f32 %v2462_v6, %v2461_v5  ;;  %v2515_v9 = vpop.f32.mrb[65].mxu1 }
 0x18b   :  { %v2516_v10 = vadd.f32 %v2515_v9, %v2514_v7 }
 0x18c   :  { %v1479_v11 = vadd.f32 %v2463_v8, %v1379_v4  ;;  %v2464_v13 = vpop.f32.mrb[66].mxu0 }
 0x18d   :  { %v2465_v14 = vpop.f32.mrb[67].mxu0  ;;  %v2517_v15 = vpop.f32.mrb[66].mxu1 }
 0x18e   :  { %v1579_v51 = vadd.f32 %v2516_v10, %v1479_v11  ;;  %v2466_v17 = vadd.f32 %v2465_v14, %v2464_v13  ;;  %v2518_v18 = vpop.f32.mrb[67].mxu1 }
 0x18f   :  { %v2519_v19 = vadd.f32 %v2518_v18, %v2517_v15 }
 0x190   :  { %v1484_v20 = vadd.f32 %v2466_v17, %v1384_v12  ;;  %v2467_v21 = vpop.f32.mrb[68].mxu0 }
 0x191   :  { %v2468_v22 = vpop.f32.mrb[69].mxu0  ;;  %v2520_v24 = vpop.f32.mrb[68].mxu1 }
 0x192   :  { %v1584_v57 = vadd.f32 %v2519_v19, %v1484_v20  ;;  %v2469_v25 = vadd.f32 %v2468_v22, %v2467_v21  ;;  %v2521_v26 = vpop.f32.mrb[69].mxu1 }
 0x193   :  { %v2522_v27 = vadd.f32 %v2521_v26, %v2520_v24 }
 0x194   :  { %v1489_v28 = vadd.f32 %v2469_v25, %v1389_v36 }
 0x196   :  { %v1589_v29 = vadd.f32 %v2522_v27, %v1489_v28 }
 0x198   :  { %v2555_v31 = vpop.f32.mrb[70].mxu0 }
 0x199   :  { %v2556_v32 = vpop.f32.mrb[71].mxu0  ;;  %v2608_v4 = vpop.f32.mrb[70].mxu1 }
 0x19a   :  { %v2557_v33 = vadd.f32 %v2556_v32, %v2555_v31  ;;  %v2609_v34 = vpop.f32.mrb[71].mxu1 }
 0x19b   :  { %v2610_v35 = vadd.f32 %v2609_v34, %v2608_v4 }
 0x19c   :  { %v1659_v38 = vadd.f32 %v2557_v33, %v1559_v23  ;;  %v2558_v39 = vpop.f32.mrb[72].mxu0 }
 0x19d   :  { %v2559_v16 = vpop.f32.mrb[73].mxu0  ;;  %v2611_v40 = vpop.f32.mrb[72].mxu1 }
 0x19e   :  { %v2560_v12 = vadd.f32 %v2559_v16, %v2558_v39  ;;  %v2612_v41 = vpop.f32.mrb[73].mxu1  ;;  %v1759_v42 = vadd.f32 %v2610_v35, %v1659_v38 }
 0x19f   :  { %v2613_v45 = vadd.f32 %v2612_v41, %v2611_v40 }
 0x1a0   :  { %v1664_v46 = vadd.f32 %v2560_v12, %v1564_v43  ;;  %v2561_v30 = vpop.f32.mrb[74].mxu0 }
 0x1a1   :  { %v2562_v47 = vpop.f32.mrb[75].mxu0  ;;  %v2614_v48 = vpop.f32.mrb[74].mxu1 }
 0x1a2   :  { %v2563_v36 = vadd.f32 %v2562_v47, %v2561_v30  ;;  %v2615_v49 = vpop.f32.mrb[75].mxu1  ;;  %v1764_v52 = vadd.f32 %v2613_v45, %v1664_v46 }
 0x1a3   :  { %v2616_v53 = vadd.f32 %v2615_v49, %v2614_v48 }
 0x1a4   :  { %v1669_v44 = vadd.f32 %v2563_v36, %v1569_v37  ;;  %v2564_v54 = vpop.f32.mrb[76].mxu0 }
 0x1a5   :  { %v2565_v55 = vpop.f32.mrb[77].mxu0  ;;  %v2617_v56 = vpop.f32.mrb[76].mxu1 }
 0x1a6   :  { %v2566_v23 = vadd.f32 %v2565_v55, %v2564_v54  ;;  %v2618_v58 = vpop.f32.mrb[77].mxu1  ;;  %v1769_v59 = vadd.f32 %v2616_v53, %v1669_v44 }
 0x1a7   :  { %v2619_v60 = vadd.f32 %v2618_v58, %v2617_v56 }
 0x1a8   :  { %v1674_v61 = vadd.f32 %v2566_v23, %v1574_v50  ;;  %v2567_v62 = vpop.f32.mrb[78].mxu0 }
 0x1a9   :  { %v2568_v63 = vpop.f32.mrb[79].mxu0  ;;  %v2620_v0 = vpop.f32.mrb[78].mxu1 }
 0x1aa   :  { %v2569_v43 = vadd.f32 %v2568_v63, %v2567_v62  ;;  %v2621_v1 = vpop.f32.mrb[79].mxu1  ;;  %v1774_v2 = vadd.f32 %v2619_v60, %v1674_v61 }
 0x1ab   :  { %v2622_v3 = vadd.f32 %v2621_v1, %v2620_v0 }
 0x1ac   :  { %v1679_v5 = vadd.f32 %v2569_v43, %v1579_v51  ;;  %v2570_v6 = vpop.f32.mrb[80].mxu0 }
 0x1ad   :  { %v2571_v7 = vpop.f32.mrb[81].mxu0  ;;  %v2623_v8 = vpop.f32.mrb[80].mxu1 }
 0x1ae   :  { %v2572_v37 = vadd.f32 %v2571_v7, %v2570_v6  ;;  %v2624_v9 = vpop.f32.mrb[81].mxu1  ;;  %v1779_v10 = vadd.f32 %v2622_v3, %v1679_v5 }
 0x1af   :  { %v2625_v11 = vadd.f32 %v2624_v9, %v2623_v8 }
 0x1b0   :  { %v1684_v13 = vadd.f32 %v2572_v37, %v1584_v57  ;;  %v2573_v14 = vpop.f32.mrb[82].mxu0 }
 0x1b1   :  { %v2574_v15 = vpop.f32.mrb[83].mxu0  ;;  %v2626_v17 = vpop.f32.mrb[82].mxu1 }
 0x1b2   :  { %v2575_v50 = vadd.f32 %v2574_v15, %v2573_v14  ;;  %v2627_v18 = vpop.f32.mrb[83].mxu1  ;;  %v1784_v19 = vadd.f32 %v2625_v11, %v1684_v13 }
 0x1b3   :  { %v2628_v20 = vadd.f32 %v2627_v18, %v2626_v17 }
 0x1b4   :  { %v1689_v21 = vadd.f32 %v2575_v50, %v1589_v29 }
 0x1b6   :  { %v1789_v22 = vadd.f32 %v2628_v20, %v1689_v21 }
 0x1b8   :  { %v1858_v24 = vpop.f32.mrb[84].mxu0 }
 0x1b9   :  { %v1859_v25 = vadd.f32 %v1858_v24, %v1759_v42  ;;  %v1878_v51 = vpop.f32.mrb[84].mxu1  ;;  %v2686_v26 = vpop.f32.mrb[85].mxu0 }
 0x1ba   :  { %v1879_v27 = vadd.f32 %v1878_v51, %v1779_v10  ;;  %v2698_v28 = vpop.f32.mrb[85].mxu1 }
 0x1bc   :  { %v1863_v31 = vpop.f32.mrb[86].mxu0 }
 0x1bd   :  { %v1864_v32 = vadd.f32 %v1863_v31, %v1764_v52  ;;  %v1883_v4 = vpop.f32.mrb[86].mxu1  ;;  %v2689_v33 = vpop.f32.mrb[87].mxu0 }
 0x1be   :  { %v1884_v57 = vadd.f32 %v1883_v4, %v1784_v19  ;;  %v2701_v34 = vpop.f32.mrb[87].mxu1  ;;  %v1992_v33 = vld [vmem:[%s4942_s3] ss:$0 sm:$0xff] }
 0x1bf   :  { %v1892_v35 = vadd.f32 %v1864_v32, %v1859_v25 }
 0x1c0   :  { %v1868_v38 = vpop.f32.mrb[88].mxu0 }
 0x1c1   :  { %v1869_v39 = vadd.f32 %v1868_v38, %v1769_v59  ;;  %v1888_v16 = vpop.f32.mrb[88].mxu1  ;;  %v2692_v40 = vpop.f32.mrb[89].mxu0 }
 0x1c2   :  { %v1889_v12 = vadd.f32 %v1888_v16, %v1789_v22  ;;  %v2704_v29 = vpop.f32.mrb[89].mxu1 }
 0x1c3   :  { %v1893_v41 = vadd.f32 %v1892_v35, %v1869_v39 }
 0x1c4   :  { %v1873_v45 = vpop.f32.mrb[90].mxu0  ;;  %v1898_v36 = vsel %vm1897_vm1, %v1889_v12, 0.0 }
 0x1c5   :  { %v1874_v42 = vadd.f32 %v1873_v45, %v1774_v2  ;;  %v2695_v46 = vpop.f32.mrb[91].mxu0 }
 0x1c7   :  { %v1894_v30 = vadd.f32 %v1893_v41, %v1874_v42 }
 0x1c9   :  { %v1895_v47 = vadd.f32 %v1894_v30, %v1879_v27 }
 0x1cb   :  { %v1896_v48 = vadd.f32 %v1895_v47, %v1884_v57 }
 0x1cd   :  { %v1899_v49 = vadd.f32 %v1898_v36, %v1896_v48 }
 0x1cf   :  { %v1900_v52 = vrot.slane %v1899_v49, 4 }
 0x1d1   :  { %v1901_v53 = vadd.f32 %v1900_v52, %v1899_v49 }
 0x1d3   :  { %v1902_v44 = vrot.slane %v1901_v53, 2 }
 0x1d5   :  { %v1903_v54 = vadd.f32 %v1902_v44, %v1901_v53 }
 0x1d7   :  { %v1904_v55 = vrot.slane %v1903_v54, 1 }
 0x1d9   :  { %v1905_v56 = vadd.f32 %v1904_v55, %v1903_v54 }
 0x1db   :  { %v1907_v23 = vmul.f32 0.02, %v1905_v56 }
 0x1dd   :  { %v1908_v58 = vsub.f32 %v1859_v25, %v1907_v23  ;;  %v1909_v59 = vsub.f32 %v1864_v32, %v1907_v23  ;;  %v1910_v60 = vsub.f32 %v1869_v39, %v1907_v23  ;;  %v1911_v61 = vsub.f32 %v1874_v42, %v1907_v23  ;;  %v1991_v25 = vld [vmem:[%s4941_s2] ss:$0 sm:$0xff] }
 0x1de   :  { %v1912_v62 = vsub.f32 %v1879_v27, %v1907_v23  ;;  %v1913_v63 = vsub.f32 %v1884_v57, %v1907_v23  ;;  %v1914_v0 = vsub.f32 %v1889_v12, %v1907_v23 }
 0x1df   :  { %v1915_v43 = vmul.f32 %v1908_v58, %v1908_v58  ;;  %v1916_v1 = vmul.f32 %v1909_v59, %v1909_v59  ;;  %v1917_v2 = vmul.f32 %v1910_v60, %v1910_v60  ;;  %v1918_v5 = vmul.f32 %v1911_v61, %v1911_v61 }
 0x1e0   :  { %v1919_v7 = vmul.f32 %v1912_v62, %v1912_v62  ;;  %v1921_v37 = vmul.f32 %v1914_v0, %v1914_v0  ;;  %v1920_v9 = vmul.f32 %v1913_v63, %v1913_v63 }
 0x1e1   :  { %v1922_v3 = vadd.f32 %v1916_v1, %v1915_v43 }
 0x1e2   :  { %v1927_v13 = vsel %vm1897_vm1, %v1921_v37, 0.0 }
 0x1e3   :  { %v1923_v6 = vadd.f32 %v1922_v3, %v1917_v2 }
 0x1e5   :  { %v1924_v8 = vadd.f32 %v1923_v6, %v1918_v5 }
 0x1e7   :  { %v1925_v10 = vadd.f32 %v1924_v8, %v1919_v7 }
 0x1e9   :  { %v1926_v11 = vadd.f32 %v1925_v10, %v1920_v9 }
 0x1eb   :  { %v1928_v14 = vadd.f32 %v1927_v13, %v1926_v11 }
 0x1ed   :  { %v1929_v15 = vrot.slane %v1928_v14, 4 }
 0x1ef   :  { %v1930_v17 = vadd.f32 %v1929_v15, %v1928_v14 }
 0x1f1   :  { %v1931_v50 = vrot.slane %v1930_v17, 2 }
 0x1f3   :  { %v1932_v18 = vadd.f32 %v1931_v50, %v1930_v17 }
 0x1f5   :  { %v1933_v19 = vrot.slane %v1932_v18, 1 }
 0x1f7   :  { %v1934_v20 = vadd.f32 %v1933_v19, %v1932_v18 }
 0x1f9   :  { %v1935_v21 = vmul.f32 0.02, %v1934_v20 }
 0x1fb   :  { %v1936_v22 = vadd.f32 1e-05, %v1935_v21 }
 0x1fd   :  { %3132 = vrsqrt.f32 %v1936_v22 }
 0x207   :  { %v3133_v24 = vpop.eup %3132 }
 0x208   :  { %v1938_v51 = vmul.f32 %v3133_v24, %v1908_v58  ;;  %v1939_v26 = vmul.f32 %v3133_v24, %v1909_v59  ;;  %v1940_v27 = vmul.f32 %v3133_v24, %v1910_v60  ;;  %v1941_v28 = vmul.f32 %v3133_v24, %v1911_v61 }
 0x209   :  { %v1942_v31 = vmul.f32 %v3133_v24, %v1912_v62  ;;  %v1943_v32 = vmul.f32 %v3133_v24, %v1913_v63  ;;  %v1944_v4 = vmul.f32 %v3133_v24, %v1914_v0 }
 0x20a   :  { %v1952_v57 = vmul.f32 %v1991_v25, %v1938_v51  ;;  %v1953_v34 = vmul.f32 %v1991_v25, %v1939_v26  ;;  %v1954_v35 = vmul.f32 %v1991_v25, %v1940_v27  ;;  %v1955_v38 = vmul.f32 %v1991_v25, %v1941_v28 }
 0x20b   :  { %v1956_v39 = vmul.f32 %v1991_v25, %v1942_v31  ;;  %v1957_v16 = vmul.f32 %v1991_v25, %v1943_v32  ;;  %v1958_v40 = vmul.f32 %v1991_v25, %v1944_v4 }
 0x20c   :  { %v1966_v12 = vadd.f32 %v1992_v33, %v1952_v57  ;;  %v1967_v29 = vadd.f32 %v1992_v33, %v1953_v34  ;;  %v1968_v41 = vadd.f32 %v1992_v33, %v1954_v35  ;;  %v1969_v45 = vadd.f32 %v1992_v33, %v1955_v38 }
 0x20d   :  { %v1970_v42 = vadd.f32 %v1992_v33, %v1956_v39  ;;  %v1971_v46 = vadd.f32 %v1992_v33, %v1957_v16  ;;  %v1972_v30 = vadd.f32 %v1992_v33, %v1958_v40 }
 0x20e   :  { %v1973_v47 = vmax.f32 %v1966_v12, 0.0  ;;  %v1974_v48 = vmax.f32 %v1967_v29, 0.0  ;;  %v1975_v36 = vmax.f32 %v1968_v41, 0.0  ;;  %v1976_v49 = vmax.f32 %v1969_v45, 0.0 }
 0x20f   :  { %v1977_v52 = vmax.f32 %v1970_v42, 0.0  ;;  %v1978_v53 = vmax.f32 %v1971_v46, 0.0  ;;  %v1979_v44 = vmax.f32 %v1972_v30, 0.0 }
 0x210   :  { %1980 = vst [vmem:[%s4943_s4] sm:$0xff] %v1973_v47  ;;  %1981 = vst [vmem:[%s4943_s4 + $0x8] sm:$0xff] %v1974_v48 }
 0x211   :  { %1982 = vst [vmem:[%s4943_s4 + $0x10] sm:$0xff] %v1975_v36  ;;  %1983 = vst [vmem:[%s4943_s4 + $0x18] sm:$0xff] %v1976_v49 }
 0x212   :  { %1984 = vst [vmem:[%s4943_s4 + $0x20] sm:$0xff] %v1977_v52  ;;  %1985 = vst [vmem:[%s4943_s4 + $0x28] sm:$0xff] %v1978_v53 }
 0x213   :  { %1986 = vst [vmem:[%s4943_s4 + $0x30] sm:$0x3] %v1979_v44 }

// kernel: dqn_forward.5
= control target key start
LH: loop header
LB: loop body
LE: loop exit
PB: predicated region body
PF: predicated region fallthrough
CT: control target
= control target key end

     0   :  { %v2627_v47 = vmov 1983009808   ;;  %v442_v49 = vlaneseq  ;;  %s4037_s0 = inlined_call_operand.vmem [shape: f32[2,3200], index: 0, kind: input, shape index: {}]   ;;  %s4038_s1 = inlined_call_operand.vmem [shape: f32[3200,128], index: 1, kind: input, shape index: {}]   ;;  %s4039_s2 = inlined_call_operand.vmem [shape: f32[1,128], index: 2, kind: input, shape index: {}]   ;;  %s4040_s3 = inlined_call_operand.vmem [shape: f32[1,128], index: 3, kind: input, shape index: {}]   ;;  %s4041_s4 = inlined_call_operand.vmem [shape: f32[128,128], index: 4, kind: input, shape index: {}]   ;;  %s4042_s5 = inlined_call_operand.vmem [shape: f32[1,128], index: 5, kind: input, shape index: {}]   ;;  %s4043_s6 = inlined_call_operand.hbm [shape: f32[2,128], index: 6, kind: output, shape index: {}]  }
   0x1   :  { %v47_v0 = vld [vmem:[%s4038_s1 + $0x80] sm:$0xff]  ;;  %v48_v1 = vld [vmem:[%s4038_s1 + $0x88] sm:$0xff]  ;;  %v49_v11 = vld [vmem:[%s4038_s1 + $0x90] sm:$0xff]  ;;  %v440_v48 = vunpack.c.l.s4 %v2627_v47 }
   0x2   :  { %v79_v2 = vld [vmem:[%s4038_s1 + $0x180] sm:$0xff]  ;;  %v2158_v3 = vpack.c.bf16 %v48_v1, %v47_v0  ;;  %v80_v4 = vld [vmem:[%s4038_s1 + $0x188] sm:$0xff]  ;;  %v50_v13 = vld [vmem:[%s4038_s1 + $0x98] sm:$0xff]  ;;  %v443_v0 = vshrl.u32 %v442_v49, 7 }
   0x3   :  { %v31_v5 = vld [vmem:[%s4038_s1] sm:$0xff]  ;;  %v32_v6 = vld [vmem:[%s4038_s1 + $0x8] sm:$0xff]  ;;  %v2190_v7 = vpack.c.bf16 %v80_v4, %v79_v2  ;;  %v81_v14 = vld [vmem:[%s4038_s1 + $0x190] sm:$0xff]  ;;  %v2162_v16 = vpack.c.bf16 %v50_v13, %v49_v11  ;;  %v441_v63 = vunpack.c.0.s8 %v440_v48 }
   0x4   :  { %v2160_v8 = vpack.c.bf16 %v32_v6, %v31_v5  ;;  %v63_v9 = vld [vmem:[%s4038_s1 + $0x100] sm:$0xff]  ;;  %v64_v10 = vld [vmem:[%s4038_s1 + $0x108] sm:$0xff]  ;;  %2159 = vmatprep.subr.bf16.mxu0 %v2158_v3  ;;  %v82_v15 = vld [vmem:[%s4038_s1 + $0x198] sm:$0xff] }
   0x5   :  { %v2192_v12 = vpack.c.bf16 %v64_v10, %v63_v9  ;;  %2191 = vmatprep.subr.bf16.mxu1 %v2190_v7  ;;  %v2194_v17 = vpack.c.bf16 %v82_v15, %v81_v14  ;;  %v33_v18 = vld [vmem:[%s4038_s1 + $0x10] sm:$0xff]  ;;  %v34_v19 = vld [vmem:[%s4038_s1 + $0x18] sm:$0xff]  ;;  %v51_v23 = vld [vmem:[%s4038_s1 + $0xa0] sm:$0xff]  ;;  %v2817_v13 = vsub.s32 %v441_v63, %v443_v0 }
   0x6   :  { %2161 = vmatpush3.bf16.msra.mxu0 %v2160_v8  ;;  %v65_v20 = vld [vmem:[%s4038_s1 + $0x110] sm:$0xff]  ;;  %v2164_v21 = vpack.c.bf16 %v34_v19, %v33_v18  ;;  %v66_v22 = vld [vmem:[%s4038_s1 + $0x118] sm:$0xff]  ;;  %v52_v24 = vld [vmem:[%s4038_s1 + $0xa8] sm:$0xff] }
   0x7   :  { %2193 = vmatpush3.bf16.msra.mxu1 %v2192_v12  ;;  %2163 = vmatprep.subr.bf16.mxu0 %v2162_v16  ;;  %v2196_v25 = vpack.c.bf16 %v66_v22, %v65_v20  ;;  %v2166_v26 = vpack.c.bf16 %v52_v24, %v51_v23  ;;  %v83_v27 = vld [vmem:[%s4038_s1 + $0x1a0] sm:$0xff]  ;;  %v84_v28 = vld [vmem:[%s4038_s1 + $0x1a8] sm:$0xff]  ;;  %v53_v35 = vld [vmem:[%s4038_s1 + $0xb0] sm:$0xff] }
   0x8   :  { %2195 = vmatprep.subr.bf16.mxu1 %v2194_v17  ;;  %v35_v29 = vld [vmem:[%s4038_s1 + $0x20] sm:$0xff]  ;;  %v2198_v30 = vpack.c.bf16 %v84_v28, %v83_v27  ;;  %v36_v31 = vld [vmem:[%s4038_s1 + $0x28] sm:$0xff]  ;;  %v54_v36 = vld [vmem:[%s4038_s1 + $0xb8] sm:$0xff] }
   0x9   :  { %v67_v32 = vld [vmem:[%s4038_s1 + $0x120] sm:$0xff]  ;;  %v68_v33 = vld [vmem:[%s4038_s1 + $0x128] sm:$0xff]  ;;  %v2168_v34 = vpack.c.bf16 %v36_v31, %v35_v29  ;;  %v85_v37 = vld [vmem:[%s4038_s1 + $0x1b0] sm:$0xff]  ;;  %v2170_v39 = vpack.c.bf16 %v54_v36, %v53_v35 }
   0xa   :  { %2165 = vmatpush3.bf16.msra.mxu0 %v2164_v21  ;;  %v2200_v38 = vpack.c.bf16 %v68_v33, %v67_v32  ;;  %v86_v40 = vld [vmem:[%s4038_s1 + $0x1b8] sm:$0xff]  ;;  %v37_v41 = vld [vmem:[%s4038_s1 + $0x30] sm:$0xff]  ;;  %v55_v46 = vld [vmem:[%s4038_s1 + $0xc0] sm:$0xff] }
   0xb   :  { %2197 = vmatpush3.bf16.msra.mxu1 %v2196_v25  ;;  %2167 = vmatprep.subr.bf16.mxu0 %v2166_v26  ;;  %v38_v42 = vld [vmem:[%s4038_s1 + $0x38] sm:$0xff]  ;;  %v2202_v43 = vpack.c.bf16 %v86_v40, %v85_v37  ;;  %v69_v44 = vld [vmem:[%s4038_s1 + $0x130] sm:$0xff]  ;;  %v56_v50 = vld [vmem:[%s4038_s1 + $0xc8] sm:$0xff] }
   0xc   :  { %2199 = vmatprep.subr.bf16.mxu1 %v2198_v30  ;;  %v70_v45 = vld [vmem:[%s4038_s1 + $0x138] sm:$0xff]  ;;  %v87_v51 = vld [vmem:[%s4038_s1 + $0x1c0] sm:$0xff]  ;;  %v88_v52 = vld [vmem:[%s4038_s1 + $0x1c8] sm:$0xff]  ;;  %v2172_v53 = vpack.c.bf16 %v38_v42, %v37_v41  ;;  %v2174_v55 = vpack.c.bf16 %v56_v50, %v55_v46 }
   0xd   :  { %v2204_v54 = vpack.c.bf16 %v70_v45, %v69_v44  ;;  %v39_v56 = vld [vmem:[%s4038_s1 + $0x40] sm:$0xff]  ;;  %v40_v57 = vld [vmem:[%s4038_s1 + $0x48] sm:$0xff]  ;;  %v2206_v59 = vpack.c.bf16 %v88_v52, %v87_v51  ;;  %v57_v61 = vld [vmem:[%s4038_s1 + $0xd0] sm:$0xff] }
   0xe   :  { %2169 = vmatpush3.bf16.msra.mxu0 %v2168_v34  ;;  %v71_v58 = vld [vmem:[%s4038_s1 + $0x140] sm:$0xff]  ;;  %v72_v60 = vld [vmem:[%s4038_s1 + $0x148] sm:$0xff]  ;;  %v58_v62 = vld [vmem:[%s4038_s1 + $0xd8] sm:$0xff]  ;;  %v2176_v3 = vpack.c.bf16 %v40_v57, %v39_v56 }
   0xf   :  { %2201 = vmatpush3.bf16.msra.mxu1 %v2200_v38  ;;  %2171 = vmatprep.subr.bf16.mxu0 %v2170_v39  ;;  %v89_v1 = vld [vmem:[%s4038_s1 + $0x1d0] sm:$0xff]  ;;  %v90_v2 = vld [vmem:[%s4038_s1 + $0x1d8] sm:$0xff]  ;;  %v2208_v4 = vpack.c.bf16 %v72_v60, %v71_v58  ;;  %v2178_v5 = vpack.c.bf16 %v58_v62, %v57_v61  ;;  %v59_v11 = vld [vmem:[%s4038_s1 + $0xe0] sm:$0xff] }
  0x10   :  { %2203 = vmatprep.subr.bf16.mxu1 %v2202_v43  ;;  %v41_v6 = vld [vmem:[%s4038_s1 + $0x50] sm:$0xff]  ;;  %v42_v7 = vld [vmem:[%s4038_s1 + $0x58] sm:$0xff]  ;;  %v2210_v9 = vpack.c.bf16 %v90_v2, %v89_v1  ;;  %v60_v12 = vld [vmem:[%s4038_s1 + $0xe8] sm:$0xff] }
  0x11   :  { %v73_v8 = vld [vmem:[%s4038_s1 + $0x150] sm:$0xff]  ;;  %v74_v10 = vld [vmem:[%s4038_s1 + $0x158] sm:$0xff]  ;;  %v91_v14 = vld [vmem:[%s4038_s1 + $0x1e0] sm:$0xff]  ;;  %v2180_v16 = vpack.c.bf16 %v42_v7, %v41_v6  ;;  %v2182_v19 = vpack.c.bf16 %v60_v12, %v59_v11 }
  0x12   :  { %2173 = vmatpush3.bf16.msra.mxu0 %v2172_v53  ;;  %v92_v15 = vld [vmem:[%s4038_s1 + $0x1e8] sm:$0xff]  ;;  %v43_v17 = vld [vmem:[%s4038_s1 + $0x60] sm:$0xff]  ;;  %v2212_v18 = vpack.c.bf16 %v74_v10, %v73_v8  ;;  %v61_v25 = vld [vmem:[%s4038_s1 + $0xf0] sm:$0xff] }
  0x13   :  { %2205 = vmatpush3.bf16.msra.mxu1 %v2204_v54  ;;  %2175 = vmatprep.subr.bf16.mxu0 %v2174_v55  ;;  %v44_v20 = vld [vmem:[%s4038_s1 + $0x68] sm:$0xff]  ;;  %v75_v21 = vld [vmem:[%s4038_s1 + $0x160] sm:$0xff]  ;;  %v2214_v23 = vpack.c.bf16 %v92_v15, %v91_v14  ;;  %v62_v26 = vld [vmem:[%s4038_s1 + $0xf8] sm:$0xff] }
  0x14   :  { %2207 = vmatprep.subr.bf16.mxu1 %v2206_v59  ;;  %v24_v22 = vld [vmem:[%s4037_s0] sm:$0xff]  ;;  %v76_v24 = vld [vmem:[%s4038_s1 + $0x168] sm:$0xff]  ;;  %v93_v29 = vld [vmem:[%s4038_s1 + $0x1f0] sm:$0xff]  ;;  %v2184_v31 = vpack.c.bf16 %v44_v20, %v43_v17  ;;  %v2186_v35 = vpack.c.bf16 %v62_v26, %v61_v25 }
  0x15   :  { %v445_v27 = vrot.slane %v24_v22, %v2817_v13  ;;  %v438_v28 = vcombine.high %v24_v22, %v24_v22  ;;  %v94_v30 = vld [vmem:[%s4038_s1 + $0x1f8] sm:$0xff]  ;;  %v2216_v34 = vpack.c.bf16 %v76_v24, %v75_v21  ;;  %v45_v36 = vld [vmem:[%s4038_s1 + $0x70] sm:$0xff]  ;;  %v111_v42 = vld [vmem:[%s4038_s1 + $0x280] sm:$0xff] }
  0x16   :  { %2177 = vmatpush3.bf16.msra.mxu0 %v2176_v3  ;;  %v46_v37 = vld [vmem:[%s4038_s1 + $0x78] sm:$0xff]  ;;  %v77_v38 = vld [vmem:[%s4038_s1 + $0x170] sm:$0xff]  ;;  %v2218_v39 = vpack.c.bf16 %v94_v30, %v93_v29  ;;  %v112_v43 = vld [vmem:[%s4038_s1 + $0x288] sm:$0xff] }
  0x17   :  { %2209 = vmatpush3.bf16.msra.mxu1 %v2208_v4  ;;  %2179 = vmatprep.subr.bf16.mxu0 %v2178_v5  ;;  %v453_v32 = vcombine.high %v445_v27, %v445_v27  ;;  %v452_v33 = vrot.slane %v438_v28, %v2817_v13  ;;  %v78_v40 = vld [vmem:[%s4038_s1 + $0x178] sm:$0xff]  ;;  %v143_v44 = vld [vmem:[%s4038_s1 + $0x380] sm:$0xff]  ;;  %v144_v45 = vld [vmem:[%s4038_s1 + $0x388] sm:$0xff]  ;;  %v2188_v46 = vpack.c.bf16 %v46_v37, %v45_v36 }
  0x18   :  { %2211 = vmatprep.subr.bf16.mxu1 %v2210_v9  ;;  %v2220_v47 = vpack.c.bf16 %v78_v40, %v77_v38  ;;  %v2222_v48 = vpack.c.bf16 %v112_v43, %v111_v42  ;;  %v95_v49 = vld [vmem:[%s4038_s1 + $0x200] sm:$0xff]  ;;  %v96_v50 = vld [vmem:[%s4038_s1 + $0x208] sm:$0xff]  ;;  %v2254_v52 = vpack.c.bf16 %v144_v45, %v143_v44  ;;  %v113_v54 = vld [vmem:[%s4038_s1 + $0x290] sm:$0xff] }
  0x19   :  { %636 = vmatprep.mubr.f32.mxu0 %v453_v32  ;;  %v454_v41 = vcombine.high %v452_v33, %v452_v33  ;;  %v127_v51 = vld [vmem:[%s4038_s1 + $0x300] sm:$0xff]  ;;  %v128_v53 = vld [vmem:[%s4038_s1 + $0x308] sm:$0xff]  ;;  %v114_v55 = vld [vmem:[%s4038_s1 + $0x298] sm:$0xff]  ;;  %v2224_v58 = vpack.c.bf16 %v96_v50, %v95_v49 }
  0x1a   :  { %2181 = vmatpush3.bf16.msra.mxu0 %v2180_v16  ;;  %v145_v56 = vld [vmem:[%s4038_s1 + $0x390] sm:$0xff]  ;;  %v146_v57 = vld [vmem:[%s4038_s1 + $0x398] sm:$0xff]  ;;  %v2256_v59 = vpack.c.bf16 %v128_v53, %v127_v51  ;;  %v2226_v60 = vpack.c.bf16 %v114_v55, %v113_v54  ;;  %v115_v2 = vld [vmem:[%s4038_s1 + $0x2a0] sm:$0xff] }
  0x1b   :  { %2213 = vmatpush3.bf16.msra.mxu1 %v2212_v18  ;;  %2183 = vmatprep.subr.bf16.mxu0 %v2182_v19  ;;  %v97_v61 = vld [vmem:[%s4038_s1 + $0x210] sm:$0xff]  ;;  %v98_v62 = vld [vmem:[%s4038_s1 + $0x218] sm:$0xff]  ;;  %v2258_v0 = vpack.c.bf16 %v146_v57, %v145_v56  ;;  %v116_v3 = vld [vmem:[%s4038_s1 + $0x2a8] sm:$0xff] }
  0x1c   :  { %2215 = vmatprep.subr.bf16.mxu1 %v2214_v23  ;;  %706 = vmatprep.mubr.f32.mxu1 %v454_v41  ;;  %v129_v63 = vld [vmem:[%s4038_s1 + $0x310] sm:$0xff]  ;;  %v130_v1 = vld [vmem:[%s4038_s1 + $0x318] sm:$0xff]  ;;  %v147_v4 = vld [vmem:[%s4038_s1 + $0x3a0] sm:$0xff]  ;;  %v2228_v6 = vpack.c.bf16 %v98_v62, %v97_v61  ;;  %v2230_v8 = vpack.c.bf16 %v116_v3, %v115_v2 }
  0x1d   :  { %v148_v5 = vld [vmem:[%s4038_s1 + $0x3a8] sm:$0xff]  ;;  %v2260_v7 = vpack.c.bf16 %v130_v1, %v129_v63  ;;  %v99_v9 = vld [vmem:[%s4038_s1 + $0x220] sm:$0xff]  ;;  %v117_v15 = vld [vmem:[%s4038_s1 + $0x2b0] sm:$0xff] }
  0x1e   :  { %2185 = vmatpush3.bf16.msra.mxu0 %v2184_v31  ;;  %v100_v10 = vld [vmem:[%s4038_s1 + $0x228] sm:$0xff]  ;;  %v131_v11 = vld [vmem:[%s4038_s1 + $0x320] sm:$0xff]  ;;  %v2262_v12 = vpack.c.bf16 %v148_v5, %v147_v4  ;;  %v118_v16 = vld [vmem:[%s4038_s1 + $0x2b8] sm:$0xff] }
  0x1f   :  { %2217 = vmatpush3.bf16.msra.mxu1 %v2216_v34  ;;  %2187 = vmatprep.subr.bf16.mxu0 %v2186_v35  ;;  %v132_v14 = vld [vmem:[%s4038_s1 + $0x328] sm:$0xff]  ;;  %v149_v17 = vld [vmem:[%s4038_s1 + $0x3b0] sm:$0xff]  ;;  %v150_v18 = vld [vmem:[%s4038_s1 + $0x3b8] sm:$0xff]  ;;  %v2232_v19 = vpack.c.bf16 %v100_v10, %v99_v9  ;;  %v2234_v22 = vpack.c.bf16 %v118_v16, %v117_v15 }
  0x20   :  { %2219 = vmatprep.subr.bf16.mxu1 %v2218_v39  ;;  %v101_v20 = vld [vmem:[%s4038_s1 + $0x230] sm:$0xff]  ;;  %v2264_v21 = vpack.c.bf16 %v132_v14, %v131_v11  ;;  %v102_v23 = vld [vmem:[%s4038_s1 + $0x238] sm:$0xff]  ;;  %v2266_v26 = vpack.c.bf16 %v150_v18, %v149_v17  ;;  %v120_v28 = vld [vmem:[%s4038_s1 + $0x2c8] sm:$0xff] }
  0x21   :  { %v133_v24 = vld [vmem:[%s4038_s1 + $0x330] sm:$0xff]  ;;  %v134_v25 = vld [vmem:[%s4038_s1 + $0x338] sm:$0xff]  ;;  %v25_v29 = vld [vmem:[%s4037_s0 + $0x8] sm:$0xff]  ;;  %v2236_v34 = vpack.c.bf16 %v102_v23, %v101_v20 }
  0x22   :  { %2189 = vmatpush3.bf16.msra.mxu0 %v2188_v46  ;;  %v151_v30 = vld [vmem:[%s4038_s1 + $0x3c0] sm:$0xff]  ;;  %v152_v31 = vld [vmem:[%s4038_s1 + $0x3c8] sm:$0xff]  ;;  %v2978_v32 = vrot.slane %v25_v29, %v2817_v13  ;;  %v2268_v35 = vpack.c.bf16 %v134_v25, %v133_v24  ;;  %v121_v44 = vld [vmem:[%s4038_s1 + $0x2d0] sm:$0xff] }
  0x23   :  { %2221 = vmatpush3.bf16.msra.mxu1 %v2220_v47  ;;  %2223 = vmatprep.subr.bf16.mxu0 %v2222_v48  ;;  %v103_v37 = vld [vmem:[%s4038_s1 + $0x240] sm:$0xff]  ;;  %v104_v38 = vld [vmem:[%s4038_s1 + $0x248] sm:$0xff]  ;;  %v2270_v42 = vpack.c.bf16 %v152_v31, %v151_v30  ;;  %v122_v45 = vld [vmem:[%s4038_s1 + $0x2d8] sm:$0xff] }
  0x24   :  { %2255 = vmatprep.subr.bf16.mxu1 %v2254_v52  ;;  %v135_v39 = vld [vmem:[%s4038_s1 + $0x340] sm:$0xff]  ;;  %v470_v40 = vcombine.high %v2978_v32, %v2978_v32  ;;  %v136_v43 = vld [vmem:[%s4038_s1 + $0x348] sm:$0xff]  ;;  %v153_v46 = vld [vmem:[%s4038_s1 + $0x3d0] sm:$0xff]  ;;  %v2240_v49 = vpack.c.bf16 %v104_v38, %v103_v37  ;;  %v2242_v51 = vpack.c.bf16 %v122_v45, %v121_v44 }
  0x25   :  { %637 = vmatmul.mubr.f32.vlgmr.msra.gmra.mrb[0].mxu0 %v445_v27  ;;  %v119_v27 = vld [vmem:[%s4038_s1 + $0x2c0] sm:$0xff]  ;;  %v154_v47 = vld [vmem:[%s4038_s1 + $0x3d8] sm:$0xff]  ;;  %v2272_v50 = vpack.c.bf16 %v136_v43, %v135_v39  ;;  %v105_v52 = vld [vmem:[%s4038_s1 + $0x250] sm:$0xff] }
  0x26   :  { %707 = vmatmul.mubr.f32.vlgmr.msra.gmra.mrb[0].mxu1 %v452_v33  ;;  %2225 = vmatpush3.bf16.msra.mxu0 %v2224_v58  ;;  %v455_v33 = vcombine.high %v25_v29, %v25_v29  ;;  %v2238_v36 = vpack.c.bf16 %v120_v28, %v119_v27  ;;  %v106_v53 = vld [vmem:[%s4038_s1 + $0x258] sm:$0xff]  ;;  %v137_v54 = vld [vmem:[%s4038_s1 + $0x350] sm:$0xff]  ;;  %v2274_v55 = vpack.c.bf16 %v154_v47, %v153_v46  ;;  %v123_v57 = vld [vmem:[%s4038_s1 + $0x2e0] sm:$0xff] }
  0x27   :  { %2257 = vmatpush3.bf16.msra.mxu1 %v2256_v59  ;;  %2227 = vmatprep.subr.bf16.mxu0 %v2226_v60  ;;  %v138_v56 = vld [vmem:[%s4038_s1 + $0x358] sm:$0xff]  ;;  %v124_v58 = vld [vmem:[%s4038_s1 + $0x2e8] sm:$0xff]  ;;  %v155_v59 = vld [vmem:[%s4038_s1 + $0x3e0] sm:$0xff]  ;;  %v2244_v61 = vpack.c.bf16 %v106_v53, %v105_v52 }
  0x28   :  { %2259 = vmatprep.subr.bf16.mxu1 %v2258_v0  ;;  %v2992_v41 = vrot.slane %v455_v33, %v2817_v13  ;;  %776 = vmatprep.mubr.f32.mxu0 %v470_v40  ;;  %v156_v60 = vld [vmem:[%s4038_s1 + $0x3e8] sm:$0xff]  ;;  %v2276_v62 = vpack.c.bf16 %v138_v56, %v137_v54  ;;  %v2246_v63 = vpack.c.bf16 %v124_v58, %v123_v57  ;;  %v107_v0 = vld [vmem:[%s4038_s1 + $0x260] sm:$0xff]  ;;  %v125_v5 = vld [vmem:[%s4038_s1 + $0x2f0] sm:$0xff] }
  0x29   :  { %v108_v1 = vld [vmem:[%s4038_s1 + $0x268] sm:$0xff]  ;;  %v139_v2 = vld [vmem:[%s4038_s1 + $0x360] sm:$0xff]  ;;  %v2278_v3 = vpack.c.bf16 %v156_v60, %v155_v59  ;;  %v110_v14 = vld [vmem:[%s4038_s1 + $0x278] sm:$0xff] }
  0x2a   :  { %2229 = vmatpush3.bf16.msra.mxu0 %v2228_v6  ;;  %v471_v48 = vcombine.high %v2992_v41, %v2992_v41  ;;  %v140_v4 = vld [vmem:[%s4038_s1 + $0x368] sm:$0xff]  ;;  %v126_v6 = vld [vmem:[%s4038_s1 + $0x2f8] sm:$0xff]  ;;  %v2248_v9 = vpack.c.bf16 %v108_v1, %v107_v0  ;;  %v141_v15 = vld [vmem:[%s4038_s1 + $0x370] sm:$0xff] }
  0x2b   :  { %2261 = vmatpush3.bf16.msra.mxu1 %v2260_v7  ;;  %2231 = vmatprep.subr.bf16.mxu0 %v2230_v8  ;;  %v157_v7 = vld [vmem:[%s4038_s1 + $0x3f0] sm:$0xff]  ;;  %v158_v8 = vld [vmem:[%s4038_s1 + $0x3f8] sm:$0xff]  ;;  %v2280_v10 = vpack.c.bf16 %v140_v4, %v139_v2  ;;  %v2250_v11 = vpack.c.bf16 %v126_v6, %v125_v5  ;;  %v175_v18 = vld [vmem:[%s4038_s1 + $0x480] sm:$0xff] }
  0x2c   :  { %2263 = vmatprep.subr.bf16.mxu1 %v2262_v12  ;;  %846 = vmatprep.mubr.f32.mxu1 %v471_v48  ;;  %v109_v12 = vld [vmem:[%s4038_s1 + $0x270] sm:$0xff]  ;;  %v2282_v16 = vpack.c.bf16 %v158_v8, %v157_v7  ;;  %v142_v17 = vld [vmem:[%s4038_s1 + $0x378] sm:$0xff]  ;;  %v207_v20 = vld [vmem:[%s4038_s1 + $0x580] sm:$0xff] }
  0x2d   :  { %v159_v23 = vld [vmem:[%s4038_s1 + $0x400] sm:$0xff]  ;;  %v2284_v24 = vpack.c.bf16 %v142_v17, %v141_v15  ;;  %v192_v28 = vld [vmem:[%s4038_s1 + $0x508] sm:$0xff]  ;;  %v177_v30 = vld [vmem:[%s4038_s1 + $0x490] sm:$0xff] }
  0x2e   :  { %2233 = vmatpush3.bf16.msra.mxu0 %v2232_v19  ;;  %v176_v19 = vld [vmem:[%s4038_s1 + $0x488] sm:$0xff]  ;;  %v191_v27 = vld [vmem:[%s4038_s1 + $0x500] sm:$0xff]  ;;  %v178_v31 = vld [vmem:[%s4038_s1 + $0x498] sm:$0xff] }
  0x2f   :  { %2265 = vmatpush3.bf16.msra.mxu1 %v2264_v21  ;;  %2235 = vmatprep.subr.bf16.mxu0 %v2234_v22  ;;  %v208_v21 = vld [vmem:[%s4038_s1 + $0x588] sm:$0xff]  ;;  %v2252_v22 = vpack.c.bf16 %v110_v14, %v109_v12  ;;  %v2286_v25 = vpack.c.bf16 %v176_v19, %v175_v18  ;;  %v209_v33 = vld [vmem:[%s4038_s1 + $0x590] sm:$0xff]  ;;  %v2290_v38 = vpack.c.bf16 %v178_v31, %v177_v30  ;;  %v162_v40 = vld [vmem:[%s4038_s1 + $0x418] sm:$0xff] }
  0x30   :  { %2267 = vmatprep.subr.bf16.mxu1 %v2266_v26  ;;  %v160_v26 = vld [vmem:[%s4038_s1 + $0x408] sm:$0xff]  ;;  %v2318_v29 = vpack.c.bf16 %v208_v21, %v207_v20  ;;  %v26_v37 = vld [vmem:[%s4037_s0 + $0x10] sm:$0xff]  ;;  %v194_v46 = vld [vmem:[%s4038_s1 + $0x518] sm:$0xff] }
  0x31   :  { %v161_v39 = vld [vmem:[%s4038_s1 + $0x410] sm:$0xff]  ;;  %v3120_v43 = vrot.slane %v26_v37, %v2817_v13  ;;  %v472_v44 = vcombine.high %v26_v37, %v26_v37  ;;  %v179_v47 = vld [vmem:[%s4038_s1 + $0x4a0] sm:$0xff]  ;;  %v180_v48 = vld [vmem:[%s4038_s1 + $0x4a8] sm:$0xff] }
  0x32   :  { %2237 = vmatpush3.bf16.msra.mxu0 %v2236_v34  ;;  %v210_v34 = vld [vmem:[%s4038_s1 + $0x598] sm:$0xff]  ;;  %v2292_v53 = vpack.c.bf16 %v162_v40, %v161_v39  ;;  %v2294_v54 = vpack.c.bf16 %v180_v48, %v179_v47  ;;  %v164_v56 = vld [vmem:[%s4038_s1 + $0x428] sm:$0xff]  ;;  %v195_v57 = vld [vmem:[%s4038_s1 + $0x520] sm:$0xff] }
  0x33   :  { %2269 = vmatpush3.bf16.msra.mxu1 %v2268_v35  ;;  %2239 = vmatprep.subr.bf16.mxu0 %v2238_v36  ;;  %v2288_v35 = vpack.c.bf16 %v160_v26, %v159_v23  ;;  %v2320_v36 = vpack.c.bf16 %v192_v28, %v191_v27  ;;  %v2322_v45 = vpack.c.bf16 %v210_v34, %v209_v33  ;;  %v196_v59 = vld [vmem:[%s4038_s1 + $0x528] sm:$0xff]  ;;  %v181_v60 = vld [vmem:[%s4038_s1 + $0x4b0] sm:$0xff]  ;;  %v166_v4 = vld [vmem:[%s4038_s1 + $0x438] sm:$0xff] }
  0x34   :  { %2271 = vmatprep.subr.bf16.mxu1 %v2270_v42  ;;  %v193_v42 = vld [vmem:[%s4038_s1 + $0x510] sm:$0xff]  ;;  %v3141_v52 = vrot.slane %v472_v44, %v2817_v13  ;;  %v2328_v1 = vpack.c.bf16 %v196_v59, %v195_v57  ;;  %v198_v7 = vld [vmem:[%s4038_s1 + $0x538] sm:$0xff]  ;;  %v183_v8 = vld [vmem:[%s4038_s1 + $0x4c0] sm:$0xff] }
  0x35   :  { %v197_v5 = vld [vmem:[%s4038_s1 + $0x530] sm:$0xff]  ;;  %v168_v17 = vld [vmem:[%s4038_s1 + $0x448] sm:$0xff]  ;;  %v199_v18 = vld [vmem:[%s4038_s1 + $0x540] sm:$0xff] }
  0x36   :  { %2241 = vmatpush3.bf16.msra.mxu0 %v2240_v49  ;;  %v211_v49 = vld [vmem:[%s4038_s1 + $0x5a0] sm:$0xff]  ;;  %v2332_v14 = vpack.c.bf16 %v198_v7, %v197_v5  ;;  %v200_v20 = vld [vmem:[%s4038_s1 + $0x548] sm:$0xff]  ;;  %v185_v21 = vld [vmem:[%s4038_s1 + $0x4d0] sm:$0xff] }
  0x37   :  { %2273 = vmatpush3.bf16.msra.mxu1 %v2272_v50  ;;  %2243 = vmatprep.subr.bf16.mxu0 %v2242_v51  ;;  %v212_v50 = vld [vmem:[%s4038_s1 + $0x5a8] sm:$0xff]  ;;  %v487_v51 = vcombine.high %v3120_v43, %v3120_v43  ;;  %v217_v23 = vld [vmem:[%s4038_s1 + $0x5d0] sm:$0xff]  ;;  %v2336_v26 = vpack.c.bf16 %v200_v20, %v199_v18  ;;  %v202_v33 = vld [vmem:[%s4038_s1 + $0x558] sm:$0xff] }
  0x38   :  { %2275 = vmatprep.subr.bf16.mxu1 %v2274_v55  ;;  %v163_v55 = vld [vmem:[%s4038_s1 + $0x420] sm:$0xff]  ;;  %v2326_v58 = vpack.c.bf16 %v212_v50, %v211_v49  ;;  %v169_v28 = vld [vmem:[%s4038_s1 + $0x450] sm:$0xff]  ;;  %v220_v37 = vld [vmem:[%s4038_s1 + $0x5e8] sm:$0xff] }
  0x39   :  { %v2296_v0 = vpack.c.bf16 %v164_v56, %v163_v55  ;;  %v201_v30 = vld [vmem:[%s4038_s1 + $0x550] sm:$0xff]  ;;  %v187_v34 = vld [vmem:[%s4038_s1 + $0x4e0] sm:$0xff]  ;;  %v172_v44 = vld [vmem:[%s4038_s1 + $0x468] sm:$0xff] }
  0x3a   :  { %2245 = vmatpush3.bf16.msra.mxu0 %v2244_v61  ;;  %v182_v61 = vld [vmem:[%s4038_s1 + $0x4b8] sm:$0xff]  ;;  %v2340_v39 = vpack.c.bf16 %v202_v33, %v201_v30  ;;  %v204_v47 = vld [vmem:[%s4038_s1 + $0x568] sm:$0xff]  ;;  %v189_v48 = vld [vmem:[%s4038_s1 + $0x4f0] sm:$0xff] }
  0x3b   :  { %2277 = vmatpush3.bf16.msra.mxu1 %v2276_v62  ;;  %2247 = vmatprep.subr.bf16.mxu0 %v2246_v63  ;;  %v213_v62 = vld [vmem:[%s4038_s1 + $0x5b0] sm:$0xff]  ;;  %v214_v63 = vld [vmem:[%s4038_s1 + $0x5b8] sm:$0xff]  ;;  %v2298_v2 = vpack.c.bf16 %v182_v61, %v181_v60  ;;  %v239_v60 = vld [vmem:[%s4038_s1 + $0x680] sm:$0xff] }
  0x3c   :  { %2279 = vmatprep.subr.bf16.mxu1 %v2278_v3  ;;  %v165_v3 = vld [vmem:[%s4038_s1 + $0x430] sm:$0xff]  ;;  %v2330_v6 = vpack.c.bf16 %v214_v63, %v213_v62  ;;  %v190_v49 = vld [vmem:[%s4038_s1 + $0x4f8] sm:$0xff]  ;;  %v240_v61 = vld [vmem:[%s4038_s1 + $0x688] sm:$0xff] }
  0x3d   :  { %v2300_v12 = vpack.c.bf16 %v166_v4, %v165_v3  ;;  %v221_v50 = vld [vmem:[%s4038_s1 + $0x5f0] sm:$0xff]  ;;  %v2314_v55 = vpack.c.bf16 %v190_v49, %v189_v48  ;;  %v174_v57 = vld [vmem:[%s4038_s1 + $0x478] sm:$0xff]  ;;  %v271_v62 = vld [vmem:[%s4038_s1 + $0x780] sm:$0xff]  ;;  %v2350_v3 = vpack.c.bf16 %v240_v61, %v239_v60 }
  0x3e   :  { %2249 = vmatpush3.bf16.msra.mxu0 %v2248_v9  ;;  %v184_v9 = vld [vmem:[%s4038_s1 + $0x4c8] sm:$0xff]  ;;  %v173_v56 = vld [vmem:[%s4038_s1 + $0x470] sm:$0xff]  ;;  %v206_v59 = vld [vmem:[%s4038_s1 + $0x578] sm:$0xff] }
  0x3f   :  { %2281 = vmatpush3.bf16.msra.mxu1 %v2280_v10  ;;  %2251 = vmatprep.subr.bf16.mxu0 %v2250_v11  ;;  %v215_v10 = vld [vmem:[%s4038_s1 + $0x5c0] sm:$0xff]  ;;  %v216_v11 = vld [vmem:[%s4038_s1 + $0x5c8] sm:$0xff]  ;;  %v2302_v15 = vpack.c.bf16 %v184_v9, %v183_v8  ;;  %v241_v9 = vld [vmem:[%s4038_s1 + $0x690] sm:$0xff] }
  0x40   :  { %2283 = vmatprep.subr.bf16.mxu1 %v2282_v16  ;;  %v167_v16 = vld [vmem:[%s4038_s1 + $0x440] sm:$0xff]  ;;  %v2334_v19 = vpack.c.bf16 %v216_v11, %v215_v10  ;;  %v272_v63 = vld [vmem:[%s4038_s1 + $0x788] sm:$0xff]  ;;  %v242_v10 = vld [vmem:[%s4038_s1 + $0x698] sm:$0xff] }
  0x41   :  { %v223_v4 = vld [vmem:[%s4038_s1 + $0x600] sm:$0xff]  ;;  %v224_v5 = vld [vmem:[%s4038_s1 + $0x608] sm:$0xff]  ;;  %v2382_v7 = vpack.c.bf16 %v272_v63, %v271_v62  ;;  %v2354_v18 = vpack.c.bf16 %v242_v10, %v241_v9  ;;  %v226_v20 = vld [vmem:[%s4038_s1 + $0x618] sm:$0xff] }
  0x42   :  { %2253 = vmatpush3.bf16.msra.mxu0 %v2252_v22  ;;  %v186_v22 = vld [vmem:[%s4038_s1 + $0x4d8] sm:$0xff]  ;;  %v256_v8 = vld [vmem:[%s4038_s1 + $0x708] sm:$0xff]  ;;  %v261_v48 = vld [vmem:[%s4038_s1 + $0x730] sm:$0xff] }
  0x43   :  { %2285 = vmatpush3.bf16.msra.mxu1 %v2284_v24  ;;  %2287 = vmatprep.subr.bf16.mxu0 %v2286_v25  ;;  %v218_v24 = vld [vmem:[%s4038_s1 + $0x5d8] sm:$0xff]  ;;  %v2304_v25 = vpack.c.bf16 %v168_v17, %v167_v16  ;;  %v2306_v27 = vpack.c.bf16 %v186_v22, %v185_v21  ;;  %v2352_v16 = vpack.c.bf16 %v224_v5, %v223_v4  ;;  %v257_v21 = vld [vmem:[%s4038_s1 + $0x710] sm:$0xff]  ;;  %v264_v61 = vld [vmem:[%s4038_s1 + $0x748] sm:$0xff] }
  0x44   :  { %2319 = vmatprep.subr.bf16.mxu1 %v2318_v29  ;;  %v170_v29 = vld [vmem:[%s4038_s1 + $0x458] sm:$0xff]  ;;  %v2338_v31 = vpack.c.bf16 %v218_v24, %v217_v23  ;;  %v243_v24 = vld [vmem:[%s4038_s1 + $0x6a0] sm:$0xff]  ;;  %v249_v62 = vld [vmem:[%s4038_s1 + $0x6d0] sm:$0xff] }
  0x45   :  { %777 = vmatmul.mubr.f32.vlgmr.msra.gmra.mrb[2].mxu0 %v2978_v32  ;;  %v2324_v32 = vpack.c.bf16 %v194_v46, %v193_v42  ;;  %v171_v42 = vld [vmem:[%s4038_s1 + $0x460] sm:$0xff]  ;;  %v258_v23 = vld [vmem:[%s4038_s1 + $0x718] sm:$0xff]  ;;  %v233_v5 = vld [vmem:[%s4038_s1 + $0x650] sm:$0xff] }
  0x46   :  { %2289 = vmatpush3.bf16.msra.mxu0 %v2288_v35  ;;  %847 = vmatmul.mubr.f32.vlgmr.msra.gmra.mrb[2].mxu1 %v2992_v41  ;;  %v488_v41 = vcombine.high %v3141_v52, %v3141_v52  ;;  %v188_v35 = vld [vmem:[%s4038_s1 + $0x4e8] sm:$0xff]  ;;  %v250_v63 = vld [vmem:[%s4038_s1 + $0x6d8] sm:$0xff]  ;;  %v251_v10 = vld [vmem:[%s4038_s1 + $0x6e0] sm:$0xff] }
  0x47   :  { %2321 = vmatpush3.bf16.msra.mxu1 %v2320_v36  ;;  %2291 = vmatprep.subr.bf16.mxu0 %v2290_v38  ;;  %v219_v36 = vld [vmem:[%s4038_s1 + $0x5e0] sm:$0xff]  ;;  %v2308_v38 = vpack.c.bf16 %v170_v29, %v169_v28  ;;  %v2310_v40 = vpack.c.bf16 %v188_v35, %v187_v34  ;;  %v276_v28 = vld [vmem:[%s4038_s1 + $0x7a8] sm:$0xff]  ;;  %v2370_v4 = vpack.c.bf16 %v250_v63, %v249_v62  ;;  %v266_v9 = vld [vmem:[%s4038_s1 + $0x758] sm:$0xff] }
  0x48   :  { %2323 = vmatprep.subr.bf16.mxu1 %v2322_v45  ;;  %916 = vmatprep.mubr.f32.mxu0 %v487_v51  ;;  %v203_v45 = vld [vmem:[%s4038_s1 + $0x560] sm:$0xff]  ;;  %v2342_v46 = vpack.c.bf16 %v220_v37, %v219_v36  ;;  %v222_v51 = vld [vmem:[%s4038_s1 + $0x5f8] sm:$0xff]  ;;  %v228_v34 = vld [vmem:[%s4038_s1 + $0x628] sm:$0xff] }
  0x49   :  { %986 = vmatprep.mubr.f32.mxu1 %v488_v41  ;;  %v205_v41 = vld [vmem:[%s4038_s1 + $0x570] sm:$0xff]  ;;  %v259_v35 = vld [vmem:[%s4038_s1 + $0x720] sm:$0xff] }
  0x4a   :  { %2293 = vmatpush3.bf16.msra.mxu0 %v2292_v53  ;;  %v2312_v53 = vpack.c.bf16 %v172_v44, %v171_v42  ;;  %v245_v37 = vld [vmem:[%s4038_s1 + $0x6b0] sm:$0xff] }
  0x4b   :  { %2325 = vmatpush3.bf16.msra.mxu1 %v2324_v32  ;;  %2295 = vmatprep.subr.bf16.mxu0 %v2294_v54  ;;  %v27_v32 = vld [vmem:[%s4037_s0 + $0x18] sm:$0xff]  ;;  %v2344_v54 = vpack.c.bf16 %v204_v47, %v203_v45  ;;  %v321_v62 = vld [vmem:[%s4038_s1 + $0x910] sm:$0xff] }
  0x4c   :  { %2327 = vmatprep.subr.bf16.mxu1 %v2326_v58  ;;  %v2346_v58 = vpack.c.bf16 %v222_v51, %v221_v50  ;;  %v3312_v11 = vrot.slane %v27_v32, %v2817_v13  ;;  %v230_v47 = vld [vmem:[%s4038_s1 + $0x638] sm:$0xff]  ;;  %v247_v51 = vld [vmem:[%s4038_s1 + $0x6c0] sm:$0xff] }
  0x4d   :  { %v262_v50 = vld [vmem:[%s4038_s1 + $0x738] sm:$0xff] }
  0x4e   :  { %2297 = vmatpush3.bf16.msra.mxu0 %v2296_v0  ;;  %v489_v0 = vcombine.high %v27_v32, %v27_v32  ;;  %v279_v32 = vld [vmem:[%s4038_s1 + $0x7c0] sm:$0xff] }
  0x4f   :  { %2329 = vmatpush3.bf16.msra.mxu1 %v2328_v1  ;;  %2299 = vmatprep.subr.bf16.mxu0 %v2298_v2  ;;  %v2316_v1 = vpack.c.bf16 %v174_v57, %v173_v56  ;;  %v2348_v2 = vpack.c.bf16 %v206_v59, %v205_v41  ;;  %v2396_v56 = vpack.c.bf16 %v262_v50, %v261_v48  ;;  %v231_v41 = vld [vmem:[%s4038_s1 + $0x640] sm:$0xff]  ;;  %v288_v48 = vld [vmem:[%s4038_s1 + $0x808] sm:$0xff] }
  0x50   :  { %2331 = vmatprep.subr.bf16.mxu1 %v2330_v6  ;;  %v255_v6 = vld [vmem:[%s4038_s1 + $0x700] sm:$0xff] }
  0x51   :  { %v2384_v17 = vpack.c.bf16 %v256_v8, %v255_v6  ;;  %v263_v59 = vld [vmem:[%s4038_s1 + $0x740] sm:$0xff]  ;;  %v234_v6 = vld [vmem:[%s4038_s1 + $0x658] sm:$0xff] }
  0x52   :  { %2301 = vmatpush3.bf16.msra.mxu0 %v2300_v12  ;;  %v273_v12 = vld [vmem:[%s4038_s1 + $0x790] sm:$0xff] }
  0x53   :  { %2333 = vmatpush3.bf16.msra.mxu1 %v2332_v14  ;;  %2303 = vmatprep.subr.bf16.mxu0 %v2302_v15  ;;  %v274_v14 = vld [vmem:[%s4038_s1 + $0x798] sm:$0xff]  ;;  %v3321_v15 = vrot.slane %v489_v0, %v2817_v13  ;;  %v281_v0 = vld [vmem:[%s4038_s1 + $0x7d0] sm:$0xff] }
  0x54   :  { %2335 = vmatprep.subr.bf16.mxu1 %v2334_v19  ;;  %v225_v19 = vld [vmem:[%s4038_s1 + $0x610] sm:$0xff]  ;;  %v2386_v22 = vpack.c.bf16 %v274_v14, %v273_v12  ;;  %v252_v12 = vld [vmem:[%s4038_s1 + $0x6e8] sm:$0xff]  ;;  %v283_v14 = vld [vmem:[%s4038_s1 + $0x7e0] sm:$0xff] }
  0x55   :  { %v505_v29 = vcombine.high %v3321_v15, %v3321_v15  ;;  %v2356_v30 = vpack.c.bf16 %v226_v20, %v225_v19  ;;  %v2374_v19 = vpack.c.bf16 %v252_v12, %v251_v10  ;;  %v235_v20 = vld [vmem:[%s4038_s1 + $0x660] sm:$0xff]  ;;  %v292_v10 = vld [vmem:[%s4038_s1 + $0x828] sm:$0xff] }
  0x56   :  { %2305 = vmatpush3.bf16.msra.mxu0 %v2304_v25  ;;  %v244_v25 = vld [vmem:[%s4038_s1 + $0x6a8] sm:$0xff]  ;;  %v323_v12 = vld [vmem:[%s4038_s1 + $0x920] sm:$0xff] }
  0x57   :  { %2337 = vmatpush3.bf16.msra.mxu1 %v2336_v26  ;;  %2307 = vmatprep.subr.bf16.mxu0 %v2306_v27  ;;  %v504_v26 = vcombine.high %v3312_v11, %v3312_v11  ;;  %v275_v27 = vld [vmem:[%s4038_s1 + $0x7a0] sm:$0xff]  ;;  %v2358_v33 = vpack.c.bf16 %v244_v25, %v243_v24  ;;  %v268_v24 = vld [vmem:[%s4038_s1 + $0x768] sm:$0xff]  ;;  %v253_v25 = vld [vmem:[%s4038_s1 + $0x6f0] sm:$0xff] }
  0x58   :  { %2339 = vmatprep.subr.bf16.mxu1 %v2338_v31  ;;  %v2388_v31 = vpack.c.bf16 %v258_v23, %v257_v21  ;;  %v2390_v36 = vpack.c.bf16 %v276_v28, %v275_v27  ;;  %v236_v21 = vld [vmem:[%s4038_s1 + $0x668] sm:$0xff]  ;;  %v285_v27 = vld [vmem:[%s4038_s1 + $0x7f0] sm:$0xff]  ;;  %v286_v28 = vld [vmem:[%s4038_s1 + $0x7f8] sm:$0xff] }
  0x5a   :  { %2309 = vmatpush3.bf16.msra.mxu0 %v2308_v38  ;;  %v246_v38 = vld [vmem:[%s4038_s1 + $0x6b8] sm:$0xff] }
  0x5b   :  { %2341 = vmatpush3.bf16.msra.mxu1 %v2340_v39  ;;  %2311 = vmatprep.subr.bf16.mxu0 %v2310_v40  ;;  %v277_v39 = vld [vmem:[%s4038_s1 + $0x7b0] sm:$0xff]  ;;  %v278_v40 = vld [vmem:[%s4038_s1 + $0x7b8] sm:$0xff]  ;;  %v2362_v45 = vpack.c.bf16 %v246_v38, %v245_v37  ;;  %v303_v37 = vld [vmem:[%s4038_s1 + $0x880] sm:$0xff] }
  0x5c   :  { %2343 = vmatprep.subr.bf16.mxu1 %v2342_v46  ;;  %v229_v46 = vld [vmem:[%s4038_s1 + $0x630] sm:$0xff]  ;;  %v2394_v49 = vpack.c.bf16 %v278_v40, %v277_v39  ;;  %v304_v38 = vld [vmem:[%s4038_s1 + $0x888] sm:$0xff]  ;;  %v335_v39 = vld [vmem:[%s4038_s1 + $0x980] sm:$0xff] }
  0x5d   :  { %v336_v40 = vld [vmem:[%s4038_s1 + $0x988] sm:$0xff] }
  0x5e   :  { %2313 = vmatpush3.bf16.msra.mxu0 %v2312_v53  ;;  %v248_v53 = vld [vmem:[%s4038_s1 + $0x6c8] sm:$0xff]  ;;  %v2446_v50 = vpack.c.bf16 %v336_v40, %v335_v39 }
  0x5f   :  { %2345 = vmatpush3.bf16.msra.mxu1 %v2344_v54  ;;  %2315 = vmatprep.subr.bf16.mxu0 %v2314_v55  ;;  %v280_v54 = vld [vmem:[%s4038_s1 + $0x7c8] sm:$0xff]  ;;  %v2364_v55 = vpack.c.bf16 %v230_v47, %v229_v46  ;;  %v2366_v57 = vpack.c.bf16 %v248_v53, %v247_v51  ;;  %v2414_v46 = vpack.c.bf16 %v304_v38, %v303_v37  ;;  %v287_v47 = vld [vmem:[%s4038_s1 + $0x800] sm:$0xff]  ;;  %v305_v53 = vld [vmem:[%s4038_s1 + $0x890] sm:$0xff] }
  0x60   :  { %2347 = vmatprep.subr.bf16.mxu1 %v2346_v58  ;;  %v232_v58 = vld [vmem:[%s4038_s1 + $0x648] sm:$0xff]  ;;  %v2398_v60 = vpack.c.bf16 %v280_v54, %v279_v32  ;;  %v306_v32 = vld [vmem:[%s4038_s1 + $0x898] sm:$0xff] }
  0x61   :  { %v320_v51 = vld [vmem:[%s4038_s1 + $0x908] sm:$0xff] }
  0x62   :  { %2317 = vmatpush3.bf16.msra.mxu0 %v2316_v1  ;;  %v282_v1 = vld [vmem:[%s4038_s1 + $0x7d8] sm:$0xff] }
  0x63   :  { %2349 = vmatpush3.bf16.msra.mxu1 %v2348_v2  ;;  %2351 = vmatprep.subr.bf16.mxu0 %v2350_v3  ;;  %v2368_v2 = vpack.c.bf16 %v232_v58, %v231_v41  ;;  %v2400_v3 = vpack.c.bf16 %v264_v61, %v263_v59  ;;  %v2402_v8 = vpack.c.bf16 %v282_v1, %v281_v0  ;;  %v290_v61 = vld [vmem:[%s4038_s1 + $0x818] sm:$0xff]  ;;  %v307_v1 = vld [vmem:[%s4038_s1 + $0x8a0] sm:$0xff] }
  0x64   :  { %2383 = vmatprep.subr.bf16.mxu1 %v2382_v7  ;;  %v265_v7 = vld [vmem:[%s4038_s1 + $0x750] sm:$0xff]  ;;  %v2416_v41 = vpack.c.bf16 %v288_v48, %v287_v47  ;;  %v2418_v59 = vpack.c.bf16 %v306_v32, %v305_v53  ;;  %v322_v0 = vld [vmem:[%s4038_s1 + $0x918] sm:$0xff] }
  0x65   :  { %917 = vmatmul.mubr.f32.vlgmr.msra.gmra.mrb[4].mxu0 %v3120_v43  ;;  %v227_v43 = vld [vmem:[%s4038_s1 + $0x620] sm:$0xff] }
  0x66   :  { %2353 = vmatpush3.bf16.msra.mxu0 %v2352_v16  ;;  %987 = vmatmul.mubr.f32.vlgmr.msra.gmra.mrb[4].mxu1 %v3141_v52  ;;  %v260_v52 = vld [vmem:[%s4038_s1 + $0x728] sm:$0xff]  ;;  %v2360_v42 = vpack.c.bf16 %v228_v34, %v227_v43  ;;  %v237_v43 = vld [vmem:[%s4038_s1 + $0x670] sm:$0xff]  ;;  %v238_v34 = vld [vmem:[%s4038_s1 + $0x678] sm:$0xff] }
  0x67   :  { %2385 = vmatpush3.bf16.msra.mxu1 %v2384_v17  ;;  %2355 = vmatprep.subr.bf16.mxu0 %v2354_v18  ;;  %v2392_v44 = vpack.c.bf16 %v260_v52, %v259_v35  ;;  %v284_v16 = vld [vmem:[%s4038_s1 + $0x7e8] sm:$0xff]  ;;  %v2372_v17 = vpack.c.bf16 %v234_v6, %v233_v5  ;;  %v2404_v18 = vpack.c.bf16 %v266_v9, %v265_v7  ;;  %v269_v35 = vld [vmem:[%s4038_s1 + $0x770] sm:$0xff]  ;;  %v270_v52 = vld [vmem:[%s4038_s1 + $0x778] sm:$0xff] }
  0x68   :  { %2387 = vmatprep.subr.bf16.mxu1 %v2386_v22  ;;  %1056 = vmatprep.mubr.f32.mxu0 %v504_v26  ;;  %v267_v22 = vld [vmem:[%s4038_s1 + $0x760] sm:$0xff]  ;;  %v2406_v23 = vpack.c.bf16 %v284_v16, %v283_v14  ;;  %v254_v26 = vld [vmem:[%s4038_s1 + $0x6f8] sm:$0xff]  ;;  %v340_v5 = vld [vmem:[%s4038_s1 + $0x9a8] sm:$0xff] }
  0x69   :  { %1126 = vmatprep.mubr.f32.mxu1 %v505_v29  ;;  %v2376_v29 = vpack.c.bf16 %v236_v21, %v235_v20  ;;  %v309_v16 = vld [vmem:[%s4038_s1 + $0x8b0] sm:$0xff] }
  0x6a   :  { %2357 = vmatpush3.bf16.msra.mxu0 %v2356_v30  ;;  %v28_v30 = vld [vmem:[%s4037_s0 + $0x20] sm:$0xff] }
  0x6b   :  { %2389 = vmatpush3.bf16.msra.mxu1 %v2388_v31  ;;  %2359 = vmatprep.subr.bf16.mxu0 %v2358_v33  ;;  %v2408_v31 = vpack.c.bf16 %v268_v24, %v267_v22  ;;  %v2378_v33 = vpack.c.bf16 %v254_v26, %v253_v25  ;;  %v3519_v54 = vrot.slane %v28_v30, %v2817_v13 }
  0x6c   :  { %2391 = vmatprep.subr.bf16.mxu1 %v2390_v36  ;;  %v2410_v36 = vpack.c.bf16 %v286_v28, %v285_v27 }
  0x6e   :  { %2361 = vmatpush3.bf16.msra.mxu0 %v2360_v42  ;;  %v506_v42 = vcombine.high %v28_v30, %v28_v30 }
  0x6f   :  { %2393 = vmatpush3.bf16.msra.mxu1 %v2392_v44  ;;  %2363 = vmatprep.subr.bf16.mxu0 %v2362_v45  ;;  %v2380_v44 = vpack.c.bf16 %v238_v34, %v237_v43  ;;  %v2412_v45 = vpack.c.bf16 %v270_v52, %v269_v35 }
  0x70   :  { %2395 = vmatprep.subr.bf16.mxu1 %v2394_v49  ;;  %v319_v49 = vld [vmem:[%s4038_s1 + $0x900] sm:$0xff] }
  0x71   :  { %v2448_v58 = vpack.c.bf16 %v320_v51, %v319_v49 }
  0x72   :  { %2365 = vmatpush3.bf16.msra.mxu0 %v2364_v55  ;;  %v337_v55 = vld [vmem:[%s4038_s1 + $0x990] sm:$0xff] }
  0x73   :  { %2397 = vmatpush3.bf16.msra.mxu1 %v2396_v56  ;;  %2367 = vmatprep.subr.bf16.mxu0 %v2366_v57  ;;  %v338_v56 = vld [vmem:[%s4038_s1 + $0x998] sm:$0xff]  ;;  %v3528_v57 = vrot.slane %v506_v42, %v2817_v13 }
  0x74   :  { %2399 = vmatprep.subr.bf16.mxu1 %v2398_v60  ;;  %v289_v60 = vld [vmem:[%s4038_s1 + $0x810] sm:$0xff]  ;;  %v2450_v63 = vpack.c.bf16 %v338_v56, %v337_v55 }
  0x75   :  { %v522_v6 = vcombine.high %v3528_v57, %v3528_v57  ;;  %v2420_v7 = vpack.c.bf16 %v290_v61, %v289_v60 }
  0x76   :  { %2369 = vmatpush3.bf16.msra.mxu0 %v2368_v2  ;;  %v308_v2 = vld [vmem:[%s4038_s1 + $0x8a8] sm:$0xff] }
  0x77   :  { %2401 = vmatpush3.bf16.msra.mxu1 %v2400_v3  ;;  %2371 = vmatprep.subr.bf16.mxu0 %v2370_v4  ;;  %v521_v3 = vcombine.high %v3519_v54, %v3519_v54  ;;  %v339_v4 = vld [vmem:[%s4038_s1 + $0x9a0] sm:$0xff]  ;;  %v2422_v9 = vpack.c.bf16 %v308_v2, %v307_v1 }
  0x78   :  { %2403 = vmatprep.subr.bf16.mxu1 %v2402_v8  ;;  %v2452_v8 = vpack.c.bf16 %v322_v0, %v321_v62  ;;  %v2454_v14 = vpack.c.bf16 %v340_v5, %v339_v4 }
  0x7a   :  { %2373 = vmatpush3.bf16.msra.mxu0 %v2372_v17  ;;  %v310_v17 = vld [vmem:[%s4038_s1 + $0x8b8] sm:$0xff] }
  0x7b   :  { %2405 = vmatpush3.bf16.msra.mxu1 %v2404_v18  ;;  %2375 = vmatprep.subr.bf16.mxu0 %v2374_v19  ;;  %v341_v18 = vld [vmem:[%s4038_s1 + $0x9b0] sm:$0xff]  ;;  %v342_v19 = vld [vmem:[%s4038_s1 + $0x9b8] sm:$0xff] }
  0x7c   :  { %2407 = vmatprep.subr.bf16.mxu1 %v2406_v23 }
  0x7e   :  { %2377 = vmatpush3.bf16.msra.mxu0 %v2376_v29 }
  0x7f   :  { %2409 = vmatpush3.bf16.msra.mxu1 %v2408_v31  ;;  %2379 = vmatprep.subr.bf16.mxu0 %v2378_v33 }
  0x80   :  { %2411 = vmatprep.subr.bf16.mxu1 %v2410_v36 }
  0x82   :  { %2381 = vmatpush3.bf16.msra.mxu0 %v2380_v44 }
  0x83   :  { %2413 = vmatpush3.bf16.msra.mxu1 %v2412_v45  ;;  %2415 = vmatprep.subr.bf16.mxu0 %v2414_v46 }
  0x84   :  { %2447 = vmatprep.subr.bf16.mxu1 %v2446_v50 }
  0x85   :  { %1057 = vmatmul.mubr.f32.vlgmr.msra.gmra.mrb[6].mxu0 %v3312_v11  ;;  %v291_v11 = vld [vmem:[%s4038_s1 + $0x820] sm:$0xff] }
  0x86   :  { %2417 = vmatpush3.bf16.msra.mxu0 %v2416_v41  ;;  %1127 = vmatmul.mubr.f32.vlgmr.msra.gmra.mrb[6].mxu1 %v3321_v15  ;;  %v324_v15 = vld [vmem:[%s4038_s1 + $0x928] sm:$0xff]  ;;  %v2424_v20 = vpack.c.bf16 %v292_v10, %v291_v11 }
  0x87   :  { %2449 = vmatpush3.bf16.msra.mxu1 %v2448_v58  ;;  %2419 = vmatprep.subr.bf16.mxu0 %v2418_v59 }
  0x88   :  { %2451 = vmatprep.subr.bf16.mxu1 %v2450_v63  ;;  %1196 = vmatprep.mubr.f32.mxu0 %v521_v3 }
  0x89   :  { %1266 = vmatprep.mubr.f32.mxu1 %v522_v6 }
  0x8a   :  { %2421 = vmatpush3.bf16.msra.mxu0 %v2420_v7 }
  0x8b   :  { %11 = vsyncpa [#allocation3], 0  ;;  %2453 = vmatpush3.bf16.msra.mxu1 %v2452_v8  ;;  %2423 = vmatprep.subr.bf16.mxu0 %v2422_v9  ;;  %v2456_v21 = vpack.c.bf16 %v324_v15, %v323_v12  ;;  %v2426_v22 = vpack.c.bf16 %v310_v17, %v309_v16  ;;  %v293_v23 = vld [vmem:[%s4038_s1 + $0x830] sm:$0xff]  ;;  %v294_v24 = vld [vmem:[%s4038_s1 + $0x838] sm:$0xff]  ;;  %v2458_v26 = vpack.c.bf16 %v342_v19, %v341_v18  ;;  %vm2629_vm0 = vmmov 0   ;;  %s2631_s28 = smov [#allocation2]  }
  0x8c   :  { %v325_v25 = vld [vmem:[%s4038_s1 + $0x930] sm:$0xff]  ;;  %2455 = vmatprep.subr.bf16.mxu1 %v2454_v14  ;;  %v326_v27 = vld [vmem:[%s4038_s1 + $0x938] sm:$0xff]  ;;  %v311_v28 = vld [vmem:[%s4038_s1 + $0x8c0] sm:$0xff]  ;;  %v2428_v33 = vpack.c.bf16 %v294_v24, %v293_v23  ;;  %vm1482_vm1 = vcmask 1041408   ;;  %s1622_s29 = sshll.u32 %s2631_s28, 4  ;;  %s1623_s29 = int_to_ptr.vmem [resolvable:$true] %s1622_s29 }
  0x8d   :  { %v312_v29 = vld [vmem:[%s4038_s1 + $0x8c8] sm:$0xff]  ;;  %v343_v30 = vld [vmem:[%s4038_s1 + $0x9c0] sm:$0xff]  ;;  %v2460_v43 = vpack.c.bf16 %v326_v27, %v325_v25  ;;  %v313_v39 = vld [vmem:[%s4038_s1 + $0x8d0] sm:$0xff]  ;;  %p2608_p1 = scmp.lt.s32.totalorder %s1623_s29, %s1623_s29 }
  0x8e   :  { %v344_v31 = vld [vmem:[%s4038_s1 + $0x9c8] sm:$0xff]  ;;  %2425 = vmatpush3.bf16.msra.mxu0 %v2424_v20  ;;  %v2430_v34 = vpack.c.bf16 %v312_v29, %v311_v28  ;;  %v295_v35 = vld [vmem:[%s4038_s1 + $0x840] sm:$0xff]  ;;  %v314_v40 = vld [vmem:[%s4038_s1 + $0x8d8] sm:$0xff] }
  0x8f   :  { %2457 = vmatpush3.bf16.msra.mxu1 %v2456_v21  ;;  %2427 = vmatprep.subr.bf16.mxu0 %v2426_v22  ;;  %v296_v36 = vld [vmem:[%s4038_s1 + $0x848] sm:$0xff]  ;;  %v327_v52 = vld [vmem:[%s4038_s1 + $0x940] sm:$0xff]  ;;  %v2462_v37 = vpack.c.bf16 %v344_v31, %v343_v30  ;;  %v345_v42 = vld [vmem:[%s4038_s1 + $0x9d0] sm:$0xff]  ;;  %v2434_v47 = vpack.c.bf16 %v314_v40, %v313_v39 }
  0x90   :  { %2459 = vmatprep.subr.bf16.mxu1 %v2458_v26  ;;  %v328_v38 = vld [vmem:[%s4038_s1 + $0x948] sm:$0xff]  ;;  %v346_v44 = vld [vmem:[%s4038_s1 + $0x9d8] sm:$0xff]  ;;  %v2432_v45 = vpack.c.bf16 %v296_v36, %v295_v35  ;;  %v297_v48 = vld [vmem:[%s4038_s1 + $0x850] sm:$0xff] }
  0x91   :  { %v2464_v46 = vpack.c.bf16 %v328_v38, %v327_v52  ;;  %v298_v49 = vld [vmem:[%s4038_s1 + $0x858] sm:$0xff]  ;;  %v329_v50 = vld [vmem:[%s4038_s1 + $0x950] sm:$0xff]  ;;  %v2466_v51 = vpack.c.bf16 %v346_v44, %v345_v42  ;;  %v315_v32 = vld [vmem:[%s4038_s1 + $0x8e0] sm:$0xff] }
  0x92   :  { %2429 = vmatpush3.bf16.msra.mxu0 %v2428_v33  ;;  %v330_v53 = vld [vmem:[%s4038_s1 + $0x958] sm:$0xff]  ;;  %v316_v55 = vld [vmem:[%s4038_s1 + $0x8e8] sm:$0xff]  ;;  %v347_v56 = vld [vmem:[%s4038_s1 + $0x9e0] sm:$0xff]  ;;  %v2436_v58 = vpack.c.bf16 %v298_v49, %v297_v48 }
  0x93   :  { %2461 = vmatpush3.bf16.msra.mxu1 %v2460_v43  ;;  %2431 = vmatprep.subr.bf16.mxu0 %v2430_v34  ;;  %v348_v41 = vld [vmem:[%s4038_s1 + $0x9e8] sm:$0xff]  ;;  %v2468_v59 = vpack.c.bf16 %v330_v53, %v329_v50  ;;  %v2438_v60 = vpack.c.bf16 %v316_v55, %v315_v32  ;;  %v299_v61 = vld [vmem:[%s4038_s1 + $0x860] sm:$0xff]  ;;  %v317_v2 = vld [vmem:[%s4038_s1 + $0x8f0] sm:$0xff] }
  0x94   :  { %2463 = vmatprep.subr.bf16.mxu1 %v2462_v37  ;;  %v300_v62 = vld [vmem:[%s4038_s1 + $0x868] sm:$0xff]  ;;  %v331_v63 = vld [vmem:[%s4038_s1 + $0x960] sm:$0xff]  ;;  %v2470_v0 = vpack.c.bf16 %v348_v41, %v347_v56  ;;  %v318_v3 = vld [vmem:[%s4038_s1 + $0x8f8] sm:$0xff] }
  0x95   :  { %v332_v1 = vld [vmem:[%s4038_s1 + $0x968] sm:$0xff]  ;;  %v349_v4 = vld [vmem:[%s4038_s1 + $0x9f0] sm:$0xff]  ;;  %v350_v5 = vld [vmem:[%s4038_s1 + $0x9f8] sm:$0xff]  ;;  %v2440_v6 = vpack.c.bf16 %v300_v62, %v299_v61  ;;  %v2442_v9 = vpack.c.bf16 %v318_v3, %v317_v2 }
  0x96   :  { %2433 = vmatpush3.bf16.msra.mxu0 %v2432_v45  ;;  %v29_v7 = vld [vmem:[%s4037_s0 + $0x28] sm:$0xff]  ;;  %v2472_v8 = vpack.c.bf16 %v332_v1, %v331_v63  ;;  %v301_v11 = vld [vmem:[%s4038_s1 + $0x870] sm:$0xff]  ;;  %v302_v10 = vld [vmem:[%s4038_s1 + $0x878] sm:$0xff]  ;;  %v2474_v14 = vpack.c.bf16 %v350_v5, %v349_v4 }
  0x97   :  { %2465 = vmatpush3.bf16.msra.mxu1 %v2464_v46  ;;  %2435 = vmatprep.subr.bf16.mxu0 %v2434_v47  ;;  %v333_v12 = vld [vmem:[%s4038_s1 + $0x970] sm:$0xff]  ;;  %v334_v15 = vld [vmem:[%s4038_s1 + $0x978] sm:$0xff]  ;;  %v367_v16 = vld [vmem:[%s4038_s1 + $0xa80] sm:$0xff]  ;;  %v523_v20 = vcombine.high %v29_v7, %v29_v7  ;;  %v2444_v21 = vpack.c.bf16 %v302_v10, %v301_v11  ;;  %v3726_v31 = vrot.slane %v29_v7, %v2817_v13 }
  0x98   :  { %2467 = vmatprep.subr.bf16.mxu1 %v2466_v51  ;;  %v368_v17 = vld [vmem:[%s4038_s1 + $0xa88] sm:$0xff]  ;;  %v399_v18 = vld [vmem:[%s4038_s1 + $0xb80] sm:$0xff]  ;;  %v2476_v22 = vpack.c.bf16 %v334_v15, %v333_v12  ;;  %v369_v29 = vld [vmem:[%s4038_s1 + $0xa90] sm:$0xff] }
  0x99   :  { %v400_v19 = vld [vmem:[%s4038_s1 + $0xb88] sm:$0xff]  ;;  %v2478_v23 = vpack.c.bf16 %v368_v17, %v367_v16  ;;  %v351_v24 = vld [vmem:[%s4038_s1 + $0xa00] sm:$0xff]  ;;  %v370_v30 = vld [vmem:[%s4038_s1 + $0xa98] sm:$0xff]  ;;  %v3735_v34 = vrot.slane %v523_v20, %v2817_v13  ;;  %v538_v45 = vcombine.high %v3726_v31, %v3726_v31 }
  0x9a   :  { %2437 = vmatpush3.bf16.msra.mxu0 %v2436_v58  ;;  %v352_v25 = vld [vmem:[%s4038_s1 + $0xa08] sm:$0xff]  ;;  %v383_v26 = vld [vmem:[%s4038_s1 + $0xb00] sm:$0xff]  ;;  %v2510_v27 = vpack.c.bf16 %v400_v19, %v399_v18  ;;  %v401_v33 = vld [vmem:[%s4038_s1 + $0xb90] sm:$0xff]  ;;  %v2482_v52 = vpack.c.bf16 %v370_v30, %v369_v29 }
  0x9b   :  { %2469 = vmatpush3.bf16.msra.mxu1 %v2468_v59  ;;  %2439 = vmatprep.subr.bf16.mxu0 %v2438_v60  ;;  %v384_v28 = vld [vmem:[%s4038_s1 + $0xb08] sm:$0xff]  ;;  %v402_v43 = vld [vmem:[%s4038_s1 + $0xb98] sm:$0xff]  ;;  %v2480_v35 = vpack.c.bf16 %v352_v25, %v351_v24  ;;  %v353_v37 = vld [vmem:[%s4038_s1 + $0xa10] sm:$0xff]  ;;  %v539_v48 = vcombine.high %v3735_v34, %v3735_v34 }
  0x9c   :  { %2471 = vmatprep.subr.bf16.mxu1 %v2470_v0  ;;  %v2512_v36 = vpack.c.bf16 %v384_v28, %v383_v26  ;;  %v354_v38 = vld [vmem:[%s4038_s1 + $0xa18] sm:$0xff]  ;;  %v385_v39 = vld [vmem:[%s4038_s1 + $0xb10] sm:$0xff]  ;;  %v2514_v13 = vpack.c.bf16 %v402_v43, %v401_v33  ;;  %v371_v42 = vld [vmem:[%s4038_s1 + $0xaa0] sm:$0xff] }
  0x9d   :  { %v386_v40 = vld [vmem:[%s4038_s1 + $0xb18] sm:$0xff]  ;;  %v372_v44 = vld [vmem:[%s4038_s1 + $0xaa8] sm:$0xff]  ;;  %v403_v46 = vld [vmem:[%s4038_s1 + $0xba0] sm:$0xff]  ;;  %v2484_v49 = vpack.c.bf16 %v354_v38, %v353_v37 }
  0x9e   :  { %2441 = vmatpush3.bf16.msra.mxu0 %v2440_v6  ;;  %v404_v47 = vld [vmem:[%s4038_s1 + $0xba8] sm:$0xff]  ;;  %v2516_v50 = vpack.c.bf16 %v386_v40, %v385_v39  ;;  %v2486_v51 = vpack.c.bf16 %v372_v44, %v371_v42  ;;  %v387_v32 = vld [vmem:[%s4038_s1 + $0xb20] sm:$0xff]  ;;  %v373_v56 = vld [vmem:[%s4038_s1 + $0xab0] sm:$0xff] }
  0x9f   :  { %2473 = vmatpush3.bf16.msra.mxu1 %v2472_v8  ;;  %2443 = vmatprep.subr.bf16.mxu0 %v2442_v9  ;;  %v356_v53 = vld [vmem:[%s4038_s1 + $0xa28] sm:$0xff]  ;;  %v2518_v55 = vpack.c.bf16 %v404_v47, %v403_v46  ;;  %v374_v41 = vld [vmem:[%s4038_s1 + $0xab8] sm:$0xff]  ;;  %v405_v58 = vld [vmem:[%s4038_s1 + $0xbb0] sm:$0xff] }
  0xa0   :  { %2475 = vmatprep.subr.bf16.mxu1 %v2474_v14  ;;  %v406_v59 = vld [vmem:[%s4038_s1 + $0xbb8] sm:$0xff]  ;;  %v2490_v62 = vpack.c.bf16 %v374_v41, %v373_v56  ;;  %v357_v63 = vld [vmem:[%s4038_s1 + $0xa30] sm:$0xff]  ;;  %v375_v4 = vld [vmem:[%s4038_s1 + $0xac0] sm:$0xff] }
  0xa1   :  { %v358_v0 = vld [vmem:[%s4038_s1 + $0xa38] sm:$0xff]  ;;  %v389_v1 = vld [vmem:[%s4038_s1 + $0xb30] sm:$0xff]  ;;  %v2522_v2 = vpack.c.bf16 %v406_v59, %v405_v58  ;;  %v376_v5 = vld [vmem:[%s4038_s1 + $0xac8] sm:$0xff]  ;;  %v2628_v59 = vmov 0.0|0.0  }
  0xa2   :  { %2445 = vmatpush3.bf16.msra.mxu0 %v2444_v21  ;;  %v390_v3 = vld [vmem:[%s4038_s1 + $0xb38] sm:$0xff]  ;;  %v407_v6 = vld [vmem:[%s4038_s1 + $0xbc0] sm:$0xff]  ;;  %v408_v7 = vld [vmem:[%s4038_s1 + $0xbc8] sm:$0xff]  ;;  %v2492_v8 = vpack.c.bf16 %v358_v0, %v357_v63  ;;  %v2494_v11 = vpack.c.bf16 %v376_v5, %v375_v4 }
  0xa3   :  { %2477 = vmatpush3.bf16.msra.mxu1 %v2476_v22  ;;  %2479 = vmatprep.subr.bf16.mxu0 %v2478_v23  ;;  %v2524_v9 = vpack.c.bf16 %v390_v3, %v389_v1  ;;  %v359_v10 = vld [vmem:[%s4038_s1 + $0xa40] sm:$0xff]  ;;  %v360_v12 = vld [vmem:[%s4038_s1 + $0xa48] sm:$0xff]  ;;  %v2526_v15 = vpack.c.bf16 %v408_v7, %v407_v6  ;;  %v377_v17 = vld [vmem:[%s4038_s1 + $0xad0] sm:$0xff]  ;;  %v2630_v1 = vmov 0.0  }
  0xa4   :  { %2511 = vmatprep.subr.bf16.mxu1 %v2510_v27  ;;  %v391_v14 = vld [vmem:[%s4038_s1 + $0xb40] sm:$0xff]  ;;  %v392_v16 = vld [vmem:[%s4038_s1 + $0xb48] sm:$0xff]  ;;  %v378_v18 = vld [vmem:[%s4038_s1 + $0xad8] sm:$0xff]  ;;  %v2496_v21 = vpack.c.bf16 %v360_v12, %v359_v10 }
  0xa5   :  { %1197 = vmatmul.mubr.f32.vlgmr.msra.gmra.mrb[8].mxu0 %v3519_v54  ;;  %v355_v54 = vld [vmem:[%s4038_s1 + $0xa20] sm:$0xff]  ;;  %v409_v19 = vld [vmem:[%s4038_s1 + $0xbd0] sm:$0xff]  ;;  %v410_v20 = vld [vmem:[%s4038_s1 + $0xbd8] sm:$0xff]  ;;  %v2528_v22 = vpack.c.bf16 %v392_v16, %v391_v14  ;;  %v2498_v23 = vpack.c.bf16 %v378_v18, %v377_v17 }
  0xa6   :  { %2481 = vmatpush3.bf16.msra.mxu0 %v2480_v35  ;;  %1267 = vmatmul.mubr.f32.vlgmr.msra.gmra.mrb[8].mxu1 %v3528_v57  ;;  %v388_v57 = vld [vmem:[%s4038_s1 + $0xb28] sm:$0xff]  ;;  %v2488_v60 = vpack.c.bf16 %v356_v53, %v355_v54  ;;  %v361_v24 = vld [vmem:[%s4038_s1 + $0xa50] sm:$0xff]  ;;  %v362_v25 = vld [vmem:[%s4038_s1 + $0xa58] sm:$0xff]  ;;  %v2530_v27 = vpack.c.bf16 %v410_v20, %v409_v19 }
  0xa7   :  { %2513 = vmatpush3.bf16.msra.mxu1 %v2512_v36  ;;  %2483 = vmatprep.subr.bf16.mxu0 %v2482_v52  ;;  %v2520_v61 = vpack.c.bf16 %v388_v57, %v387_v32  ;;  %v393_v26 = vld [vmem:[%s4038_s1 + $0xb50] sm:$0xff]  ;;  %v394_v28 = vld [vmem:[%s4038_s1 + $0xb58] sm:$0xff]  ;;  %v379_v29 = vld [vmem:[%s4038_s1 + $0xae0] sm:$0xff]  ;;  %v2500_v35 = vpack.c.bf16 %v362_v25, %v361_v24 }
  0xa8   :  { %2515 = vmatprep.subr.bf16.mxu1 %v2514_v13  ;;  %1336 = vmatprep.mubr.f32.mxu0 %v538_v45  ;;  %v380_v30 = vld [vmem:[%s4038_s1 + $0xae8] sm:$0xff]  ;;  %v411_v33 = vld [vmem:[%s4038_s1 + $0xbe0] sm:$0xff]  ;;  %v2532_v36 = vpack.c.bf16 %v394_v28, %v393_v26  ;;  %v381_v42 = vld [vmem:[%s4038_s1 + $0xaf0] sm:$0xff] }
  0xa9   :  { %1406 = vmatprep.mubr.f32.mxu1 %v539_v48  ;;  %v412_v43 = vld [vmem:[%s4038_s1 + $0xbe8] sm:$0xff]  ;;  %v2502_v52 = vpack.c.bf16 %v380_v30, %v379_v29  ;;  %v363_v37 = vld [vmem:[%s4038_s1 + $0xa60] sm:$0xff]  ;;  %v382_v44 = vld [vmem:[%s4038_s1 + $0xaf8] sm:$0xff] }
  0xaa   :  { %2485 = vmatpush3.bf16.msra.mxu0 %v2484_v49  ;;  %v364_v38 = vld [vmem:[%s4038_s1 + $0xa68] sm:$0xff]  ;;  %v395_v39 = vld [vmem:[%s4038_s1 + $0xb60] sm:$0xff]  ;;  %v2534_v13 = vpack.c.bf16 %v412_v43, %v411_v33  ;;  %v413_v45 = vld [vmem:[%s4038_s1 + $0xbf0] sm:$0xff]  ;;  %v2506_v49 = vpack.c.bf16 %v382_v44, %v381_v42 }
  0xab   :  { %2517 = vmatpush3.bf16.msra.mxu1 %v2516_v50  ;;  %2487 = vmatprep.subr.bf16.mxu0 %v2486_v51  ;;  %v396_v40 = vld [vmem:[%s4038_s1 + $0xb68] sm:$0xff]  ;;  %v414_v46 = vld [vmem:[%s4038_s1 + $0xbf8] sm:$0xff]  ;;  %v2504_v47 = vpack.c.bf16 %v364_v38, %v363_v37  ;;  %v365_v50 = vld [vmem:[%s4038_s1 + $0xa70] sm:$0xff] }
  0xac   :  { %2519 = vmatprep.subr.bf16.mxu1 %v2518_v55  ;;  %v2536_v48 = vpack.c.bf16 %v396_v40, %v395_v39  ;;  %v366_v51 = vld [vmem:[%s4038_s1 + $0xa78] sm:$0xff]  ;;  %v2538_v54 = vpack.c.bf16 %v414_v46, %v413_v45  ;;  %v397_v53 = vld [vmem:[%s4038_s1 + $0xb70] sm:$0xff]  ;;  %v415_v56 = vld [vmem:[%s4038_s1 + $0xc00] sm:$0xff] }
  0xad   :  { %v398_v32 = vld [vmem:[%s4038_s1 + $0xb78] sm:$0xff]  ;;  %v2508_v55 = vpack.c.bf16 %v366_v51, %v365_v50  ;;  %v416_v41 = vld [vmem:[%s4038_s1 + $0xc08] sm:$0xff]  ;;  %v419_v63 = vld [vmem:[%s4038_s1 + $0xc20] sm:$0xff] }
  0xae   :  { %2489 = vmatpush3.bf16.msra.mxu0 %v2488_v60  ;;  %v2540_v57 = vpack.c.bf16 %v398_v32, %v397_v53  ;;  %v2543_v58 = vpack.c.bf16 %v416_v41, %v415_v56  ;;  %v417_v60 = vld [vmem:[%s4038_s1 + $0xc10] sm:$0xff]  ;;  %v420_v0 = vld [vmem:[%s4038_s1 + $0xc28] sm:$0xff]  ;;  %v423_v4 = vld [vmem:[%s4038_s1 + $0xc40] sm:$0xff] }
  0xaf   :  { %2521 = vmatpush3.bf16.msra.mxu1 %v2520_v61  ;;  %2491 = vmatprep.subr.bf16.mxu0 %v2490_v62  ;;  %v418_v61 = vld [vmem:[%s4038_s1 + $0xc18] sm:$0xff]  ;;  %v424_v5 = vld [vmem:[%s4038_s1 + $0xc48] sm:$0xff]  ;;  %v425_v7 = vld [vmem:[%s4038_s1 + $0xc50] sm:$0xff] }
  0xb0   :  { %2523 = vmatprep.subr.bf16.mxu1 %v2522_v2  ;;  %v2546_v62 = vpack.c.bf16 %v418_v61, %v417_v60  ;;  %v422_v2 = vld [vmem:[%s4038_s1 + $0xc38] sm:$0xff]  ;;  %v2555_v6 = vpack.c.bf16 %v424_v5, %v423_v4  ;;  %v428_v10 = vld [vmem:[%s4038_s1 + $0xc68] sm:$0xff]  ;;  %v429_v14 = vld [vmem:[%s4038_s1 + $0xc70] sm:$0xff] }
  0xb1   :  { %v1630_v17 = vld.sshfl [vmem:[%s4037_s0 + $0x30] sm:$0x3 pattern:$0x76325410]  ;;  %v1522_v42 = vld [vmem:[%s4041_s4] sm:$0xff]  ;;  %v1523_v44 = vld [vmem:[%s4041_s4 + $0x8] sm:$0xff] }
  0xb2   :  { %2493 = vmatpush3.bf16.msra.mxu0 %v2492_v8  ;;  %v426_v8 = vld [vmem:[%s4038_s1 + $0xc58] sm:$0xff]  ;;  %v2567_v45 = vpack.c.bf16 %v1523_v44, %v1522_v42  ;;  %v1524_v46 = vld [vmem:[%s4041_s4 + $0x10] sm:$0xff]  ;;  %v1527_v53 = vld [vmem:[%s4041_s4 + $0x28] sm:$0xff] }
  0xb3   :  { %2525 = vmatpush3.bf16.msra.mxu1 %v2524_v9  ;;  %2495 = vmatprep.subr.bf16.mxu0 %v2494_v11  ;;  %v2558_v9 = vpack.c.bf16 %v426_v8, %v425_v7  ;;  %v427_v11 = vld [vmem:[%s4038_s1 + $0xc60] sm:$0xff]  ;;  %v1529_v60 = vld [vmem:[%s4041_s4 + $0x38] sm:$0xff]  ;;  %v1535_v4 = vld [vmem:[%s4041_s4 + $0x68] sm:$0xff] }
  0xb4   :  { %2527 = vmatprep.subr.bf16.mxu1 %v2526_v15  ;;  %v2561_v12 = vpack.c.bf16 %v428_v10, %v427_v11  ;;  %v430_v15 = vld [vmem:[%s4038_s1 + $0xc78] sm:$0xff] }
  0xb5   :  { %v2564_v16 = vpack.c.bf16 %v430_v15, %v429_v14  ;;  %v1537_v7 = vld [vmem:[%s4041_s4 + $0x78] sm:$0xff] }
  0xb6   :  { %2497 = vmatpush3.bf16.msra.mxu0 %v2496_v21 }
  0xb7   :  { %2529 = vmatpush3.bf16.msra.mxu1 %v2528_v22  ;;  %2499 = vmatprep.subr.bf16.mxu0 %v2498_v23 }
  0xb8   :  { %2531 = vmatprep.subr.bf16.mxu1 %v2530_v27 }
  0xba   :  { %2501 = vmatpush3.bf16.msra.mxu0 %v2500_v35 }
  0xbb   :  { %2533 = vmatpush3.bf16.msra.mxu1 %v2532_v36  ;;  %2503 = vmatprep.subr.bf16.mxu0 %v2502_v52 }
  0xbc   :  { %2535 = vmatprep.subr.bf16.mxu1 %v2534_v13 }
  0xbe   :  { %2505 = vmatpush3.bf16.msra.mxu0 %v2504_v47  ;;  %v1525_v47 = vld [vmem:[%s4041_s4 + $0x18] sm:$0xff] }
  0xbf   :  { %2537 = vmatpush3.bf16.msra.mxu1 %v2536_v48  ;;  %2507 = vmatprep.subr.bf16.mxu0 %v2506_v49  ;;  %v2570_v48 = vpack.c.bf16 %v1525_v47, %v1524_v46 }
  0xc0   :  { %2539 = vmatprep.subr.bf16.mxu1 %v2538_v54  ;;  %v1526_v54 = vld [vmem:[%s4041_s4 + $0x20] sm:$0xff] }
  0xc2   :  { %2509 = vmatpush3.bf16.msra.mxu0 %v2508_v55 }
  0xc3   :  { %2541 = vmatpush3.bf16.msra.mxu1 %v2540_v57  ;;  %2542 = vmatprep.subr.bf16.mxu0 %v2628_v59  ;;  %v2573_v57 = vpack.c.bf16 %v1527_v53, %v1526_v54  ;;  %v1632_v54 = vld [vmem:[%s4040_s3] ss:$0 sm:$0xff] }
  0xc4   :  { %2566 = vmatprep.subr.bf16.mxu1 %v2628_v59 }
  0xc5   :  { %1337 = vmatmul.mubr.f32.vlgmr.msra.gmra.mrb[10].mxu0 %v3726_v31  ;;  %v2549_v31 = vpack.c.bf16 %v420_v0, %v419_v63  ;;  %v1530_v63 = vld [vmem:[%s4041_s4 + $0x40] sm:$0xff]  ;;  %v1531_v0 = vld [vmem:[%s4041_s4 + $0x48] sm:$0xff] }
  0xc6   :  { %2544 = vmatpush3.bf16.msra.mxu0 %v2543_v58  ;;  %1407 = vmatmul.mubr.f32.vlgmr.msra.gmra.mrb[10].mxu1 %v3735_v34  ;;  %v421_v34 = vld [vmem:[%s4038_s1 + $0xc30] sm:$0xff] }
  0xc7   :  { %2545 = vmatprep.subr.bf16.mxu0 %v2628_v59  ;;  %2120 = vmatprep.mubr.msk.f32.mxu0 %vm2629_vm0, %v2630_v1  ;;  %v2552_v3 = vpack.c.bf16 %v422_v2, %v421_v34  ;;  %v1528_v58 = vld [vmem:[%s4041_s4 + $0x30] sm:$0xff]  ;;  %v1533_v34 = vld [vmem:[%s4041_s4 + $0x58] sm:$0xff] }
  0xc8   :  { %2155 = vmatprep.mubr.msk.f32.mxu1 %vm2629_vm0, %v2630_v1  ;;  %2568 = vmatpush3.bf16.msra.mxu1 %v2567_v45  ;;  %v2579_v1 = vpack.c.bf16 %v1531_v0, %v1530_v63 }
  0xc9   :  { %2569 = vmatprep.subr.bf16.mxu1 %v2628_v59 }
  0xca   :  { %2547 = vmatpush3.bf16.msra.mxu0 %v2546_v62  ;;  %v2576_v62 = vpack.c.bf16 %v1529_v60, %v1528_v58 }
  0xcb   :  { %2548 = vmatprep.subr.bf16.mxu0 %v2628_v59 }
  0xcc   :  { %2571 = vmatpush3.bf16.msra.mxu1 %v2570_v48 }
  0xcd   :  { %2572 = vmatprep.subr.bf16.mxu1 %v2628_v59 }
  0xce   :  { %2550 = vmatpush3.bf16.msra.mxu0 %v2549_v31  ;;  %v1532_v31 = vld [vmem:[%s4041_s4 + $0x50] sm:$0xff] }
  0xcf   :  { %2551 = vmatprep.subr.bf16.mxu0 %v2628_v59  ;;  %v2582_v2 = vpack.c.bf16 %v1533_v34, %v1532_v31 }
  0xd0   :  { %2574 = vmatpush3.bf16.msra.mxu1 %v2573_v57  ;;  %v1633_v57 = vld [vmem:[%s4042_s5] ss:$0 sm:$0xff] }
  0xd1   :  { %2575 = vmatprep.subr.bf16.mxu1 %v2628_v59 }
  0xd2   :  { %2553 = vmatpush3.bf16.msra.mxu0 %v2552_v3  ;;  %v1534_v3 = vld [vmem:[%s4041_s4 + $0x60] sm:$0xff] }
  0xd3   :  { %2554 = vmatprep.subr.bf16.mxu0 %v2628_v59  ;;  %v2585_v5 = vpack.c.bf16 %v1535_v4, %v1534_v3 }
  0xd4   :  { %2577 = vmatpush3.bf16.msra.mxu1 %v2576_v62 }
  0xd5   :  { %2578 = vmatprep.subr.bf16.mxu1 %v2628_v59 }
  0xd6   :  { %2556 = vmatpush3.bf16.msra.mxu0 %v2555_v6  ;;  %v1536_v6 = vld [vmem:[%s4041_s4 + $0x70] sm:$0xff] }
  0xd7   :  { %2557 = vmatprep.subr.bf16.mxu0 %v2628_v59  ;;  %v2588_v8 = vpack.c.bf16 %v1537_v7, %v1536_v6 }
  0xd8   :  { %2580 = vmatpush3.bf16.msra.mxu1 %v2579_v1 }
  0xd9   :  { %2581 = vmatprep.subr.bf16.mxu1 %v2628_v59 }
  0xda   :  { %2559 = vmatpush3.bf16.msra.mxu0 %v2558_v9 }
  0xdb   :  { %2560 = vmatprep.subr.bf16.mxu0 %v2628_v59 }
  0xdc   :  { %2583 = vmatpush3.bf16.msra.mxu1 %v2582_v2 }
  0xdd   :  { %2584 = vmatprep.subr.bf16.mxu1 %v2628_v59 }
  0xde   :  { %2562 = vmatpush3.bf16.msra.mxu0 %v2561_v12 }
  0xdf   :  { %2563 = vmatprep.subr.bf16.mxu0 %v2628_v59 }
  0xe0   :  { %2586 = vmatpush3.bf16.msra.mxu1 %v2585_v5 }
  0xe1   :  { %2587 = vmatprep.subr.bf16.mxu1 %v2628_v59 }
  0xe2   :  { %2565 = vmatpush3.bf16.msra.mxu0 %v2564_v16 }
  0xe4   :  { %2589 = vmatpush3.bf16.msra.mxu1 %v2588_v8 }
  0xe5   :  { %2121 = vmatmul.mubr.f32.vlgmr.msra.gmra.mrb[12].mxu0 %v1630_v17 }
  0xf8   :  { %v1666_v18 = vpop.f32.mrb[0].mxu0 }
  0xf9   :  { %v1701_v19 = vpop.f32.mrb[0].mxu1  ;;  %v1667_v20 = vpop.f32.mrb[1].mxu0 }
  0xfa   :  { %v1668_v21 = vadd.f32 %v1667_v20, %v1666_v18  ;;  %v1702_v22 = vpop.f32.mrb[1].mxu1 }
  0xfb   :  { %v1703_v23 = vadd.f32 %v1702_v22, %v1701_v19 }
  0xfd   :  { %v709_v24 = vadd.f32 %v1703_v23, %v1668_v21 }
 0x118   :  { %v1736_v25 = vpop.f32.mrb[2].mxu0 }
 0x119   :  { %v1737_v26 = vpop.f32.mrb[3].mxu0  ;;  %v1771_v27 = vpop.f32.mrb[2].mxu1 }
 0x11a   :  { %v1738_v28 = vadd.f32 %v1737_v26, %v1736_v25  ;;  %v1772_v29 = vpop.f32.mrb[3].mxu1 }
 0x11b   :  { %v1773_v30 = vadd.f32 %v1772_v29, %v1771_v27 }
 0x11c   :  { %v779_v33 = vadd.f32 %v1738_v28, %v709_v24 }
 0x11e   :  { %v849_v43 = vadd.f32 %v1773_v30, %v779_v33 }
 0x138   :  { %v1806_v35 = vpop.f32.mrb[4].mxu0 }
 0x139   :  { %v1807_v36 = vpop.f32.mrb[5].mxu0  ;;  %v1841_v52 = vpop.f32.mrb[4].mxu1 }
 0x13a   :  { %v1808_v37 = vadd.f32 %v1807_v36, %v1806_v35  ;;  %v1842_v38 = vpop.f32.mrb[5].mxu1 }
 0x13b   :  { %v1843_v39 = vadd.f32 %v1842_v38, %v1841_v52 }
 0x13c   :  { %v919_v13 = vadd.f32 %v1808_v37, %v849_v43 }
 0x13e   :  { %v989_v40 = vadd.f32 %v1843_v39, %v919_v13 }
 0x158   :  { %v1876_v49 = vpop.f32.mrb[6].mxu0 }
 0x159   :  { %v1877_v50 = vpop.f32.mrb[7].mxu0  ;;  %v1911_v51 = vpop.f32.mrb[6].mxu1 }
 0x15a   :  { %v1878_v32 = vadd.f32 %v1877_v50, %v1876_v49  ;;  %v1912_v55 = vpop.f32.mrb[7].mxu1  ;;  %v1631_v50 = vld [vmem:[%s4039_s2] ss:$0 sm:$0xff]  ;;  %s2603_s2 = scalar_lea.vmem %s1623_s29, 32 }
 0x15b   :  { %v1913_v56 = vadd.f32 %v1912_v55, %v1911_v51  ;;  %p2604_p0 = scmp.ne.s32.totalorder %s1623_s29, %s2603_s2  ;;  %p2609_p2 = scmp.lt.s32.totalorder %s2603_s2, %s2603_s2 }
 0x15c   :  { %v1059_v41 = vadd.f32 %v1878_v32, %v989_v40 }
 0x15d   :  { %p2610_p3 = por %p2609_p2, %p2608_p1 }
 0x15e   :  { %v1129_v61 = vadd.f32 %v1913_v56, %v1059_v41 }
 0x15f   :  { %p2611_p4 = pnand %p2610_p3, %p2604_p0 }
 0x178   :  { %v1946_v9 = vpop.f32.mrb[8].mxu0 }
 0x179   :  { %v1947_v11 = vpop.f32.mrb[9].mxu0  ;;  %v1981_v10 = vpop.f32.mrb[8].mxu1 }
 0x17a   :  { %v1948_v12 = vadd.f32 %v1947_v11, %v1946_v9  ;;  %v1982_v14 = vpop.f32.mrb[9].mxu1 }
 0x17b   :  { %v1983_v15 = vadd.f32 %v1982_v14, %v1981_v10 }
 0x17c   :  { %v1199_v16 = vadd.f32 %v1948_v12, %v1129_v61 }
 0x17e   :  { %v1269_v17 = vadd.f32 %v1983_v15, %v1199_v16 }
 0x198   :  { %v2016_v18 = vpop.f32.mrb[10].mxu0 }
 0x199   :  { %v2017_v19 = vpop.f32.mrb[11].mxu0  ;;  %v2051_v20 = vpop.f32.mrb[10].mxu1 }
 0x19a   :  { %v2018_v21 = vadd.f32 %v2017_v19, %v2016_v18  ;;  %v2052_v22 = vpop.f32.mrb[11].mxu1 }
 0x19b   :  { %v2053_v23 = vadd.f32 %v2052_v22, %v2051_v20 }
 0x19c   :  { %v1339_v24 = vadd.f32 %v2018_v21, %v1269_v17 }
 0x19e   :  { %v1409_v25 = vadd.f32 %v2053_v23, %v1339_v24 }
 0x1b8   :  { %v1478_v26 = vpop.f32.mrb[12].mxu0 }
 0x1b9   :  { %v1479_v59 = vadd.f32 %v1478_v26, %v1409_v25  ;;  %v2122_v27 = vpop.f32.mrb[13].mxu0 }
 0x1bb   :  { %v1483_v28 = vsel %vm1482_vm1, %v1479_v59, 0.0 }
 0x1bc   :  { %v1484_v29 = vrot.slane %v1483_v28, 4 }
 0x1be   :  { %v1485_v30 = vadd.f32 %v1484_v29, %v1483_v28 }
 0x1c0   :  { %v1486_v33 = vrot.slane %v1485_v30, 2 }
 0x1c2   :  { %v1487_v43 = vadd.f32 %v1486_v33, %v1485_v30 }
 0x1c4   :  { %v1488_v35 = vrot.slane %v1487_v43, 1 }
 0x1c6   :  { %v1489_v36 = vadd.f32 %v1488_v35, %v1487_v43 }
 0x1c8   :  { %v1491_v52 = vmul.f32 0.5, %v1489_v36 }
 0x1ca   :  { %v1492_v37 = vsub.f32 %v1479_v59, %v1491_v52 }
 0x1cc   :  { %v1493_v38 = vmul.f32 %v1492_v37, %v1492_v37 }
 0x1ce   :  { %v1494_v39 = vsel %vm1482_vm1, %v1493_v38, 0.0 }
 0x1cf   :  { %v1495_v13 = vrot.slane %v1494_v39, 4 }
 0x1d1   :  { %v1496_v40 = vadd.f32 %v1495_v13, %v1494_v39 }
 0x1d3   :  { %v1497_v42 = vrot.slane %v1496_v40, 2 }
 0x1d5   :  { %v1498_v44 = vadd.f32 %v1497_v42, %v1496_v40 }
 0x1d7   :  { %v1499_v45 = vrot.slane %v1498_v44, 1 }
 0x1d9   :  { %v1500_v46 = vadd.f32 %v1499_v45, %v1498_v44 }
 0x1db   :  { %v1501_v47 = vmul.f32 0.5, %v1500_v46 }
 0x1dd   :  { %v1502_v48 = vadd.f32 1e-05, %v1501_v47 }
 0x1df   :  { %2601 = vrsqrt.f32 %v1502_v48 }
 0x1e9   :  { %v2602_v49 = vpop.eup %2601 }
 0x1ea   :  { %v1504_v51 = vmul.f32 %v2602_v49, %v1492_v37 }
 0x1ec   :  { %v1512_v53 = vmul.f32 %v1631_v50, %v1504_v51 }
 0x1ee   :  { %v1520_v32 = vadd.f32 %v1632_v54, %v1512_v53 }
 0x1f0   :  { %v1521_v55 = vmax.f32 %v1520_v32, 0.0 }
 0x1f2   :  { %2156 = vmatmul.mubr.f32.vlgmr.msra.gmra.mrb[12].mxu1 %v1521_v55 }
 0x2c5   :  { %v1611_v56 = vpop.f32.mrb[12].mxu1 }
 0x2c6   :  { %v1612_v41 = vadd.f32 %v1633_v57, %v1611_v56  ;;  %v2157_v58 = vpop.f32.mrb[13].mxu1 }
 0x2c8   :  { %1615 = vst [vmem:[#allocation2] sm:$0x3] %v1612_v41 }
 0x2c9   :  { %2614 = shalt.err (!%p2611_p4)
}
 0x2ca   :  { %s2615_s7 = scalar_lea.hbm %s4043_s6, 32 }
 0x2cb   :  { %p2616_p5 = scmp.ne.s32.totalorder %s4043_s6, %s2615_s7  ;;  %p2619_p6 = scmp.lt.u32.totalorder %s2615_s7, %s4043_s6 }
 0x2cd   :  { %p2621_p7 = pnand %p2619_p6, %p2616_p5 }
 0x2cf   :  { %2624 = shalt.err (!%p2621_p7)
}
 0x2d0   :  { %1625 = dma.vmem_to_hbm [thread:$0]  %s1623_s29, 32, %s4043_s6, [#allocation3]  }
 0x2d1   :  { %2625 = dma.done.wait [#allocation3], 32  }
 0x2d2   :  { %2626 = vsyncadd [#allocation3], 4294967264 }
 0x2d3   :  { %1629 = vsyncpa [#allocation3], 1 }

</bundles_post_ra>
